<compile_context>
chip_gen: v7x
topology: tpu7x:2x2x1
jax: 0.10.0
libtpu: 0.0.40
codegen_flags: <defaults>
</compile_context>

<pallas_src>
import functools
import math

import jax
import jax.numpy as jnp
from jax.experimental import pallas as pl
from jax.experimental.pallas import tpu as pltpu

# ---------------- config (small, consistent with module defaults scaled down) ----------------
B = 2
IMG_C, IMG_H, IMG_W = 3, 16, 16
PATCH = 2
NUM_PATCHES = (IMG_H // PATCH) * (IMG_W // PATCH)   # 64  (vq.num_patches)
SEQ = NUM_PATCHES
DIM = 128
VOCAB = 256
N_HEADS = 2
D_HEAD = 64
INNER = N_HEADS * D_HEAD                            # 128
DEPTH = 2
MULT = 4
FFN = DIM * MULT                                    # 512
MASK_TOKEN_ID = VOCAB
EPS = 1e-5                                          # F.layer_norm default eps
M_TOTAL = B * SEQ                                   # 128 total token rows


# ---------------- Pallas kernel: fused BiDirectionalTransformer body ----------------
def _layernorm(h, gamma):
    # one-pass layernorm, f32 accumulation (beta buffer is zeros in the reference module)
    mu = jnp.mean(h, axis=-1, keepdims=True)
    msq = jnp.mean(h * h, axis=-1, keepdims=True)
    var = msq - mu * mu
    return (h - mu) * jax.lax.rsqrt(var + EPS) * gamma


def transformer_kernel(bb, x_ref, g_init_ref, ln1_ref, wqkv_ref, wo_ref, ln2_ref,
                       w1_ref, w2_ref, g_fin_ref, wvoc_ref, o_ref, xres_ref):
    # One grid step = one transformer layer for one batch block of bb*SEQ rows.
    # Residual stream is carried across layer steps in the f32 VMEM scratch xres_ref.
    l = pl.program_id(1)

    @pl.when(l == 0)
    def _():
        # input embeddings (+pos enc) arrive in f32; init_norm in f32
        xres_ref[...] = _layernorm(x_ref[...].astype(jnp.float32), g_init_ref[...])

    x = xres_ref[...]                                   # (M, DIM) f32 residual stream

    # --- attention block (pre-norm, bias-free projections) ---
    h_bf = _layernorm(x, ln1_ref[0]).astype(jnp.bfloat16)
    # fused QKV: one (M,128)x(128,384) matmul; 1/sqrt(d_head) pre-folded into the Q lanes
    qkv = jnp.dot(h_bf, wqkv_ref[0], preferred_element_type=jnp.float32)     # (M, 3*INNER) f32
    pv_heads = []
    for hh in range(N_HEADS):                           # static head loop on lane slices
        q = qkv[:, hh * D_HEAD:(hh + 1) * D_HEAD]
        k = qkv[:, INNER + hh * D_HEAD:INNER + (hh + 1) * D_HEAD]
        v = qkv[:, 2 * INNER + hh * D_HEAD:2 * INNER + (hh + 1) * D_HEAD]
        q3 = q.reshape(bb, SEQ, D_HEAD).astype(jnp.bfloat16)
        k3 = k.reshape(bb, SEQ, D_HEAD).astype(jnp.bfloat16)
        v3 = v.reshape(bb, SEQ, D_HEAD).astype(jnp.bfloat16)
        s = jnp.einsum('bqd,bkd->bqk', q3, k3,
                       preferred_element_type=jnp.float32)                   # (bb, S, S) f32
        m = jnp.max(s, axis=-1, keepdims=True)
        p = jnp.exp(s - m)
        denom = jnp.sum(p, axis=-1, keepdims=True)
        p = p * pl.reciprocal(denom, approx=True)                            # EUP divide
        pv = jnp.einsum('bqk,bkd->bqd', p.astype(jnp.bfloat16), v3,
                        preferred_element_type=jnp.float32)                  # (bb, S, d_head)
        pv_heads.append(pv.reshape(bb * SEQ, D_HEAD))
    # fused output projection: lane-concat heads -> single K=128 matmul + one residual add
    pv_all = jnp.concatenate(pv_heads, axis=-1).astype(jnp.bfloat16)         # (M, INNER)
    x = x + jnp.dot(pv_all, wo_ref[0], preferred_element_type=jnp.float32)

    # --- feed-forward block (pre-norm) ---
    h_bf = _layernorm(x, ln2_ref[0]).astype(jnp.bfloat16)
    f = jnp.dot(h_bf, w1_ref[0], preferred_element_type=jnp.float32)         # (M, FFN) f32
    f = jax.nn.gelu(f, approximate=True)                # TODO(synk): PyTorch default is exact erf
    x = x + jnp.dot(f.astype(jnp.bfloat16), w2_ref[0],
                    preferred_element_type=jnp.float32)

    xres_ref[...] = x                                   # carry residual to next layer step

    @pl.when(l == pl.num_programs(1) - 1)
    def _():
        xo = _layernorm(x, g_fin_ref[...])              # final_norm
        logits = jnp.dot(xo.astype(jnp.bfloat16), wvoc_ref[...],
                         preferred_element_type=jnp.float32)                 # (M, VOCAB)
        o_ref[...] = logits.astype(o_ref.dtype)


def bidirectional_transformer(emb, params):
    """emb: (B, S, D) f32 = input_proj(x) + pos_enc. Returns logits (B, S, VOCAB) f32."""
    # Single batch block on all generations: with M = B*S = 128, splitting across v7x's two
    # TensorCores would halve MXU sublane feed per core and duplicate the weight DMA.
    bb = B
    m_block = bb * SEQ
    n_blocks = B // bb
    x2d = emb.astype(jnp.float32).reshape(M_TOTAL, DIM)     # keep f32 into init_norm

    # advisory cost estimate for XLA scheduling around the custom call
    flops = DEPTH * (
        2 * M_TOTAL * DIM * (3 * INNER)                     # fused QKV projection
        + 2 * B * N_HEADS * (2 * SEQ * SEQ * D_HEAD)        # scores + PV
        + 2 * M_TOTAL * INNER * DIM                         # fused output projection
        + 2 * 2 * M_TOTAL * DIM * FFN                       # FFN up + down
    ) + 2 * M_TOTAL * DIM * VOCAB                           # vocab projection
    transcendentals = DEPTH * (B * N_HEADS * SEQ * SEQ + M_TOTAL * FFN)
    weight_bytes = 2 * (DEPTH * DIM * 3 * INNER
                        + DEPTH * INNER * DIM
                        + 2 * DEPTH * DIM * FFN
                        + DIM * VOCAB)
    ln_bytes = 4 * (2 * DIM + 2 * DEPTH * DIM)
    bytes_accessed = 4 * M_TOTAL * DIM + weight_bytes + ln_bytes + 4 * M_TOTAL * VOCAB

    out = pl.pallas_call(
        functools.partial(transformer_kernel, bb),
        out_shape=jax.ShapeDtypeStruct((M_TOTAL, VOCAB), jnp.float32),
        grid=(n_blocks, DEPTH),
        in_specs=[
            pl.BlockSpec((m_block, DIM), lambda b, l: (b, 0)),               # activations (f32)
            pl.BlockSpec((1, DIM), lambda b, l: (0, 0)),                     # init_norm gamma
            pl.BlockSpec((1, 1, DIM), lambda b, l: (l, 0, 0)),               # ln1 gamma (layer l)
            pl.BlockSpec((1, DIM, 3 * INNER), lambda b, l: (l, 0, 0)),       # fused QKV weights
            pl.BlockSpec((1, INNER, DIM), lambda b, l: (l, 0, 0)),           # fused out-proj
            pl.BlockSpec((1, 1, DIM), lambda b, l: (l, 0, 0)),               # ln2 gamma (layer l)
            pl.BlockSpec((1, DIM, FFN), lambda b, l: (l, 0, 0)),             # w1 (layer l)
            pl.BlockSpec((1, FFN, DIM), lambda b, l: (l, 0, 0)),             # w2 (layer l)
            pl.BlockSpec((1, DIM), lambda b, l: (0, 0)),                     # final_norm gamma
            pl.BlockSpec((DIM, VOCAB), lambda b, l: (0, 0)),                 # vocab projection
        ],
        out_specs=pl.BlockSpec((m_block, VOCAB), lambda b, l: (b, 0)),
        scratch_shapes=[pltpu.VMEM((m_block, DIM), jnp.float32)],            # residual stream
        compiler_params=pltpu.CompilerParams(
            dimension_semantics=("parallel", "arbitrary")),
        cost_estimate=pl.CostEstimate(flops=int(flops),
                                      transcendentals=int(transcendentals),
                                      bytes_accessed=int(bytes_accessed)),
    )(x2d, params["g_init"], params["ln1_g"], params["wqkv"], params["wo"],
      params["ln2_g"], params["w1"], params["w2"], params["g_final"], params["w_vocab"])
    return out.reshape(B, SEQ, VOCAB)


# ---------------- glue: parameter init, VQ stub, masking, loss ----------------
def trunc_normal(key, shape, std=0.02):
    return std * jax.random.truncated_normal(key, -2.0, 2.0, shape, jnp.float32)


def init_params(key):
    ks = jax.random.split(key, 9)
    bf = jnp.bfloat16
    scale = 1.0 / math.sqrt(D_HEAD)
    # fused QKV weights: [Q heads | K heads | V heads] along the output lanes;
    # attention scale folded into the Q lanes at init (f32, then cast once to bf16).
    wqkv = trunc_normal(ks[2], (DEPTH, DIM, 3 * INNER))
    wqkv = wqkv.at[:, :, :INNER].multiply(scale)
    return {
        "embedding": trunc_normal(ks[0], (VOCAB + 1, DIM)),          # input_proj (Embedding)
        "pos_enc": trunc_normal(ks[1], (1, NUM_PATCHES, DIM)),
        "g_init": jnp.ones((1, DIM), jnp.float32),
        "ln1_g": jnp.ones((DEPTH, 1, DIM), jnp.float32),
        "wqkv": wqkv.astype(bf),
        "wo": trunc_normal(ks[3], (DEPTH, INNER, DIM)).astype(bf),
        "ln2_g": jnp.ones((DEPTH, 1, DIM), jnp.float32),
        "w1": trunc_normal(ks[4], (DEPTH, DIM, FFN)).astype(bf),
        "w2": trunc_normal(ks[5], (DEPTH, FFN, DIM)).astype(bf),
        "g_final": jnp.ones((1, DIM), jnp.float32),
        "w_vocab": trunc_normal(ks[6], (DIM, VOCAB)).astype(bf),     # final Linear, bias=False
        "codebook": trunc_normal(ks[7], (IMG_C * PATCH * PATCH, VOCAB)),  # VQ stub codebook
    }


def vq_encode_imgs(imgs, codebook):
    # imgs: NCHW. Patchify to (B, num_patches, C*P*P) then nearest-code (argmax) tokenization.
    b, c, h, w = imgs.shape
    p = PATCH
    x = imgs.reshape(b, c, h // p, p, w // p, p)
    x = x.transpose(0, 2, 4, 1, 3, 5).reshape(b, (h // p) * (w // p), c * p * p)
    return jnp.argmax(x @ codebook, axis=-1).astype(jnp.int32)


def cosine_schedule(t):
    return jnp.cos(t * math.pi / 2)


def fill_mask(x, key):
    b, n = x.shape
    k1, k2 = jax.random.split(key)
    timesteps = jax.random.uniform(k1, (b,))
    num_tokens_masked = jnp.maximum(cosine_schedule(timesteps) * n, 1.0).astype(jnp.int32)
    randm_perm = jnp.argsort(jax.random.uniform(k2, (b, n)), axis=-1)
    mask = randm_perm < num_tokens_masked[:, None]
    tgt = jnp.where(mask, x, -1)                       # x.masked_fill(~mask, -1)
    x_masked = jnp.where(mask, MASK_TOKEN_ID, x)       # x.masked_fill(mask, mask_token_id)
    return x_masked, tgt, mask


def cross_entropy_ignore(logits, tgt, ignore_index=-1):
    # logits: (B, S, V), tgt: (B, S) with ignore_index entries skipped (mean over valid)
    valid = tgt != ignore_index
    tgt_safe = jnp.where(valid, tgt, 0)
    logp = jax.nn.log_softmax(logits, axis=-1)
    nll = -jnp.take_along_axis(logp, tgt_safe[..., None], axis=-1)[..., 0]
    return jnp.sum(jnp.where(valid, nll, 0.0)) / jnp.maximum(jnp.sum(valid), 1)


def maskgit_forward(imgs, params, key):
    ids = vq_encode_imgs(imgs, params["codebook"])                  # vq.encode_imgs
    x_masked, tgt, mask = fill_mask(ids, key)                       # fill_mask
    emb = params["embedding"][x_masked] + params["pos_enc"]         # input_proj + pos_enc
    logits = bidirectional_transformer(emb, params)                 # Pallas hot path
    loss = cross_entropy_ignore(logits, tgt)                        # training branch of forward
    return loss, logits


if __name__ == "__main__":
    root = jax.random.PRNGKey(0)
    k_img, k_param, k_mask = jax.random.split(root, 3)
    imgs = jax.random.uniform(k_img, (B, IMG_C, IMG_H, IMG_W), jnp.float32)
    params = init_params(k_param)

    loss, logits = jax.jit(maskgit_forward)(imgs, params, k_mask)
    jax.block_until_ready((loss, logits))
    assert logits.shape == (B, NUM_PATCHES, VOCAB)
    assert jnp.isfinite(loss)
    print("KERNEL_OK")
</pallas_src>

<mosaic_0001>
module attributes {stable_mosaic.version = 11 : i64} {
  func.func @transformer_kernel(%arg0: i32, %arg1: i32, %arg2: memref<128x128xf32, #tpu.memory_space<vmem>>, %arg3: memref<1x128xf32, #tpu.memory_space<vmem>>, %arg4: memref<1x1x128xf32, #tpu.memory_space<vmem>>, %arg5: memref<1x128x384xbf16, #tpu.memory_space<vmem>>, %arg6: memref<1x128x128xbf16, #tpu.memory_space<vmem>>, %arg7: memref<1x1x128xf32, #tpu.memory_space<vmem>>, %arg8: memref<1x128x512xbf16, #tpu.memory_space<vmem>>, %arg9: memref<1x512x128xbf16, #tpu.memory_space<vmem>>, %arg10: memref<1x128xf32, #tpu.memory_space<vmem>>, %arg11: memref<128x256xbf16, #tpu.memory_space<vmem>>, %arg12: memref<128x256xf32, #tpu.memory_space<vmem>>, %arg13: memref<128x128xf32, #tpu.memory_space<vmem>>) attributes {dimension_semantics = [#tpu.dimension_semantics<parallel>, #tpu.dimension_semantics<arbitrary>], iteration_bounds = array<i64: 1, 2>, scalar_prefetch = 0 : i64, scratch_operands = 1 : i64, tpu.core_type = #tpu.core_type<tc>, window_params = [{transform_indices = @transform_0, window_bounds = array<i64: 128, 128>}, {pipeline_mode = #tpu.pipeline_mode<synchronous>, transform_indices = @transform_1, window_bounds = array<i64: 1, 128>}, {transform_indices = @transform_2, window_bounds = array<i64: 1, 1, 128>}, {transform_indices = @transform_3, window_bounds = array<i64: 1, 128, 384>}, {transform_indices = @transform_4, window_bounds = array<i64: 1, 128, 128>}, {transform_indices = @transform_5, window_bounds = array<i64: 1, 1, 128>}, {transform_indices = @transform_6, window_bounds = array<i64: 1, 128, 512>}, {transform_indices = @transform_7, window_bounds = array<i64: 1, 512, 128>}, {pipeline_mode = #tpu.pipeline_mode<synchronous>, transform_indices = @transform_8, window_bounds = array<i64: 1, 128>}, {pipeline_mode = #tpu.pipeline_mode<synchronous>, transform_indices = @transform_9, window_bounds = array<i64: 128, 256>}, {transform_indices = @transform_10, window_bounds = array<i64: 128, 256>}]} {
    %c0_i32 = arith.constant 0 : i32
    %0 = arith.cmpi eq, %arg1, %c0_i32 : i32
    %1 = arith.extui %0 : i1 to i32
    %c0_i32_0 = arith.constant 0 : i32
    %2 = arith.cmpi ne, %1, %c0_i32_0 : i32
    scf.if %2 {
      %c0_48 = arith.constant 0 : index
      %c0_49 = arith.constant 0 : index
      %130 = vector.load %arg2[%c0_48, %c0_49] : memref<128x128xf32, #tpu.memory_space<vmem>>, vector<128x128xf32>
      %c0_50 = arith.constant 0 : index
      %c0_51 = arith.constant 0 : index
      %131 = vector.load %arg3[%c0_50, %c0_51] : memref<1x128xf32, #tpu.memory_space<vmem>>, vector<1x128xf32>
      %cst_52 = arith.constant dense<0.000000e+00> : vector<128xf32>
      %132 = vector.multi_reduction <add>, %130, %cst_52 [1] : vector<128x128xf32> to vector<128xf32>
      %133 = vector.shape_cast %132 : vector<128xf32> to vector<128x1xf32>
      %cst_53 = arith.constant 1.280000e+02 : f32
      %134 = vector.broadcast %cst_53 : f32 to vector<128x1xf32>
      %135 = arith.divf %133, %134 : vector<128x1xf32>
      %136 = arith.mulf %130, %130 : vector<128x128xf32>
      %cst_54 = arith.constant dense<0.000000e+00> : vector<128xf32>
      %137 = vector.multi_reduction <add>, %136, %cst_54 [1] : vector<128x128xf32> to vector<128xf32>
      %138 = vector.shape_cast %137 : vector<128xf32> to vector<128x1xf32>
      %cst_55 = arith.constant 1.280000e+02 : f32
      %139 = vector.broadcast %cst_55 : f32 to vector<128x1xf32>
      %140 = arith.divf %138, %139 : vector<128x1xf32>
      %141 = arith.mulf %135, %135 : vector<128x1xf32>
      %142 = arith.subf %140, %141 : vector<128x1xf32>
      %143 = vector.broadcast %135 : vector<128x1xf32> to vector<128x128xf32>
      %144 = arith.subf %130, %143 : vector<128x128xf32>
      %cst_56 = arith.constant 9.99999974E-6 : f32
      %145 = vector.broadcast %cst_56 : f32 to vector<128x1xf32>
      %146 = arith.addf %142, %145 : vector<128x1xf32>
      %147 = math.rsqrt %146 : vector<128x1xf32>
      %148 = vector.broadcast %147 : vector<128x1xf32> to vector<128x128xf32>
      %149 = arith.mulf %144, %148 : vector<128x128xf32>
      %150 = vector.broadcast %131 : vector<1x128xf32> to vector<128x128xf32>
      %151 = arith.mulf %149, %150 : vector<128x128xf32>
      %c0_57 = arith.constant 0 : index
      %c0_58 = arith.constant 0 : index
      %152 = vector.load %arg13[%c0_57, %c0_58] : memref<128x128xf32, #tpu.memory_space<vmem>>, vector<128x128xf32>
      tpu.vector_store %arg13[%c0_57, %c0_58], %151 {strides = array<i32>} : memref<128x128xf32, #tpu.memory_space<vmem>>, vector<128x128xf32>,
    } else {
    }
    %c0 = arith.constant 0 : index
    %c0_1 = arith.constant 0 : index
    %3 = vector.load %arg13[%c0, %c0_1] : memref<128x128xf32, #tpu.memory_space<vmem>>, vector<128x128xf32>
    %c0_2 = arith.constant 0 : index
    %c0_3 = arith.constant 0 : index
    %c0_4 = arith.constant 0 : index
    %4 = vector.load %arg4[%c0_2, %c0_3, %c0_4] : memref<1x1x128xf32, #tpu.memory_space<vmem>>, vector<1x1x128xf32>
    %5 = vector.shape_cast %4 : vector<1x1x128xf32> to vector<1x128xf32>
    %cst = arith.constant dense<0.000000e+00> : vector<128xf32>
    %6 = vector.multi_reduction <add>, %3, %cst [1] : vector<128x128xf32> to vector<128xf32>
    %7 = vector.shape_cast %6 : vector<128xf32> to vector<128x1xf32>
    %cst_5 = arith.constant 1.280000e+02 : f32
    %8 = vector.broadcast %cst_5 : f32 to vector<128x1xf32>
    %9 = arith.divf %7, %8 : vector<128x1xf32>
    %10 = arith.mulf %3, %3 : vector<128x128xf32>
    %cst_6 = arith.constant dense<0.000000e+00> : vector<128xf32>
    %11 = vector.multi_reduction <add>, %10, %cst_6 [1] : vector<128x128xf32> to vector<128xf32>
    %12 = vector.shape_cast %11 : vector<128xf32> to vector<128x1xf32>
    %cst_7 = arith.constant 1.280000e+02 : f32
    %13 = vector.broadcast %cst_7 : f32 to vector<128x1xf32>
    %14 = arith.divf %12, %13 : vector<128x1xf32>
    %15 = arith.mulf %9, %9 : vector<128x1xf32>
    %16 = arith.subf %14, %15 : vector<128x1xf32>
    %17 = vector.broadcast %9 : vector<128x1xf32> to vector<128x128xf32>
    %18 = arith.subf %3, %17 : vector<128x128xf32>
    %cst_8 = arith.constant 9.99999974E-6 : f32
    %19 = vector.broadcast %cst_8 : f32 to vector<128x1xf32>
    %20 = arith.addf %16, %19 : vector<128x1xf32>
    %21 = math.rsqrt %20 : vector<128x1xf32>
    %22 = vector.broadcast %21 : vector<128x1xf32> to vector<128x128xf32>
    %23 = arith.mulf %18, %22 : vector<128x128xf32>
    %24 = vector.broadcast %5 : vector<1x128xf32> to vector<128x128xf32>
    %25 = arith.mulf %23, %24 : vector<128x128xf32>
    %26 = arith.truncf %25 : vector<128x128xf32> to vector<128x128xbf16>
    %c0_9 = arith.constant 0 : index
    %c0_10 = arith.constant 0 : index
    %c0_11 = arith.constant 0 : index
    %27 = vector.load %arg5[%c0_9, %c0_10, %c0_11] : memref<1x128x384xbf16, #tpu.memory_space<vmem>>, vector<1x128x384xbf16>
    %28 = vector.shape_cast %27 : vector<1x128x384xbf16> to vector<128x384xbf16>
    %cst_12 = arith.constant dense<0.000000e+00> : vector<128x384xf32>
    %29 = tpu.matmul %26, %28, %cst_12 {dimension_numbers = #tpu.dot_dimension_numbers<[1], [0], [0], [1], [0, 0, 1, 1], [], []>} : vector<128x128xbf16>, vector<128x384xbf16>, vector<128x384xf32> -> vector<128x384xf32>
    %30 = vector.extract_strided_slice %29 {offsets = [0, 0], sizes = [128, 64], strides = [1, 1]} : vector<128x384xf32> to vector<128x64xf32>
    %31 = vector.extract_strided_slice %29 {offsets = [0, 128], sizes = [128, 64], strides = [1, 1]} : vector<128x384xf32> to vector<128x64xf32>
    %32 = vector.extract_strided_slice %29 {offsets = [0, 256], sizes = [128, 64], strides = [1, 1]} : vector<128x384xf32> to vector<128x64xf32>
    %33 = vector.shape_cast %30 : vector<128x64xf32> to vector<2x64x64xf32>
    %34 = arith.truncf %33 : vector<2x64x64xf32> to vector<2x64x64xbf16>
    %35 = vector.shape_cast %31 : vector<128x64xf32> to vector<2x64x64xf32>
    %36 = arith.truncf %35 : vector<2x64x64xf32> to vector<2x64x64xbf16>
    %37 = vector.shape_cast %32 : vector<128x64xf32> to vector<2x64x64xf32>
    %38 = arith.truncf %37 : vector<2x64x64xf32> to vector<2x64x64xbf16>
    "tpu.trace_start"() <{level = 10 : i32, message = "bqd,bkd->bqk"}> : () -> ()
    %cst_13 = arith.constant dense<0.000000e+00> : vector<2x64x64xf32>
    %39 = tpu.matmul %34, %36, %cst_13 {dimension_numbers = #tpu.dot_dimension_numbers<[2], [2], [1], [1], [0, 0, 0, 1, 1, 1], [0], [0]>} : vector<2x64x64xbf16>, vector<2x64x64xbf16>, vector<2x64x64xf32> -> vector<2x64x64xf32>
    "tpu.trace_stop"() : () -> ()
    %cst_14 = arith.constant dense<0xFF800000> : vector<2x64xf32>
    %40 = vector.multi_reduction <maximumf>, %39, %cst_14 [2] : vector<2x64x64xf32> to vector<2x64xf32>
    %41 = vector.shape_cast %40 : vector<2x64xf32> to vector<2x64x1xf32>
    %42 = vector.broadcast %41 : vector<2x64x1xf32> to vector<2x64x64xf32>
    %43 = arith.subf %39, %42 : vector<2x64x64xf32>
    %44 = math.exp %43 : vector<2x64x64xf32>
    %cst_15 = arith.constant dense<0.000000e+00> : vector<2x64xf32>
    %45 = vector.multi_reduction <add>, %44, %cst_15 [2] : vector<2x64x64xf32> to vector<2x64xf32>
    %46 = vector.shape_cast %45 : vector<2x64xf32> to vector<2x64x1xf32>
    %47 = tpu.reciprocal %46 {approx = true} : vector<2x64x1xf32> -> vector<2x64x1xf32>
    %48 = vector.broadcast %47 : vector<2x64x1xf32> to vector<2x64x64xf32>
    %49 = arith.mulf %44, %48 : vector<2x64x64xf32>
    %50 = arith.truncf %49 : vector<2x64x64xf32> to vector<2x64x64xbf16>
    "tpu.trace_start"() <{level = 10 : i32, message = "bqk,bkd->bqd"}> : () -> ()
    %cst_16 = arith.constant dense<0.000000e+00> : vector<2x64x64xf32>
    %51 = tpu.matmul %50, %38, %cst_16 {dimension_numbers = #tpu.dot_dimension_numbers<[2], [1], [1], [2], [0, 0, 0, 1, 1, 2], [0], [0]>} : vector<2x64x64xbf16>, vector<2x64x64xbf16>, vector<2x64x64xf32> -> vector<2x64x64xf32>
    "tpu.trace_stop"() : () -> ()
    %52 = vector.shape_cast %51 : vector<2x64x64xf32> to vector<128x64xf32>
    %53 = vector.extract_strided_slice %29 {offsets = [0, 64], sizes = [128, 64], strides = [1, 1]} : vector<128x384xf32> to vector<128x64xf32>
    %54 = vector.extract_strided_slice %29 {offsets = [0, 192], sizes = [128, 64], strides = [1, 1]} : vector<128x384xf32> to vector<128x64xf32>
    %55 = vector.extract_strided_slice %29 {offsets = [0, 320], sizes = [128, 64], strides = [1, 1]} : vector<128x384xf32> to vector<128x64xf32>
    %56 = vector.shape_cast %53 : vector<128x64xf32> to vector<2x64x64xf32>
    %57 = arith.truncf %56 : vector<2x64x64xf32> to vector<2x64x64xbf16>
    %58 = vector.shape_cast %54 : vector<128x64xf32> to vector<2x64x64xf32>
    %59 = arith.truncf %58 : vector<2x64x64xf32> to vector<2x64x64xbf16>
    %60 = vector.shape_cast %55 : vector<128x64xf32> to vector<2x64x64xf32>
    %61 = arith.truncf %60 : vector<2x64x64xf32> to vector<2x64x64xbf16>
    "tpu.trace_start"() <{level = 10 : i32, message = "bqd,bkd->bqk"}> : () -> ()
    %cst_17 = arith.constant dense<0.000000e+00> : vector<2x64x64xf32>
    %62 = tpu.matmul %57, %59, %cst_17 {dimension_numbers = #tpu.dot_dimension_numbers<[2], [2], [1], [1], [0, 0, 0, 1, 1, 1], [0], [0]>} : vector<2x64x64xbf16>, vector<2x64x64xbf16>, vector<2x64x64xf32> -> vector<2x64x64xf32>
    "tpu.trace_stop"() : () -> ()
    %cst_18 = arith.constant dense<0xFF800000> : vector<2x64xf32>
    %63 = vector.multi_reduction <maximumf>, %62, %cst_18 [2] : vector<2x64x64xf32> to vector<2x64xf32>
    %64 = vector.shape_cast %63 : vector<2x64xf32> to vector<2x64x1xf32>
    %65 = vector.broadcast %64 : vector<2x64x1xf32> to vector<2x64x64xf32>
    %66 = arith.subf %62, %65 : vector<2x64x64xf32>
    %67 = math.exp %66 : vector<2x64x64xf32>
    %cst_19 = arith.constant dense<0.000000e+00> : vector<2x64xf32>
    %68 = vector.multi_reduction <add>, %67, %cst_19 [2] : vector<2x64x64xf32> to vector<2x64xf32>
    %69 = vector.shape_cast %68 : vector<2x64xf32> to vector<2x64x1xf32>
    %70 = tpu.reciprocal %69 {approx = true} : vector<2x64x1xf32> -> vector<2x64x1xf32>
    %71 = vector.broadcast %70 : vector<2x64x1xf32> to vector<2x64x64xf32>
    %72 = arith.mulf %67, %71 : vector<2x64x64xf32>
    %73 = arith.truncf %72 : vector<2x64x64xf32> to vector<2x64x64xbf16>
    "tpu.trace_start"() <{level = 10 : i32, message = "bqk,bkd->bqd"}> : () -> ()
    %cst_20 = arith.constant dense<0.000000e+00> : vector<2x64x64xf32>
    %74 = tpu.matmul %73, %61, %cst_20 {dimension_numbers = #tpu.dot_dimension_numbers<[2], [1], [1], [2], [0, 0, 0, 1, 1, 2], [0], [0]>} : vector<2x64x64xbf16>, vector<2x64x64xbf16>, vector<2x64x64xf32> -> vector<2x64x64xf32>
    "tpu.trace_stop"() : () -> ()
    %75 = vector.shape_cast %74 : vector<2x64x64xf32> to vector<128x64xf32>
    %76 = tpu.concatenate %52, %75 in 1 : vector<128x64xf32>, vector<128x64xf32> -> vector<128x128xf32>
    %77 = arith.truncf %76 : vector<128x128xf32> to vector<128x128xbf16>
    %c0_21 = arith.constant 0 : index
    %c0_22 = arith.constant 0 : index
    %c0_23 = arith.constant 0 : index
    %78 = vector.load %arg6[%c0_21, %c0_22, %c0_23] : memref<1x128x128xbf16, #tpu.memory_space<vmem>>, vector<1x128x128xbf16>
    %79 = vector.shape_cast %78 : vector<1x128x128xbf16> to vector<128x128xbf16>
    %cst_24 = arith.constant dense<0.000000e+00> : vector<128x128xf32>
    %80 = tpu.matmul %77, %79, %cst_24 {dimension_numbers = #tpu.dot_dimension_numbers<[1], [0], [0], [1], [0, 0, 1, 1], [], []>} : vector<128x128xbf16>, vector<128x128xbf16>, vector<128x128xf32> -> vector<128x128xf32>
    %81 = arith.addf %3, %80 : vector<128x128xf32>
    %c0_25 = arith.constant 0 : index
    %c0_26 = arith.constant 0 : index
    %c0_27 = arith.constant 0 : index
    %82 = vector.load %arg7[%c0_25, %c0_26, %c0_27] : memref<1x1x128xf32, #tpu.memory_space<vmem>>, vector<1x1x128xf32>
    %83 = vector.shape_cast %82 : vector<1x1x128xf32> to vector<1x128xf32>
    %cst_28 = arith.constant dense<0.000000e+00> : vector<128xf32>
    %84 = vector.multi_reduction <add>, %81, %cst_28 [1] : vector<128x128xf32> to vector<128xf32>
    %85 = vector.shape_cast %84 : vector<128xf32> to vector<128x1xf32>
    %cst_29 = arith.constant 1.280000e+02 : f32
    %86 = vector.broadcast %cst_29 : f32 to vector<128x1xf32>
    %87 = arith.divf %85, %86 : vector<128x1xf32>
    %88 = arith.mulf %81, %81 : vector<128x128xf32>
    %cst_30 = arith.constant dense<0.000000e+00> : vector<128xf32>
    %89 = vector.multi_reduction <add>, %88, %cst_30 [1] : vector<128x128xf32> to vector<128xf32>
    %90 = vector.shape_cast %89 : vector<128xf32> to vector<128x1xf32>
    %cst_31 = arith.constant 1.280000e+02 : f32
    %91 = vector.broadcast %cst_31 : f32 to vector<128x1xf32>
    %92 = arith.divf %90, %91 : vector<128x1xf32>
    %93 = arith.mulf %87, %87 : vector<128x1xf32>
    %94 = arith.subf %92, %93 : vector<128x1xf32>
    %95 = vector.broadcast %87 : vector<128x1xf32> to vector<128x128xf32>
    %96 = arith.subf %81, %95 : vector<128x128xf32>
    %cst_32 = arith.constant 9.99999974E-6 : f32
    %97 = vector.broadcast %cst_32 : f32 to vector<128x1xf32>
    %98 = arith.addf %94, %97 : vector<128x1xf32>
    %99 = math.rsqrt %98 : vector<128x1xf32>
    %100 = vector.broadcast %99 : vector<128x1xf32> to vector<128x128xf32>
    %101 = arith.mulf %96, %100 : vector<128x128xf32>
    %102 = vector.broadcast %83 : vector<1x128xf32> to vector<128x128xf32>
    %103 = arith.mulf %101, %102 : vector<128x128xf32>
    %104 = arith.truncf %103 : vector<128x128xf32> to vector<128x128xbf16>
    %c0_33 = arith.constant 0 : index
    %c0_34 = arith.constant 0 : index
    %c0_35 = arith.constant 0 : index
    %105 = vector.load %arg8[%c0_33, %c0_34, %c0_35] : memref<1x128x512xbf16, #tpu.memory_space<vmem>>, vector<1x128x512xbf16>
    %106 = vector.shape_cast %105 : vector<1x128x512xbf16> to vector<128x512xbf16>
    %cst_36 = arith.constant dense<0.000000e+00> : vector<128x512xf32>
    %107 = tpu.matmul %104, %106, %cst_36 {dimension_numbers = #tpu.dot_dimension_numbers<[1], [0], [0], [1], [0, 0, 1, 1], [], []>} : vector<128x128xbf16>, vector<128x512xbf16>, vector<128x512xf32> -> vector<128x512xf32>
    %108 = arith.mulf %107, %107 : vector<128x512xf32>
    %109 = arith.mulf %107, %108 : vector<128x512xf32>
    %cst_37 = arith.constant 4.471500e-02 : f32
    %110 = vector.broadcast %cst_37 : f32 to vector<128x512xf32>
    %111 = arith.mulf %110, %109 : vector<128x512xf32>
    %112 = arith.addf %107, %111 : vector<128x512xf32>
    %cst_38 = arith.constant 0.797884583 : f32
    %113 = vector.broadcast %cst_38 : f32 to vector<128x512xf32>
    %114 = arith.mulf %113, %112 : vector<128x512xf32>
    %115 = math.tanh %114 : vector<128x512xf32>
    %cst_39 = arith.constant 1.000000e+00 : f32
    %116 = vector.broadcast %cst_39 : f32 to vector<128x512xf32>
    %117 = arith.addf %116, %115 : vector<128x512xf32>
    %cst_40 = arith.constant 5.000000e-01 : f32
    %118 = vector.broadcast %cst_40 : f32 to vector<128x512xf32>
    %119 = arith.mulf %118, %117 : vector<128x512xf32>
    %120 = arith.mulf %107, %119 : vector<128x512xf32>
    %121 = arith.truncf %120 : vector<128x512xf32> to vector<128x512xbf16>
    %c0_41 = arith.constant 0 : index
    %c0_42 = arith.constant 0 : index
    %c0_43 = arith.constant 0 : index
    %122 = vector.load %arg9[%c0_41, %c0_42, %c0_43] : memref<1x512x128xbf16, #tpu.memory_space<vmem>>, vector<1x512x128xbf16>
    %123 = vector.shape_cast %122 : vector<1x512x128xbf16> to vector<512x128xbf16>
    %cst_44 = arith.constant dense<0.000000e+00> : vector<128x128xf32>
    %124 = tpu.matmul %121, %123, %cst_44 {dimension_numbers = #tpu.dot_dimension_numbers<[1], [0], [0], [1], [0, 0, 1, 1], [], []>} : vector<128x512xbf16>, vector<512x128xbf16>, vector<128x128xf32> -> vector<128x128xf32>
    %125 = arith.addf %81, %124 : vector<128x128xf32>
    %c0_45 = arith.constant 0 : index
    %c0_46 = arith.constant 0 : index
    %126 = vector.load %arg13[%c0_45, %c0_46] : memref<128x128xf32, #tpu.memory_space<vmem>>, vector<128x128xf32>
    tpu.vector_store %arg13[%c0_45, %c0_46], %125 {strides = array<i32>} : memref<128x128xf32, #tpu.memory_space<vmem>>, vector<128x128xf32>,
    %c1_i32 = arith.constant 1 : i32
    %127 = arith.cmpi eq, %arg1, %c1_i32 : i32
    %128 = arith.extui %127 : i1 to i32
    %c0_i32_47 = arith.constant 0 : i32
    %129 = arith.cmpi ne, %128, %c0_i32_47 : i32
    scf.if %129 {
      %c0_48 = arith.constant 0 : index
      %c0_49 = arith.constant 0 : index
      %130 = vector.load %arg10[%c0_48, %c0_49] : memref<1x128xf32, #tpu.memory_space<vmem>>, vector<1x128xf32>
      %cst_50 = arith.constant dense<0.000000e+00> : vector<128xf32>
      %131 = vector.multi_reduction <add>, %125, %cst_50 [1] : vector<128x128xf32> to vector<128xf32>
      %132 = vector.shape_cast %131 : vector<128xf32> to vector<128x1xf32>
      %cst_51 = arith.constant 1.280000e+02 : f32
      %133 = vector.broadcast %cst_51 : f32 to vector<128x1xf32>
      %134 = arith.divf %132, %133 : vector<128x1xf32>
      %135 = arith.mulf %125, %125 : vector<128x128xf32>
      %cst_52 = arith.constant dense<0.000000e+00> : vector<128xf32>
      %136 = vector.multi_reduction <add>, %135, %cst_52 [1] : vector<128x128xf32> to vector<128xf32>
      %137 = vector.shape_cast %136 : vector<128xf32> to vector<128x1xf32>
      %cst_53 = arith.constant 1.280000e+02 : f32
      %138 = vector.broadcast %cst_53 : f32 to vector<128x1xf32>
      %139 = arith.divf %137, %138 : vector<128x1xf32>
      %140 = arith.mulf %134, %134 : vector<128x1xf32>
      %141 = arith.subf %139, %140 : vector<128x1xf32>
      %142 = vector.broadcast %134 : vector<128x1xf32> to vector<128x128xf32>
      %143 = arith.subf %125, %142 : vector<128x128xf32>
      %cst_54 = arith.constant 9.99999974E-6 : f32
      %144 = vector.broadcast %cst_54 : f32 to vector<128x1xf32>
      %145 = arith.addf %141, %144 : vector<128x1xf32>
      %146 = math.rsqrt %145 : vector<128x1xf32>
      %147 = vector.broadcast %146 : vector<128x1xf32> to vector<128x128xf32>
      %148 = arith.mulf %143, %147 : vector<128x128xf32>
      %149 = vector.broadcast %130 : vector<1x128xf32> to vector<128x128xf32>
      %150 = arith.mulf %148, %149 : vector<128x128xf32>
      %151 = arith.truncf %150 : vector<128x128xf32> to vector<128x128xbf16>
      %c0_55 = arith.constant 0 : index
      %c0_56 = arith.constant 0 : index
      %152 = vector.load %arg11[%c0_55, %c0_56] : memref<128x256xbf16, #tpu.memory_space<vmem>>, vector<128x256xbf16>
      %cst_57 = arith.constant dense<0.000000e+00> : vector<128x256xf32>
      %153 = tpu.matmul %151, %152, %cst_57 {dimension_numbers = #tpu.dot_dimension_numbers<[1], [0], [0], [1], [0, 0, 1, 1], [], []>} : vector<128x128xbf16>, vector<128x256xbf16>, vector<128x256xf32> -> vector<128x256xf32>
      %c0_58 = arith.constant 0 : index
      %c0_59 = arith.constant 0 : index
      %154 = vector.load %arg12[%c0_58, %c0_59] : memref<128x256xf32, #tpu.memory_space<vmem>>, vector<128x256xf32>
      tpu.vector_store %arg12[%c0_58, %c0_59], %153 {strides = array<i32>} : memref<128x256xf32, #tpu.memory_space<vmem>>, vector<128x256xf32>,
    } else {
    }
    return
  }
  func.func @transform_0(%arg0: i32, %arg1: i32) -> (i32, i32) {
    %c0_i32 = arith.constant 0 : i32
    %c0_i32_0 = arith.constant 0 : i32
    return %arg0, %c0_i32 : i32, i32
  }
  func.func @transform_1(%arg0: i32, %arg1: i32) -> (i32, i32) {
    %c0_i32 = arith.constant 0 : i32
    %c0_i32_0 = arith.constant 0 : i32
    %c0_i32_1 = arith.constant 0 : i32
    return %c0_i32, %c0_i32_0 : i32, i32
  }
  func.func @transform_2(%arg0: i32, %arg1: i32) -> (i32, i32, i32) {
    %c0_i32 = arith.constant 0 : i32
    %c0_i32_0 = arith.constant 0 : i32
    %c0_i32_1 = arith.constant 0 : i32
    return %arg1, %c0_i32, %c0_i32_0 : i32, i32, i32
  }
  func.func @transform_3(%arg0: i32, %arg1: i32) -> (i32, i32, i32) {
    %c0_i32 = arith.constant 0 : i32
    %c0_i32_0 = arith.constant 0 : i32
    %c0_i32_1 = arith.constant 0 : i32
    return %arg1, %c0_i32, %c0_i32_0 : i32, i32, i32
  }
  func.func @transform_4(%arg0: i32, %arg1: i32) -> (i32, i32, i32) {
    %c0_i32 = arith.constant 0 : i32
    %c0_i32_0 = arith.constant 0 : i32
    %c0_i32_1 = arith.constant 0 : i32
    return %arg1, %c0_i32, %c0_i32_0 : i32, i32, i32
  }
  func.func @transform_5(%arg0: i32, %arg1: i32) -> (i32, i32, i32) {
    %c0_i32 = arith.constant 0 : i32
    %c0_i32_0 = arith.constant 0 : i32
    %c0_i32_1 = arith.constant 0 : i32
    return %arg1, %c0_i32, %c0_i32_0 : i32, i32, i32
  }
  func.func @transform_6(%arg0: i32, %arg1: i32) -> (i32, i32, i32) {
    %c0_i32 = arith.constant 0 : i32
    %c0_i32_0 = arith.constant 0 : i32
    %c0_i32_1 = arith.constant 0 : i32
    return %arg1, %c0_i32, %c0_i32_0 : i32, i32, i32
  }
  func.func @transform_7(%arg0: i32, %arg1: i32) -> (i32, i32, i32) {
    %c0_i32 = arith.constant 0 : i32
    %c0_i32_0 = arith.constant 0 : i32
    %c0_i32_1 = arith.constant 0 : i32
    return %arg1, %c0_i32, %c0_i32_0 : i32, i32, i32
  }
  func.func @transform_8(%arg0: i32, %arg1: i32) -> (i32, i32) {
    %c0_i32 = arith.constant 0 : i32
    %c0_i32_0 = arith.constant 0 : i32
    %c0_i32_1 = arith.constant 0 : i32
    return %c0_i32, %c0_i32_0 : i32, i32
  }
  func.func @transform_9(%arg0: i32, %arg1: i32) -> (i32, i32) {
    %c0_i32 = arith.constant 0 : i32
    %c0_i32_0 = arith.constant 0 : i32
    %c0_i32_1 = arith.constant 0 : i32
    return %c0_i32, %c0_i32_0 : i32, i32
  }
  func.func @transform_10(%arg0: i32, %arg1: i32) -> (i32, i32) {
    %c0_i32 = arith.constant 0 : i32
    %c0_i32_0 = arith.constant 0 : i32
    return %arg0, %c0_i32 : i32, i32
  }
}

</mosaic_0001>

<bundles_post_ra>
// kernel: maskgit_forward.1
= control target key start
LH: loop header
LB: loop body
LE: loop exit
PB: predicated region body
PF: predicated region fallthrough
CT: control target
= control target key end

     0   :  { %s6457_s13 = smov 0   ;;  %s6459_s14 = smov 0   ;;  %s8694_s0 = inlined_call_operand.vmem [shape: f32[128,128], index: 0, kind: input, shape index: {}]   ;;  %s8695_s1 = inlined_call_operand.vmem [shape: f32[1,128], index: 1, kind: input, shape index: {}]   ;;  %s8696_s2 = inlined_call_operand.vmem [shape: f32[2,1,128], index: 2, kind: input, shape index: {}]   ;;  %s8697_s3 = inlined_call_operand.vmem [shape: bf16[2,128,384], index: 3, kind: input, shape index: {}]   ;;  %s8698_s4 = inlined_call_operand.vmem [shape: bf16[2,128,128], index: 4, kind: input, shape index: {}]   ;;  %s8699_s5 = inlined_call_operand.vmem [shape: f32[2,1,128], index: 5, kind: input, shape index: {}]   ;;  %s8700_s6 = inlined_call_operand.vmem [shape: bf16[2,128,512], index: 6, kind: input, shape index: {}]   ;;  %s8701_s7 = inlined_call_operand.vmem [shape: bf16[2,512,128], index: 7, kind: input, shape index: {}]   ;;  %s8702_s8 = inlined_call_operand.vmem [shape: f32[1,128], index: 8, kind: input, shape index: {}]   ;;  %s8703_s9 = inlined_call_operand.vmem [shape: bf16[128,256], index: 9, kind: input, shape index: {}]   ;;  %s8704_s10 = inlined_call_operand.vmem [shape: f32[128,256], index: 10, kind: output, shape index: {}]  }
   0x1   :  { %s6461_s15 = smov 0  }
   0x2 LB: > { %8717 = sst [smem:[#allocation3_spill]] %s6393_s14  ;;  %s29_s16 = sadd.s32 1, %s6393_s14  ;;  %s6397_s15 = sphi %s6461_s15, %s20_s15   ;;  %s6393_s14 = sphi %s6459_s14, %s8744_s14   ;;  %s6389_s13 = sphi %s6457_s13, %s8743_s13  }
   0x3   : > { %p5150_p0 = scmp.ge.s32.totalorder %s6397_s15, 1  ;;  %p30_p1 = scmp.ge.s32.totalorder %s29_s16, 2 }
   0x4   : > { %p381_p2 = scmp.lt.s32.totalorder %s6397_s15, 3 }
   0x5   : > { %s8746_s16 = smov (%p30_p1, %s29_s16), 0 }
   0x6   : > { %8718 = sst [smem:[#allocation4_spill]] %s8746_s16  ;;  %p382_p3 = pnand %p5150_p0, %p381_p2 }
   0x8   : > { %385 = sbr.rel (%p382_p3) target bundleno = 3614 (0xe1e), region = 60 }
   0xf   : > { %p452_p4 = scmp.lt.s32.totalorder %s6389_s13, 1  ;;  %p5158_p5 = scmp.ne.s32.totalorder %s6389_s13, 0 }
  0x10   : > { %v6516_v0 = vld [vmem:[%s8694_s0 + $0x10] sm:$0xff] (!%p5158_p5)  ;;  %v6521_v1 = vld [vmem:[%s8694_s0] sm:$0xff] (!%p5158_p5)  ;;  %v6528_v2 = vld [vmem:[%s8694_s0 + $0x18] sm:$0xff] (!%p5158_p5) }
  0x11   : > { %s6479_s17 = scalar_select %p452_p4, %s6389_s13, 1 }
  0x12   : > { %489 = sbr.rel (%p5158_p5) target bundleno = 243 (0xf3), region = 64  ;;  %511 = vadd.xlane.f32.xlu1 (!%p5158_p5), %v6516_v0  ;;  %507 = vadd.xlane.f32.xlu0 (!%p5158_p5), %v6521_v1  ;;  %v6533_v3 = vld [vmem:[%s8694_s0 + $0x8] sm:$0xff] (!%p5158_p5)  ;;  %v6545_v5 = vld [vmem:[%s8694_s0 + $0x20] sm:$0xff] (!%p5158_p5)  ;;  %v6552_v6 = vld [vmem:[%s8694_s0 + $0x38] sm:$0xff] (!%p5158_p5)  ;;  %v556_v17 = vmul.f32 (!%p5158_p5), %v6521_v1, %v6521_v1  ;;  %v559_v18 = vmul.f32 (!%p5158_p5), %v6528_v2, %v6528_v2  ;;  %v558_v19 = vmul.f32 (!%p5158_p5), %v6516_v0, %v6516_v0 }
  0x13   : > { %s5763_s21 = smul.u32 192, %s6479_s17  ;;  %s5312_s22 = sshll.u32 %s6479_s17, 6  ;;  %v6540_v4 = vld [vmem:[%s8694_s0 + $0x28] sm:$0xff] (!%p5158_p5)  ;;  %v6557_v7 = vld [vmem:[%s8694_s0 + $0x30] sm:$0xff] (!%p5158_p5)  ;;  %v6569_v9 = vld [vmem:[%s8694_s0 + $0x40] sm:$0xff] (!%p5158_p5)  ;;  %v557_v16 = vmul.f32 (!%p5158_p5), %v6533_v3, %v6533_v3  ;;  %v560_v21 = vmul.f32 (!%p5158_p5), %v6545_v5, %v6545_v5  ;;  %v563_v22 = vmul.f32 (!%p5158_p5), %v6552_v6, %v6552_v6 }
  0x14   : > { %s467_s25 = scalar_lea.vmem %s8699_s5, %s6479_s17  ;;  %s6499_s11 = scalar_lea.vmem %s8698_s4, %s5312_s22  ;;  %v6564_v8 = vld [vmem:[%s8694_s0 + $0x48] sm:$0xff] (!%p5158_p5)  ;;  %v6576_v10 = vld [vmem:[%s8694_s0 + $0x58] sm:$0xff] (!%p5158_p5)  ;;  %v6581_v11 = vld [vmem:[%s8694_s0 + $0x50] sm:$0xff] (!%p5158_p5)  ;;  %v561_v20 = vmul.f32 (!%p5158_p5), %v6540_v4, %v6540_v4  ;;  %v562_v23 = vmul.f32 (!%p5158_p5), %v6557_v7, %v6557_v7  ;;  %v564_v25 = vmul.f32 (!%p5158_p5), %v6569_v9, %v6569_v9 }
  0x15   : > { %s6494_s28 = scalar_lea.vmem %s8697_s3, %s5763_s21  ;;  %s5313_s12 = sshll.u32 %s6479_s17, 8  ;;  %v6588_v12 = vld [vmem:[%s8694_s0 + $0x68] sm:$0xff] (!%p5158_p5)  ;;  %v6593_v13 = vld [vmem:[%s8694_s0 + $0x60] sm:$0xff] (!%p5158_p5)  ;;  %v6600_v14 = vld [vmem:[%s8694_s0 + $0x78] sm:$0xff] (!%p5158_p5)  ;;  %v565_v24 = vmul.f32 (!%p5158_p5), %v6564_v8, %v6564_v8  ;;  %v567_v26 = vmul.f32 (!%p5158_p5), %v6576_v10, %v6576_v10  ;;  %v566_v27 = vmul.f32 (!%p5158_p5), %v6581_v11, %v6581_v11 }
  0x16   : > { %s6505_s20 = scalar_lea.vmem %s8700_s6, %s5313_s12  ;;  %s6510_s23 = scalar_lea.vmem %s8701_s7, %s5313_s12  ;;  %513 = vadd.xlane.f32.xlu1 (!%p5158_p5), %v6528_v2  ;;  %509 = vadd.xlane.f32.xlu0 (!%p5158_p5), %v6533_v3  ;;  %v6605_v15 = vld [vmem:[%s8694_s0 + $0x70] sm:$0xff] (!%p5158_p5)  ;;  %v569_v28 = vmul.f32 (!%p5158_p5), %v6588_v12, %v6588_v12  ;;  %v568_v29 = vmul.f32 (!%p5158_p5), %v6593_v13, %v6593_v13  ;;  %v571_v30 = vmul.f32 (!%p5158_p5), %v6600_v14, %v6600_v14 }
  0x17   : > { %v570_v31 = vmul.f32 (!%p5158_p5), %v6605_v15, %v6605_v15 }
  0x1a   : > { %517 = vadd.xlane.f32.xlu1 %v6540_v4  ;;  %515 = vadd.xlane.f32.xlu0 %v6545_v5 }
  0x1e   : > { %521 = vadd.xlane.f32.xlu1 %v6552_v6  ;;  %519 = vadd.xlane.f32.xlu0 %v6557_v7 }
  0x22   : > { %525 = vadd.xlane.f32.xlu1 %v6564_v8  ;;  %523 = vadd.xlane.f32.xlu0 %v6569_v9 }
  0x26   : > { %529 = vadd.xlane.f32.xlu1 %v6576_v10  ;;  %527 = vadd.xlane.f32.xlu0 %v6581_v11 }
  0x2a   : > { %533 = vadd.xlane.f32.xlu1 %v6588_v12  ;;  %531 = vadd.xlane.f32.xlu0 %v6593_v13 }
  0x2e   : > { %537 = vadd.xlane.f32.xlu1 %v6600_v14  ;;  %535 = vadd.xlane.f32.xlu0 %v6605_v15 }
  0x32   : > { %574 = vadd.xlane.f32.xlu1 %v557_v16  ;;  %572 = vadd.xlane.f32.xlu0 %v556_v17 }
  0x36   : > { %578 = vadd.xlane.f32.xlu1 %v559_v18  ;;  %576 = vadd.xlane.f32.xlu0 %v558_v19 }
  0x3a   : > { %582 = vadd.xlane.f32.xlu1 %v561_v20  ;;  %580 = vadd.xlane.f32.xlu0 %v560_v21 }
  0x3e   : > { %586 = vadd.xlane.f32.xlu1 %v563_v22  ;;  %584 = vadd.xlane.f32.xlu0 %v562_v23 }
  0x42   : > { %590 = vadd.xlane.f32.xlu1 %v565_v24  ;;  %588 = vadd.xlane.f32.xlu0 %v564_v25 }
  0x46   : > { %594 = vadd.xlane.f32.xlu1 %v567_v26  ;;  %592 = vadd.xlane.f32.xlu0 %v566_v27 }
  0x4a   : > { %598 = vadd.xlane.f32.xlu1 %v569_v28  ;;  %596 = vadd.xlane.f32.xlu0 %v568_v29 }
  0x4e   : > { %602 = vadd.xlane.f32.xlu1 %v571_v30  ;;  %600 = vadd.xlane.f32.xlu0 %v570_v31 }
  0x9f   : > { %v512_v32 = vpop.xlane.xlu1 %511  ;;  %v508_v33 = vpop.xlane.xlu0 %507 }
  0xa0   : > { %v6653_v48 = vmul.f32 0.0078125, %v508_v33  ;;  %v6657_v50 = vmul.f32 0.0078125, %v512_v32 }
  0xa2   : > { %v620_v54 = vmul.f32 %v6653_v48, %v6653_v48  ;;  %v622_v60 = vmul.f32 %v6657_v50, %v6657_v50 }
  0xa3   : > { %v514_v34 = vpop.xlane.xlu1 %513  ;;  %v510_v35 = vpop.xlane.xlu0 %509 }
  0xa4   : > { %v6655_v49 = vmul.f32 0.0078125, %v510_v35  ;;  %v6659_v51 = vmul.f32 0.0078125, %v514_v34 }
  0xa6   : > { %v621_v55 = vmul.f32 %v6655_v49, %v6655_v49  ;;  %v623_v61 = vmul.f32 %v6659_v51, %v6659_v51 }
  0xa7   : > { %v518_v36 = vpop.xlane.xlu1 %517  ;;  %v516_v37 = vpop.xlane.xlu0 %515 }
  0xa8   : > { %v6669_v62 = vmul.f32 0.0078125, %v518_v36  ;;  %v6671_v63 = vmul.f32 0.0078125, %v516_v37 }
  0xaa   : > { %v625_v25 = vmul.f32 %v6669_v62, %v6669_v62  ;;  %v624_v26 = vmul.f32 %v6671_v63, %v6671_v63 }
  0xab   : > { %v522_v38 = vpop.xlane.xlu1 %521  ;;  %v520_v39 = vpop.xlane.xlu0 %519 }
  0xac   : > { %v6673_v22 = vmul.f32 0.0078125, %v522_v38  ;;  %v6679_v27 = vmul.f32 0.0078125, %v520_v39 }
  0xae   : > { %v627_v34 = vmul.f32 %v6673_v22, %v6673_v22  ;;  %v626_v37 = vmul.f32 %v6679_v27, %v6679_v27 }
  0xaf   : > { %v526_v40 = vpop.xlane.xlu1 %525  ;;  %v524_v41 = vpop.xlane.xlu0 %523 }
  0xb0   : > { %v6685_v38 = vmul.f32 0.0078125, %v526_v40  ;;  %v6687_v39 = vmul.f32 0.0078125, %v524_v41  ;;  %v653_v40 = vsub.f32 %v6533_v3, %v6655_v49  ;;  %v657_v41 = vsub.f32 %v6540_v4, %v6669_v62 }
  0xb3   : > { %v6641_v42 = vpop.xlane.xlu1 %529  ;;  %v6643_v43 = vpop.xlane.xlu0 %527 }
  0xb7   : > { %v6645_v44 = vpop.xlane.xlu1 %533  ;;  %v6647_v45 = vpop.xlane.xlu0 %531 }
  0xbb   : > { %v6649_v46 = vpop.xlane.xlu1 %537  ;;  %v6651_v47 = vpop.xlane.xlu0 %535 }
  0xbf   : > { %v575_v52 = vpop.xlane.xlu1 %574  ;;  %v573_v53 = vpop.xlane.xlu0 %572 }
  0xc0   : > { %v605_v56 = vmul.f32 0.0078125, %v575_v52  ;;  %v604_v57 = vmul.f32 0.0078125, %v573_v53 }
  0xc2   : > { %v637_v58 = vsub.f32 %v605_v56, %v621_v55  ;;  %v636_v59 = vsub.f32 %v604_v57, %v620_v54 }
  0xc3   : > { %v579_v16 = vpop.xlane.xlu1 %578  ;;  %v577_v17 = vpop.xlane.xlu0 %576 }
  0xc4   : > { %v669_v18 = vadd.f32 1e-05, %v637_v58  ;;  %v668_v19 = vadd.f32 1e-05, %v636_v59  ;;  %v607_v20 = vmul.f32 0.0078125, %v579_v16  ;;  %v606_v21 = vmul.f32 0.0078125, %v577_v17 }
  0xc5   : > { %v654_v58 = vsub.f32 %v6516_v0, %v6657_v50  ;;  %v652_v59 = vsub.f32 %v6521_v1, %v6653_v48  ;;  %v629_v17 = vmul.f32 %v6685_v38, %v6685_v38  ;;  %v628_v0 = vmul.f32 %v6687_v39, %v6687_v39 }
  0xc6   : > { %5791 = vrsqrt.f32 %v669_v18  ;;  %v639_v23 = vsub.f32 %v607_v20, %v623_v61  ;;  %v638_v24 = vsub.f32 %v606_v21, %v622_v60  ;;  %v655_v60 = vsub.f32 %v6528_v2, %v6659_v51  ;;  %v6709_v2 = vld [vmem:[%s8695_s1] ss:$0 sm:$0xff] }
  0xc7   : > { %5793 = vrsqrt.f32 %v668_v19  ;;  %v583_v28 = vpop.xlane.xlu1 %582  ;;  %v581_v29 = vpop.xlane.xlu0 %580  ;;  %v6704_v1 = vmul.f32 0.0078125, %v6641_v42  ;;  %v6712_v19 = vmul.f32 0.0078125, %v6643_v43  ;;  %v6715_v42 = vmul.f32 0.0078125, %v6645_v44 }
  0xc8   : > { %v671_v30 = vadd.f32 1e-05, %v639_v23  ;;  %v670_v31 = vadd.f32 1e-05, %v638_v24  ;;  %v609_v32 = vmul.f32 0.0078125, %v583_v28  ;;  %v608_v33 = vmul.f32 0.0078125, %v581_v29 }
  0xc9   : > { %v6718_v20 = vmul.f32 0.0078125, %v6647_v45  ;;  %v631_v28 = vmul.f32 %v6704_v1, %v6704_v1 }
  0xca   : > { %5795 = vrsqrt.f32 %v671_v30  ;;  %v641_v35 = vsub.f32 %v609_v32, %v625_v25  ;;  %v640_v36 = vsub.f32 %v608_v33, %v624_v26  ;;  %v656_v26 = vsub.f32 %v6545_v5, %v6671_v63 }
  0xcb   : > { %5797 = vrsqrt.f32 %v670_v31  ;;  %v587_v52 = vpop.xlane.xlu1 %586  ;;  %v585_v53 = vpop.xlane.xlu0 %584  ;;  %v633_v5 = vmul.f32 %v6715_v42, %v6715_v42 }
  0xcc   : > { %v673_v54 = vadd.f32 1e-05, %v641_v35  ;;  %v672_v55 = vadd.f32 1e-05, %v640_v36  ;;  %v611_v56 = vmul.f32 0.0078125, %v587_v52  ;;  %v610_v57 = vmul.f32 0.0078125, %v585_v53 }
  0xcd   : > { %v630_v35 = vmul.f32 %v6712_v19, %v6712_v19 }
  0xce   : > { %5799 = vrsqrt.f32 %v673_v54  ;;  %v643_v61 = vsub.f32 %v611_v56, %v627_v34  ;;  %v642_v16 = vsub.f32 %v610_v57, %v626_v37  ;;  %v632_v37 = vmul.f32 %v6718_v20, %v6718_v20 }
  0xcf   : > { %5801 = vrsqrt.f32 %v672_v55  ;;  %v591_v3 = vpop.xlane.xlu1 %590  ;;  %v589_v4 = vpop.xlane.xlu0 %588  ;;  %v6733_v54 = vmul.f32 0.0078125, %v6649_v46 }
  0xd0   : > { %v5792_v48 = vpop.eup %5791  ;;  %v675_v49 = vadd.f32 1e-05, %v643_v61  ;;  %v674_v50 = vadd.f32 1e-05, %v642_v16  ;;  %v613_v51 = vmul.f32 0.0078125, %v591_v3  ;;  %v612_v62 = vmul.f32 0.0078125, %v589_v4 }
  0xd1   : > { %v5794_v18 = vpop.eup %5793  ;;  %v701_v21 = vmul.f32 %v5792_v48, %v653_v40  ;;  %v6740_v3 = vmul.f32 0.0078125, %v6651_v47 }
  0xd2   : > { %v700_v23 = vmul.f32 %v5794_v18, %v652_v59  ;;  %5803 = vrsqrt.f32 %v675_v49  ;;  %v645_v24 = vsub.f32 %v613_v51, %v629_v17  ;;  %v644_v25 = vsub.f32 %v612_v62, %v628_v0 }
  0xd3   : > { %v723_v43 = vmul.f32 %v6709_v2, %v701_v21  ;;  %5805 = vrsqrt.f32 %v674_v50  ;;  %v595_v29 = vpop.xlane.xlu1 %594  ;;  %v593_v44 = vpop.xlane.xlu0 %592  ;;  %v658_v51 = vsub.f32 %v6557_v7, %v6679_v27  ;;  %v635_v62 = vmul.f32 %v6733_v54, %v6733_v54 }
  0xd4   : > { %v5796_v30 = vpop.eup %5795  ;;  %v722_v45 = vmul.f32 %v6709_v2, %v700_v23  ;;  %v677_v31 = vadd.f32 1e-05, %v645_v24  ;;  %v676_v32 = vadd.f32 1e-05, %v644_v25  ;;  %v615_v33 = vmul.f32 0.0078125, %v595_v29 }
  0xd5   : > { %v5798_v34 = vpop.eup %5797  ;;  %739 = vst [vmem:[#allocation2 + $0x8] sm:$0xff] %v723_v43  ;;  %v703_v63 = vmul.f32 %v5796_v30, %v655_v60  ;;  %v614_v36 = vmul.f32 0.0078125, %v593_v44  ;;  %v661_v29 = vsub.f32 %v6564_v8, %v6685_v38  ;;  %v663_v8 = vsub.f32 %v6576_v10, %v6704_v1 }
  0xd6   : > { %738 = vst [vmem:[#allocation2] sm:$0xff] %v722_v45  ;;  %v702_v52 = vmul.f32 %v5798_v34, %v654_v58  ;;  %5807 = vrsqrt.f32 %v677_v31  ;;  %v647_v53 = vsub.f32 %v615_v33, %v631_v28  ;;  %v659_v58 = vsub.f32 %v6552_v6, %v6673_v22 }
  0xd7   : > { %v725_v55 = vmul.f32 %v6709_v2, %v703_v63  ;;  %5809 = vrsqrt.f32 %v676_v32  ;;  %v646_v56 = vsub.f32 %v614_v36, %v630_v35  ;;  %v599_v57 = vpop.xlane.xlu1 %598  ;;  %v597_v59 = vpop.xlane.xlu0 %596  ;;  %v660_v31 = vsub.f32 %v6569_v9, %v6687_v39 }
  0xd8   : > { %v5800_v40 = vpop.eup %5799  ;;  %v724_v60 = vmul.f32 %v6709_v2, %v702_v52  ;;  %v679_v61 = vadd.f32 1e-05, %v647_v53  ;;  %v617_v16 = vmul.f32 0.0078125, %v599_v57  ;;  %v616_v17 = vmul.f32 0.0078125, %v597_v59 }
  0xd9   : > { %v5802_v0 = vpop.eup %5801  ;;  %741 = vst [vmem:[#allocation2 + $0x18] sm:$0xff] %v725_v55  ;;  %v705_v46 = vmul.f32 %v5800_v40, %v657_v41  ;;  %v678_v4 = vadd.f32 1e-05, %v646_v56  ;;  %v662_v9 = vsub.f32 %v6581_v11, %v6712_v19  ;;  %v665_v55 = vsub.f32 %v6588_v12, %v6715_v42 }
  0xda   : > { %740 = vst [vmem:[#allocation2 + $0x10] sm:$0xff] %v724_v60  ;;  %v704_v48 = vmul.f32 %v5802_v0, %v656_v26  ;;  %5811 = vrsqrt.f32 %v679_v61  ;;  %v649_v49 = vsub.f32 %v617_v16, %v633_v5  ;;  %v648_v50 = vsub.f32 %v616_v17, %v632_v37 }
  0xdb   : > { %v727_v18 = vmul.f32 %v6709_v2, %v705_v46  ;;  %5813 = vrsqrt.f32 %v678_v4  ;;  %v603_v6 = vpop.xlane.xlu1 %602  ;;  %v601_v47 = vpop.xlane.xlu0 %600  ;;  %v634_v26 = vmul.f32 %v6740_v3, %v6740_v3  ;;  %v664_v1 = vsub.f32 %v6593_v13, %v6718_v20 }
  0xdc   : > { %v5804_v22 = vpop.eup %5803  ;;  %v726_v41 = vmul.f32 %v6709_v2, %v704_v48  ;;  %v681_v21 = vadd.f32 1e-05, %v649_v49  ;;  %v680_v23 = vadd.f32 1e-05, %v648_v50  ;;  %v619_v24 = vmul.f32 0.0078125, %v603_v6 }
  0xdd   : > { %v5806_v25 = vpop.eup %5805  ;;  %743 = vst [vmem:[#allocation2 + $0x28] sm:$0xff] %v727_v18  ;;  %v707_v7 = vmul.f32 %v5804_v22, %v659_v58  ;;  %v618_v27 = vmul.f32 0.0078125, %v601_v47  ;;  %v667_v40 = vsub.f32 %v6600_v14, %v6733_v54  ;;  %v666_v12 = vsub.f32 %v6605_v15, %v6740_v3 }
  0xde   : > { %742 = vst [vmem:[#allocation2 + $0x20] sm:$0xff] %v726_v41  ;;  %v706_v28 = vmul.f32 %v5806_v25, %v658_v51  ;;  %5815 = vrsqrt.f32 %v681_v21  ;;  %v651_v43 = vsub.f32 %v619_v24, %v635_v62 }
  0xdf   : > { %v729_v44 = vmul.f32 %v6709_v2, %v707_v7  ;;  %5817 = vrsqrt.f32 %v680_v23  ;;  %v650_v30 = vsub.f32 %v618_v27, %v634_v26 }
  0xe0   : > { %v5808_v45 = vpop.eup %5807  ;;  %v728_v32 = vmul.f32 %v6709_v2, %v706_v28  ;;  %v683_v33 = vadd.f32 1e-05, %v651_v43 }
  0xe1   : > { %v5810_v34 = vpop.eup %5809  ;;  %745 = vst [vmem:[#allocation2 + $0x38] sm:$0xff] %v729_v44  ;;  %v709_v35 = vmul.f32 %v5808_v45, %v661_v29  ;;  %v682_v5 = vadd.f32 1e-05, %v650_v30 }
  0xe2   : > { %744 = vst [vmem:[#allocation2 + $0x30] sm:$0xff] %v728_v32  ;;  %v708_v63 = vmul.f32 %v5810_v34, %v660_v31  ;;  %5819 = vrsqrt.f32 %v683_v33 }
  0xe3   : > { %v731_v38 = vmul.f32 %v6709_v2, %v709_v35  ;;  %5821 = vrsqrt.f32 %v682_v5 }
  0xe4   : > { %v5812_v36 = vpop.eup %5811  ;;  %v730_v39 = vmul.f32 %v6709_v2, %v708_v63 }
  0xe5   : > { %v5814_v37 = vpop.eup %5813  ;;  %747 = vst [vmem:[#allocation2 + $0x48] sm:$0xff] %v731_v38  ;;  %v711_v52 = vmul.f32 %v5812_v36, %v663_v8 }
  0xe6   : > { %746 = vst [vmem:[#allocation2 + $0x40] sm:$0xff] %v730_v39  ;;  %v710_v53 = vmul.f32 %v5814_v37, %v662_v9 }
  0xe7   : > { %v733_v56 = vmul.f32 %v6709_v2, %v711_v52 }
  0xe8   : > { %v5816_v10 = vpop.eup %5815  ;;  %v732_v57 = vmul.f32 %v6709_v2, %v710_v53 }
  0xe9   : > { %v5818_v59 = vpop.eup %5817  ;;  %749 = vst [vmem:[#allocation2 + $0x58] sm:$0xff] %v733_v56  ;;  %v713_v11 = vmul.f32 %v5816_v10, %v665_v55 }
  0xea   : > { %748 = vst [vmem:[#allocation2 + $0x50] sm:$0xff] %v732_v57  ;;  %v712_v19 = vmul.f32 %v5818_v59, %v664_v1 }
  0xeb   : > { %v735_v60 = vmul.f32 %v6709_v2, %v713_v11 }
  0xec   : > { %v5820_v61 = vpop.eup %5819  ;;  %v734_v42 = vmul.f32 %v6709_v2, %v712_v19 }
  0xed   : > { %v5822_v16 = vpop.eup %5821  ;;  %751 = vst [vmem:[#allocation2 + $0x68] sm:$0xff] %v735_v60  ;;  %v715_v13 = vmul.f32 %v5820_v61, %v667_v40 }
  0xee   : > { %750 = vst [vmem:[#allocation2 + $0x60] sm:$0xff] %v734_v42  ;;  %v714_v20 = vmul.f32 %v5822_v16, %v666_v12 }
  0xef   : > { %v737_v17 = vmul.f32 %v6709_v2, %v715_v13 }
  0xf0   : > { %v736_v0 = vmul.f32 %v6709_v2, %v714_v20 }
  0xf1   : > { %753 = vst [vmem:[#allocation2 + $0x78] sm:$0xff] %v737_v17 }
  0xf2   : > { %752 = vst [vmem:[#allocation2 + $0x70] sm:$0xff] %v736_v0 }
  0xf3 PF: > { %v6776_v14 = vld [vmem:[#allocation2] sm:$0xff]  ;;  %v6778_v54 = vld [vmem:[#allocation2 + $0x8] sm:$0xff]  ;;  %v6786_v2 = vld [vmem:[#allocation2 + $0x10] sm:$0xff]  ;;  %v6399_v10 = vmov 0   ;;  %s8719_s19 = scalar_lea.vmem %s8696_s2, %s6479_s17  ;;  %vm1404_vm0 = vcmask 523264   ;;  %s6400_s21 = smov 64  }
  0xf4   : > { %771 = vadd.xlane.f32.xlu0 %v6776_v14  ;;  %v820_v15 = vmul.f32 %v6776_v14, %v6776_v14  ;;  %v821_v58 = vmul.f32 %v6778_v54, %v6778_v54  ;;  %v6788_v3 = vld [vmem:[#allocation2 + $0x18] sm:$0xff]  ;;  %v5863_v46 = vld [vmem:[%s6494_s28 + $0x4] ss:$12 sps:$4 sm:$0xff]   ;;  %v5865_v4 = vld [vmem:[%s6494_s28] ss:$12 sps:$4 sm:$0xff]   ;;  %v822_v48 = vmul.f32 %v6786_v2, %v6786_v2  ;;  %1202 = vmatprep.mubr.bf16.mxu0 %v6399_v10  ;;  %p5290_p6 = scmp.ne.s32.totalorder %s6389_s13, 1 }
  0xf5   : > { %1170 = vmatprep.subr.bf16.mxu0 %v5863_v46  ;;  %v823_v49 = vmul.f32 %v6788_v3, %v6788_v3  ;;  %v6798_v50 = vld [vmem:[#allocation2 + $0x20] sm:$0xff]  ;;  %v6800_v51 = vld [vmem:[#allocation2 + $0x28] sm:$0xff]  ;;  %v5872_v21 = vld [vmem:[%s6494_s28 + $0x30] ss:$12 sps:$4 sm:$0xff]  }
  0xf6   : > { %836 = vadd.xlane.f32.xlu1 %v820_v15  ;;  %1171 = vmatpush1.bf16.msra.mxu0 %v5865_v4  ;;  %v5866_v62 = vld [vmem:[%s6494_s28 + $0x1c] ss:$12 sps:$4 sm:$0xff]   ;;  %v5868_v18 = vld [vmem:[%s6494_s28 + $0x18] ss:$12 sps:$4 sm:$0xff]   ;;  %v824_v6 = vmul.f32 %v6798_v50, %v6798_v50  ;;  %v5869_v47 = vld [vmem:[%s6494_s28 + $0x34] ss:$12 sps:$4 sm:$0xff]   ;;  %v825_v41 = vmul.f32 %v6800_v51, %v6800_v51 }
  0xf7   : > { %1172 = vmatprep.subr.bf16.mxu0 %v5866_v62  ;;  %v5871_v22 = vld [vmem:[%s6494_s28 + $0x8] ss:$12 sps:$4 sm:$0xff]   ;;  %v6815_v24 = vld [vmem:[#allocation2 + $0x38] sm:$0xff]  ;;  %v5875_v26 = vld [vmem:[%s6494_s28 + $0x20] ss:$12 sps:$4 sm:$0xff]  }
  0xf8   : > { %773 = vadd.xlane.f32.xlu0 %v6778_v54  ;;  %v6813_v23 = vld [vmem:[#allocation2 + $0x30] sm:$0xff]  ;;  %5539 = vmatprep.subr.bf16.mxu1 %v5871_v22  ;;  %v5873_v25 = vld [vmem:[%s6494_s28 + $0x4c] ss:$12 sps:$4 sm:$0xff]   ;;  %v827_v29 = vmul.f32 %v6815_v24, %v6815_v24  ;;  %v6829_v30 = vld [vmem:[#allocation2 + $0x40] sm:$0xff] }
  0xf9   : > { %5540 = vmatpush3.bf16.msra.mxu1 %v5871_v22  ;;  %v5876_v7 = vld [vmem:[%s6494_s28 + $0x48] ss:$12 sps:$4 sm:$0xff]   ;;  %v826_v27 = vmul.f32 %v6813_v23, %v6813_v23  ;;  %v5877_v28 = vld [vmem:[%s6494_s28 + $0x64] ss:$12 sps:$4 sm:$0xff]   ;;  %v5880_v44 = vld [vmem:[%s6494_s28 + $0x60] ss:$12 sps:$4 sm:$0xff]   ;;  %v828_v34 = vmul.f32 %v6829_v30, %v6829_v30 }
  0xfa   : > { %838 = vadd.xlane.f32.xlu1 %v821_v58  ;;  %1173 = vmatpush1.bf16.msra.mxu0 %v5868_v18  ;;  %v5879_v43 = vld [vmem:[%s6494_s28 + $0x38] ss:$12 sps:$4 sm:$0xff]   ;;  %v6831_v45 = vld [vmem:[#allocation2 + $0x48] sm:$0xff]  ;;  %v5883_v32 = vld [vmem:[%s6494_s28 + $0x50] ss:$12 sps:$4 sm:$0xff]  }
  0xfb   : > { %1174 = vmatprep.subr.bf16.mxu0 %v5869_v47  ;;  %5541 = vmatprep.subr.bf16.mxu1 %v5875_v26  ;;  %v5881_v31 = vld [vmem:[%s6494_s28 + $0x7c] ss:$12 sps:$4 sm:$0xff]   ;;  %v5884_v33 = vld [vmem:[%s6494_s28 + $0x78] ss:$12 sps:$4 sm:$0xff]   ;;  %v829_v35 = vmul.f32 %v6831_v45, %v6831_v45  ;;  %v5885_v5 = vld [vmem:[%s6494_s28 + $0x94] ss:$12 sps:$4 sm:$0xff]  }
  0xfc   : > { %775 = vadd.xlane.f32.xlu0 %v6786_v2  ;;  %v5887_v63 = vld [vmem:[%s6494_s28 + $0x68] ss:$12 sps:$4 sm:$0xff]   ;;  %v5888_v38 = vld [vmem:[%s6494_s28 + $0x90] ss:$12 sps:$4 sm:$0xff]   ;;  %v5889_v9 = vld [vmem:[%s6494_s28 + $0xac] ss:$12 sps:$4 sm:$0xff]  }
  0xfd   : > { %5542 = vmatpush3.bf16.msra.mxu1 %v5875_v26  ;;  %v6844_v8 = vld [vmem:[#allocation2 + $0x50] sm:$0xff]  ;;  %v6847_v36 = vld [vmem:[#allocation2 + $0x58] sm:$0xff]  ;;  %v5891_v39 = vld [vmem:[%s6494_s28 + $0x80] ss:$12 sps:$4 sm:$0xff]  }
  0xfe   : > { %777 = vadd.xlane.f32.xlu1 %v6788_v3  ;;  %1175 = vmatpush1.bf16.msra.mxu0 %v5872_v21  ;;  %v5892_v37 = vld [vmem:[%s6494_s28 + $0xa8] ss:$12 sps:$4 sm:$0xff]   ;;  %v830_v52 = vmul.f32 %v6844_v8, %v6844_v8  ;;  %v831_v53 = vmul.f32 %v6847_v36, %v6847_v36  ;;  %v5893_v55 = vld [vmem:[%s6494_s28 + $0x98] ss:$12 sps:$4 sm:$0xff]   ;;  %v5894_v57 = vld [vmem:[%s6494_s28 + $0xb0] ss:$12 sps:$4 sm:$0xff]  }
  0xff   : > { %1176 = vmatprep.subr.bf16.mxu0 %v5873_v25  ;;  %5543 = vmatprep.subr.bf16.mxu1 %v5879_v43  ;;  %v6859_v56 = vld [vmem:[#allocation2 + $0x60] sm:$0xff]  ;;  %v6862_v1 = vld [vmem:[#allocation2 + $0x68] sm:$0xff]  ;;  %v6871_v19 = vld [vmem:[#allocation2 + $0x70] sm:$0xff] }
 0x100   : > { %840 = vadd.xlane.f32.xlu0 %v822_v48  ;;  %v832_v59 = vmul.f32 %v6859_v56, %v6859_v56  ;;  %v833_v11 = vmul.f32 %v6862_v1, %v6862_v1  ;;  %v6873_v40 = vld [vmem:[#allocation2 + $0x78] sm:$0xff]  ;;  %v834_v60 = vmul.f32 %v6871_v19, %v6871_v19 }
 0x101   : > { %5544 = vmatpush3.bf16.msra.mxu1 %v5879_v43  ;;  %v835_v61 = vmul.f32 %v6873_v40, %v6873_v40 }
 0x102   : > { %842 = vadd.xlane.f32.xlu1 %v823_v49  ;;  %1177 = vmatpush1.bf16.msra.mxu0 %v5876_v7 }
 0x103   : > { %1178 = vmatprep.subr.bf16.mxu0 %v5877_v28  ;;  %5545 = vmatprep.subr.bf16.mxu1 %v5883_v32 }
 0x104   : > { %779 = vadd.xlane.f32.xlu0 %v6798_v50 }
 0x105   : > { %5546 = vmatpush3.bf16.msra.mxu1 %v5883_v32 }
 0x106   : > { %781 = vadd.xlane.f32.xlu1 %v6800_v51  ;;  %1179 = vmatpush1.bf16.msra.mxu0 %v5880_v44 }
 0x107   : > { %1180 = vmatprep.subr.bf16.mxu0 %v5881_v31  ;;  %5547 = vmatprep.subr.bf16.mxu1 %v5887_v63 }
 0x108   : > { %844 = vadd.xlane.f32.xlu0 %v824_v6 }
 0x109   : > { %5548 = vmatpush3.bf16.msra.mxu1 %v5887_v63 }
 0x10a   : > { %846 = vadd.xlane.f32.xlu1 %v825_v41  ;;  %1181 = vmatpush1.bf16.msra.mxu0 %v5884_v33 }
 0x10b   : > { %1182 = vmatprep.subr.bf16.mxu0 %v5885_v5  ;;  %5549 = vmatprep.subr.bf16.mxu1 %v5891_v39 }
 0x10c   : > { %783 = vadd.xlane.f32.xlu0 %v6813_v23 }
 0x10d   : > { %5550 = vmatpush3.bf16.msra.mxu1 %v5891_v39 }
 0x10e   : > { %785 = vadd.xlane.f32.xlu1 %v6815_v24  ;;  %1183 = vmatpush1.bf16.msra.mxu0 %v5888_v38 }
 0x10f   : > { %1184 = vmatprep.subr.bf16.mxu0 %v5889_v9  ;;  %5551 = vmatprep.subr.bf16.mxu1 %v5893_v55 }
 0x110   : > { %848 = vadd.xlane.f32.xlu0 %v826_v27 }
 0x111   : > { %5552 = vmatpush3.bf16.msra.mxu1 %v5893_v55 }
 0x112   : > { %850 = vadd.xlane.f32.xlu1 %v827_v29  ;;  %1185 = vmatpush1.bf16.msra.mxu0 %v5892_v37 }
 0x113   : > { %5553 = vmatprep.subr.bf16.mxu1 %v5894_v57 }
 0x114   : > { %787 = vadd.xlane.f32.xlu0 %v6829_v30 }
 0x115   : > { %5554 = vmatpush3.bf16.msra.mxu1 %v5894_v57 }
 0x116   : > { %789 = vadd.xlane.f32.xlu1 %v6831_v45 }
 0x118   : > { %852 = vadd.xlane.f32.xlu0 %v828_v34 }
 0x11a   : > { %854 = vadd.xlane.f32.xlu1 %v829_v35 }
 0x11c   : > { %791 = vadd.xlane.f32.xlu0 %v6844_v8 }
 0x11e   : > { %793 = vadd.xlane.f32.xlu1 %v6847_v36 }
 0x120   : > { %856 = vadd.xlane.f32.xlu0 %v830_v52 }
 0x122   : > { %858 = vadd.xlane.f32.xlu1 %v831_v53 }
 0x124   : > { %795 = vadd.xlane.f32.xlu0 %v6859_v56 }
 0x126   : > { %797 = vadd.xlane.f32.xlu1 %v6862_v1 }
 0x128   : > { %860 = vadd.xlane.f32.xlu0 %v832_v59 }
 0x12a   : > { %862 = vadd.xlane.f32.xlu1 %v833_v11 }
 0x12c   : > { %799 = vadd.xlane.f32.xlu0 %v6871_v19 }
 0x12e   : > { %801 = vadd.xlane.f32.xlu1 %v6873_v40 }
 0x130   : > { %864 = vadd.xlane.f32.xlu0 %v834_v60 }
 0x132   : > { %866 = vadd.xlane.f32.xlu1 %v835_v61 }
 0x181   : > { %v772_v12 = vpop.xlane.xlu0 %771 }
 0x182   : > { %v804_v42 = vmul.f32 0.0078125, %v772_v12 }
 0x183   : > { %v837_v16 = vpop.xlane.xlu1 %836 }
 0x184   : > { %v884_v13 = vmul.f32 %v804_v42, %v804_v42  ;;  %v868_v20 = vmul.f32 0.0078125, %v837_v16  ;;  %v916_v5 = vsub.f32 %v6776_v14, %v804_v42  ;;  %v6896_v14 = vld [vmem:[%s8719_s19] ss:$0 sm:$0xff] }
 0x185   : > { %v774_v17 = vpop.xlane.xlu0 %773 }
 0x186   : > { %v900_v0 = vsub.f32 %v868_v20, %v884_v13  ;;  %v805_v15 = vmul.f32 0.0078125, %v774_v17 }
 0x187   : > { %v839_v58 = vpop.xlane.xlu1 %838 }
 0x188   : > { %v932_v46 = vadd.f32 1e-05, %v900_v0  ;;  %v885_v4 = vmul.f32 %v805_v15, %v805_v15  ;;  %v869_v48 = vmul.f32 0.0078125, %v839_v58  ;;  %v917_v39 = vsub.f32 %v6778_v54, %v805_v15 }
 0x189   : > { %v776_v49 = vpop.xlane.xlu0 %775 }
 0x18a   : > { %5983 = vrsqrt.f32 %v932_v46  ;;  %v901_v62 = vsub.f32 %v869_v48, %v885_v4  ;;  %v806_v18 = vmul.f32 0.0078125, %v776_v49 }
 0x18b   : > { %v778_v6 = vpop.xlane.xlu1 %777 }
 0x18c   : > { %v933_v47 = vadd.f32 1e-05, %v901_v62  ;;  %v886_v22 = vmul.f32 %v806_v18, %v806_v18  ;;  %v807_v41 = vmul.f32 0.0078125, %v778_v6  ;;  %v918_v0 = vsub.f32 %v6786_v2, %v806_v18 }
 0x18d   : > { %v841_v21 = vpop.xlane.xlu0 %840 }
 0x18e   : > { %5985 = vrsqrt.f32 %v933_v47  ;;  %v870_v25 = vmul.f32 0.0078125, %v841_v21  ;;  %v887_v7 = vmul.f32 %v807_v41, %v807_v41  ;;  %v919_v49 = vsub.f32 %v6788_v3, %v807_v41 }
 0x18f   : > { %v843_v26 = vpop.xlane.xlu1 %842 }
 0x190   : > { %v902_v27 = vsub.f32 %v870_v25, %v886_v22  ;;  %v871_v28 = vmul.f32 0.0078125, %v843_v26 }
 0x191   : > { %v780_v43 = vpop.xlane.xlu0 %779 }
 0x192   : > { %v934_v29 = vadd.f32 1e-05, %v902_v27  ;;  %v903_v44 = vsub.f32 %v871_v28, %v887_v7  ;;  %v6881_v31 = vmul.f32 0.0078125, %v780_v43 }
 0x193   : > { %v782_v32 = vpop.xlane.xlu1 %781 }
 0x194   : > { %v5984_v33 = vpop.eup %5983  ;;  %5987 = vrsqrt.f32 %v934_v29  ;;  %v935_v34 = vadd.f32 1e-05, %v903_v44  ;;  %v888_v35 = vmul.f32 %v6881_v31, %v6881_v31  ;;  %v6886_v63 = vmul.f32 0.0078125, %v782_v32 }
 0x195   : > { %v845_v38 = vpop.xlane.xlu0 %844  ;;  %v964_v52 = vmul.f32 %v5984_v33, %v916_v5  ;;  %v920_v44 = vsub.f32 %v6798_v50, %v6881_v31 }
 0x196   : > { %5989 = vrsqrt.f32 %v935_v34  ;;  %v872_v9 = vmul.f32 0.0078125, %v845_v38  ;;  %v889_v55 = vmul.f32 %v6886_v63, %v6886_v63  ;;  %v921_v38 = vsub.f32 %v6800_v51, %v6886_v63 }
 0x197   : > { %v847_v37 = vpop.xlane.xlu1 %846  ;;  %v986_v16 = vmul.f32 %v6896_v14, %v964_v52 }
 0x198   : > { %v5986_v53 = vpop.eup %5985  ;;  %v904_v57 = vsub.f32 %v872_v9, %v888_v35  ;;  %v873_v59 = vmul.f32 0.0078125, %v847_v37 }
 0x199   : > { %v784_v11 = vpop.xlane.xlu0 %783  ;;  %v965_v60 = vmul.f32 %v5986_v53, %v917_v39 }
 0x19a   : > { %v936_v61 = vadd.f32 1e-05, %v904_v57  ;;  %v905_v12 = vsub.f32 %v873_v59, %v889_v55  ;;  %v6898_v42 = vmul.f32 0.0078125, %v784_v11 }
 0x19b   : > { %v786_v54 = vpop.xlane.xlu1 %785  ;;  %v987_v13 = vmul.f32 %v6896_v14, %v965_v60 }
 0x19c   : > { %5991 = vrsqrt.f32 %v936_v61  ;;  %v937_v20 = vadd.f32 1e-05, %v905_v12  ;;  %v890_v17 = vmul.f32 %v6898_v42, %v6898_v42  ;;  %v6905_v15 = vmul.f32 0.0078125, %v786_v54 }
 0x19d   : > { %v849_v58 = vpop.xlane.xlu0 %848  ;;  %v1002_v46 = vpack.c.bf16 %v987_v13, %v986_v16  ;;  %v922_v54 = vsub.f32 %v6813_v23, %v6898_v42 }
 0x19e   : > { %v5988_v4 = vpop.eup %5987  ;;  %5993 = vrsqrt.f32 %v937_v20  ;;  %v874_v48 = vmul.f32 0.0078125, %v849_v58  ;;  %v891_v22 = vmul.f32 %v6905_v15, %v6905_v15  ;;  %v923_v58 = vsub.f32 %v6815_v24, %v6905_v15 }
 0x19f   : > { %1203 = vmatmul.mubr.bf16.vlgmr.msra.gmra.mrb[0].mxu0 %v1002_v46  ;;  %5555 = vmatprep.mubr.bf16.mxu1 %v1002_v46  ;;  %v851_v62 = vpop.xlane.xlu1 %850  ;;  %v966_v6 = vmul.f32 %v5988_v4, %v918_v0 }
 0x1a0   : > { %v5990_v47 = vpop.eup %5989  ;;  %v906_v21 = vsub.f32 %v874_v48, %v890_v17  ;;  %v875_v25 = vmul.f32 0.0078125, %v851_v62  ;;  %1212 = vmatprep.mubr.bf16.mxu0 %v6399_v10 }
 0x1a1   : > { %v788_v2 = vpop.xlane.xlu0 %787  ;;  %v967_v18 = vmul.f32 %v5990_v47, %v919_v49  ;;  %v988_v3 = vmul.f32 %v6896_v14, %v966_v6 }
 0x1a2   : > { %v938_v26 = vadd.f32 1e-05, %v906_v21  ;;  %v907_v7 = vsub.f32 %v875_v25, %v891_v22  ;;  %v6911_v27 = vmul.f32 0.0078125, %v788_v2 }
 0x1a3   : > { %v790_v28 = vpop.xlane.xlu1 %789  ;;  %v989_v41 = vmul.f32 %v6896_v14, %v967_v18 }
 0x1a4   : > { %5995 = vrsqrt.f32 %v938_v26  ;;  %v939_v43 = vadd.f32 1e-05, %v907_v7  ;;  %v892_v29 = vmul.f32 %v6911_v27, %v6911_v27  ;;  %v6919_v32 = vmul.f32 0.0078125, %v790_v28 }
 0x1a5   : > { %v853_v33 = vpop.xlane.xlu0 %852  ;;  %v1003_v34 = vpack.c.bf16 %v989_v41, %v988_v3  ;;  %v924_v26 = vsub.f32 %v6829_v30, %v6911_v27 }
 0x1a6   : > { %v5992_v35 = vpop.eup %5991  ;;  %5997 = vrsqrt.f32 %v939_v43  ;;  %v876_v5 = vmul.f32 0.0078125, %v853_v33  ;;  %v893_v52 = vmul.f32 %v6919_v32, %v6919_v32 }
 0x1a7   : > { %1213 = vmatmul.mubr.bf16.gmra.mrb[4].mxu0 %v1003_v34  ;;  %5556 = vmatmul.mubr.bf16.vlgmr.msra.gmra.mrb[0].mxu1 %v1003_v34  ;;  %v855_v9 = vpop.xlane.xlu1 %854  ;;  %v968_v39 = vmul.f32 %v5992_v35, %v920_v44 }
 0x1a8   : > { %v5994_v37 = vpop.eup %5993  ;;  %v908_v53 = vsub.f32 %v876_v5, %v892_v29  ;;  %v877_v50 = vmul.f32 0.0078125, %v855_v9  ;;  %1222 = vmatprep.mubr.bf16.mxu0 %v6399_v10  ;;  %v925_v29 = vsub.f32 %v6831_v45, %v6919_v32 }
 0x1a9   : > { %v792_v31 = vpop.xlane.xlu0 %791  ;;  %v969_v55 = vmul.f32 %v5994_v37, %v921_v38  ;;  %v990_v51 = vmul.f32 %v6896_v14, %v968_v39 }
 0x1aa   : > { %v940_v57 = vadd.f32 1e-05, %v908_v53  ;;  %v909_v59 = vsub.f32 %v877_v50, %v893_v52  ;;  %v6926_v11 = vmul.f32 0.0078125, %v792_v31 }
 0x1ab   : > { %v794_v60 = vpop.xlane.xlu1 %793  ;;  %v991_v63 = vmul.f32 %v6896_v14, %v969_v55 }
 0x1ac   : > { %5999 = vrsqrt.f32 %v940_v57  ;;  %v941_v61 = vadd.f32 1e-05, %v909_v59  ;;  %v894_v12 = vmul.f32 %v6926_v11, %v6926_v11  ;;  %v6934_v16 = vmul.f32 0.0078125, %v794_v60 }
 0x1ad   : > { %v857_v13 = vpop.xlane.xlu0 %856  ;;  %v1004_v20 = vpack.c.bf16 %v991_v63, %v990_v51  ;;  %v926_v31 = vsub.f32 %v6844_v8, %v6926_v11 }
 0x1ae   : > { %v5996_v17 = vpop.eup %5995  ;;  %6001 = vrsqrt.f32 %v941_v61  ;;  %v878_v0 = vmul.f32 0.0078125, %v857_v13  ;;  %v895_v49 = vmul.f32 %v6934_v16, %v6934_v16  ;;  %v927_v63 = vsub.f32 %v6847_v36, %v6934_v16 }
 0x1af   : > { %1223 = vmatmul.mubr.bf16.gmra.mrb[8].mxu0 %v1004_v20  ;;  %5559 = vmatprep.mubr.bf16.mxu1 %v1004_v20  ;;  %v859_v46 = vpop.xlane.xlu1 %858  ;;  %v970_v4 = vmul.f32 %v5996_v17, %v922_v54 }
 0x1b0   : > { %v5998_v48 = vpop.eup %5997  ;;  %v910_v62 = vsub.f32 %v878_v0, %v894_v12  ;;  %v879_v23 = vmul.f32 0.0078125, %v859_v46  ;;  %1232 = vmatprep.mubr.bf16.mxu0 %v6399_v10 }
 0x1b1   : > { %v796_v42 = vpop.xlane.xlu0 %795  ;;  %v971_v6 = vmul.f32 %v5998_v48, %v923_v58  ;;  %v992_v24 = vmul.f32 %v6896_v14, %v970_v4 }
 0x1b2   : > { %v942_v47 = vadd.f32 1e-05, %v910_v62  ;;  %v911_v22 = vsub.f32 %v879_v23, %v895_v49  ;;  %v6941_v21 = vmul.f32 0.0078125, %v796_v42 }
 0x1b3   : > { %v798_v25 = vpop.xlane.xlu1 %797  ;;  %v993_v15 = vmul.f32 %v6896_v14, %v971_v6 }
 0x1b4   : > { %6003 = vrsqrt.f32 %v942_v47  ;;  %v943_v2 = vadd.f32 1e-05, %v911_v22  ;;  %v896_v18 = vmul.f32 %v6941_v21, %v6941_v21  ;;  %v817_v7 = vmul.f32 0.0078125, %v798_v25 }
 0x1b5   : > { %v861_v28 = vpop.xlane.xlu0 %860  ;;  %v1005_v3 = vpack.c.bf16 %v993_v15, %v992_v24  ;;  %v928_v36 = vsub.f32 %v6859_v56, %v6941_v21 }
 0x1b6   : > { %v6000_v41 = vpop.eup %5999  ;;  %6005 = vrsqrt.f32 %v943_v2  ;;  %v880_v43 = vmul.f32 0.0078125, %v861_v28  ;;  %v897_v35 = vmul.f32 %v817_v7, %v817_v7  ;;  %v929_v49 = vsub.f32 %v6862_v1, %v817_v7 }
 0x1b7   : > { %1233 = vmatmul.mubr.bf16.gmra.mrb[12].mxu0 %v1005_v3  ;;  %5560 = vmatmul.mubr.bf16.gmra.mrb[4].mxu1 %v1005_v3  ;;  %v863_v44 = vpop.xlane.xlu1 %862  ;;  %v972_v33 = vmul.f32 %v6000_v41, %v924_v26 }
 0x1b8   : > { %v6002_v34 = vpop.eup %6001  ;;  %v912_v5 = vsub.f32 %v880_v43, %v896_v18  ;;  %v881_v38 = vmul.f32 0.0078125, %v863_v44  ;;  %1242 = vmatprep.mubr.bf16.mxu0 %v6399_v10 }
 0x1b9   : > { %v800_v30 = vpop.xlane.xlu0 %799  ;;  %v973_v27 = vmul.f32 %v6002_v34, %v925_v29  ;;  %v994_v53 = vmul.f32 %v6896_v14, %v972_v33 }
 0x1ba   : > { %v944_v9 = vadd.f32 1e-05, %v912_v5  ;;  %v913_v39 = vsub.f32 %v881_v38, %v897_v35  ;;  %v818_v37 = vmul.f32 0.0078125, %v800_v30 }
 0x1bb   : > { %v802_v52 = vpop.xlane.xlu1 %801  ;;  %v995_v45 = vmul.f32 %v6896_v14, %v973_v27 }
 0x1bc   : > { %6007 = vrsqrt.f32 %v944_v9  ;;  %v945_v32 = vadd.f32 1e-05, %v913_v39  ;;  %v898_v50 = vmul.f32 %v818_v37, %v818_v37  ;;  %v819_v55 = vmul.f32 0.0078125, %v802_v52 }
 0x1bd   : > { %v865_v57 = vpop.xlane.xlu0 %864  ;;  %v1006_v59 = vpack.c.bf16 %v995_v45, %v994_v53  ;;  %v930_v22 = vsub.f32 %v6871_v19, %v818_v37 }
 0x1be   : > { %v6004_v60 = vpop.eup %6003  ;;  %6009 = vrsqrt.f32 %v945_v32  ;;  %v882_v51 = vmul.f32 0.0078125, %v865_v57  ;;  %v899_v13 = vmul.f32 %v819_v55, %v819_v55  ;;  %v931_v21 = vsub.f32 %v6873_v40, %v819_v55 }
 0x1bf   : > { %1243 = vmatmul.mubr.bf16.gmra.mrb[16].mxu0 %v1006_v59  ;;  %5563 = vmatprep.mubr.bf16.mxu1 %v1006_v59  ;;  %v867_v61 = vpop.xlane.xlu1 %866  ;;  %v974_v12 = vmul.f32 %v6004_v60, %v926_v31 }
 0x1c0   : > { %v6006_v54 = vpop.eup %6005  ;;  %v914_v20 = vsub.f32 %v882_v51, %v898_v50  ;;  %v883_v17 = vmul.f32 0.0078125, %v867_v61  ;;  %1252 = vmatprep.mubr.bf16.mxu0 %v6399_v10 }
 0x1c1   : > { %v975_v8 = vmul.f32 %v6006_v54, %v927_v63  ;;  %v996_v58 = vmul.f32 %v6896_v14, %v974_v12 }
 0x1c2   : > { %v946_v11 = vadd.f32 1e-05, %v914_v20  ;;  %v915_v0 = vsub.f32 %v883_v17, %v899_v13 }
 0x1c3   : > { %v997_v46 = vmul.f32 %v6896_v14, %v975_v8 }
 0x1c4   : > { %6011 = vrsqrt.f32 %v946_v11  ;;  %v947_v4 = vadd.f32 1e-05, %v915_v0 }
 0x1c5   : > { %v1007_v16 = vpack.c.bf16 %v997_v46, %v996_v58 }
 0x1c6   : > { %v6008_v48 = vpop.eup %6007  ;;  %6013 = vrsqrt.f32 %v947_v4 }
 0x1c7   : > { %1253 = vmatmul.mubr.bf16.gmra.mrb[20].mxu0 %v1007_v16  ;;  %5564 = vmatmul.mubr.bf16.gmra.mrb[8].mxu1 %v1007_v16  ;;  %v976_v62 = vmul.f32 %v6008_v48, %v928_v36 }
 0x1c8   : > { %v6010_v23 = vpop.eup %6009  ;;  %1262 = vmatprep.mubr.bf16.mxu0 %v6399_v10 }
 0x1c9   : > { %v977_v42 = vmul.f32 %v6010_v23, %v929_v49  ;;  %v998_v6 = vmul.f32 %v6896_v14, %v976_v62 }
 0x1cb   : > { %v999_v47 = vmul.f32 %v6896_v14, %v977_v42 }
 0x1cd   : > { %v1008_v25 = vpack.c.bf16 %v999_v47, %v998_v6 }
 0x1ce   : > { %v6012_v56 = vpop.eup %6011 }
 0x1cf   : > { %1263 = vmatmul.mubr.bf16.gmra.mrb[24].mxu0 %v1008_v25  ;;  %5567 = vmatprep.mubr.bf16.mxu1 %v1008_v25  ;;  %v978_v1 = vmul.f32 %v6012_v56, %v930_v22 }
 0x1d0   : > { %v6014_v24 = vpop.eup %6013  ;;  %1272 = vmatprep.mubr.bf16.mxu0 %v6399_v10 }
 0x1d1   : > { %v979_v15 = vmul.f32 %v6014_v24, %v931_v21  ;;  %v1000_v2 = vmul.f32 %v6896_v14, %v978_v1 }
 0x1d3   : > { %v1001_v18 = vmul.f32 %v6896_v14, %v979_v15 }
 0x1d5   : > { %v1009_v26 = vpack.c.bf16 %v1001_v18, %v1000_v2 }
 0x1d7   : > { %1273 = vmatmul.mubr.bf16.gmra.mrb[28].mxu0 %v1009_v26  ;;  %5568 = vmatmul.mubr.bf16.gmra.mrb[12].mxu1 %v1009_v26 }
 0x272   : > { %v1204_v7 = vpop.f32.mrb[0].mxu0 }
 0x273   : > { %v1206_v19 = vpop.f32.mrb[1].mxu0 }
 0x274   : > { %v1208_v28 = vpop.f32.mrb[2].mxu0 }
 0x275   : > { %v6972_v3 = vpack.c.bf16 %v1208_v28, %v1204_v7  ;;  %v1210_v40 = vpop.f32.mrb[3].mxu0 }
 0x276   : > { %v1388_v41 = vpack.c.bf16 %v1210_v40, %v1206_v19 }
 0x277   : > { %5579 = vmatprep.mubr.msk.bf16.mxu1 %vm1404_vm0, %v6972_v3 }
 0x278   : > { %1937 = vrot.lane.b32.xlu0 %v1388_v41, %s6400_s21  ;;  %5747 = vmatprep.subr.msk.bf16.mxu1 %vm1404_vm0, %v1388_v41  ;;  %v1418_v14 = vsel %vm1404_vm0, %v1388_v41, 0 }
 0x279   : > { %5572 = vmatpush3.bf16.xpose.msra.mxu1 %v1418_v14 }
 0x27a   : > { %v1214_v43 = vpop.f32.mrb[4].mxu0  ;;  %v5557_v29 = vpop.f32.mrb[0].mxu1 }
 0x27b   : > { %v1216_v44 = vpop.f32.mrb[5].mxu0  ;;  %v1317_v33 = vpop.f32.mrb[1].mxu1 }
 0x27c   : > { %v1218_v34 = vpop.f32.mrb[6].mxu0  ;;  %v5558_v35 = vpop.f32.mrb[2].mxu1 }
 0x27d   : > { %v6979_v5 = vpack.c.bf16 %v1218_v34, %v1214_v43  ;;  %v6981_v38 = vpack.c.bf16 %v5558_v35, %v5557_v29  ;;  %v1220_v30 = vpop.f32.mrb[7].mxu0  ;;  %v1320_v27 = vpop.f32.mrb[3].mxu1 }
 0x27e   : > { %v1389_v9 = vpack.c.bf16 %v1220_v30, %v1216_v44  ;;  %v6983_v39 = vpack.c.bf16 %v1320_v27, %v1317_v33 }
 0x280   : > { %1939 = vrot.lane.b32.xlu1 %v1389_v9, %s6400_s21  ;;  %5748 = vmatprep.subr.msk.bf16.mxu1 %vm1404_vm0, %v1389_v9  ;;  %v1421_v37 = vsel %vm1404_vm0, %v1389_v9, 0 }
 0x281   : > { %5574 = vmatpush3.bf16.xpose.msra.mxu1 %v1421_v37 }
 0x282   : > { %v1224_v52 = vpop.f32.mrb[8].mxu0 }
 0x283   : > { %v1226_v53 = vpop.f32.mrb[9].mxu0 }
 0x284   : > { %v1228_v45 = vpop.f32.mrb[10].mxu0 }
 0x285   : > { %v6988_v32 = vpack.c.bf16 %v1228_v45, %v1224_v52  ;;  %v1230_v50 = vpop.f32.mrb[11].mxu0 }
 0x286   : > { %v1390_v31 = vpack.c.bf16 %v1230_v50, %v1226_v53 }
 0x288   : > { %1941 = vrot.lane.b32.xlu0 %v1390_v31, %s6400_s21  ;;  %5749 = vmatprep.subr.msk.bf16.mxu1 %vm1404_vm0, %v1390_v31  ;;  %v1424_v55 = vsel %vm1404_vm0, %v1390_v31, 0 }
 0x289   : > { %5576 = vmatpush3.bf16.xpose.msra.mxu1 %v1424_v55 }
 0x28a   : > { %v1234_v57 = vpop.f32.mrb[12].mxu0  ;;  %v5561_v59 = vpop.f32.mrb[4].mxu1 }
 0x28b   : > { %v1236_v60 = vpop.f32.mrb[13].mxu0  ;;  %v1333_v51 = vpop.f32.mrb[5].mxu1 }
 0x28c   : > { %v1238_v63 = vpop.f32.mrb[14].mxu0  ;;  %v5562_v61 = vpop.f32.mrb[6].mxu1 }
 0x28d   : > { %v6993_v12 = vpack.c.bf16 %v1238_v63, %v1234_v57  ;;  %v6995_v54 = vpack.c.bf16 %v5562_v61, %v5561_v59  ;;  %v1240_v13 = vpop.f32.mrb[15].mxu0  ;;  %v1336_v20 = vpop.f32.mrb[7].mxu1 }
 0x28e   : > { %v1391_v17 = vpack.c.bf16 %v1240_v13, %v1236_v60  ;;  %v6997_v8 = vpack.c.bf16 %v1336_v20, %v1333_v51 }
 0x290   : > { %1943 = vrot.lane.b32.xlu0 %v1391_v17, %s6400_s21  ;;  %5750 = vmatprep.subr.msk.bf16.mxu1 %vm1404_vm0, %v1391_v17  ;;  %v1427_v11 = vsel %vm1404_vm0, %v1391_v17, 0 }
 0x291   : > { %5578 = vmatpush3.bf16.xpose.msra.mxu1 %v1427_v11 }
 0x292   : > { %v1244_v0 = vpop.f32.mrb[16].mxu0  ;;  %5603 = vmatprep.subr.bf16.mxu1 %v6983_v39 }
 0x293   : > { %v1246_v58 = vpop.f32.mrb[17].mxu0 }
 0x294   : > { %v1248_v46 = vpop.f32.mrb[18].mxu0 }
 0x295   : > { %v7003_v4 = vpack.c.bf16 %v1248_v46, %v1244_v0  ;;  %v1250_v36 = vpop.f32.mrb[19].mxu0 }
 0x296   : > { %v7005_v16 = vpack.c.bf16 %v1250_v36, %v1246_v58 }
 0x297   : > { %5595 = vmatprep.mubr.msk.bf16.mxu0 %vm1404_vm0, %v7003_v4 }
 0x298   : > { %5580 = vmatmul.mubr.msk.bf16.vlgmr.msra.gmra.mrb[16].mxu1 %vm1404_vm0, %v6979_v5  ;;  %5751 = vmatprep.subr.msk.bf16.mxu0 %vm1404_vm0, %v7005_v16  ;;  %v1507_v48 = vsel %vm1404_vm0, %v7005_v16, 0 }
 0x299   : > { %5583 = vmatprep.mubr.msk.bf16.mxu1 %vm1404_vm0, %v6988_v32  ;;  %5588 = vmatpush3.bf16.xpose.msra.mxu0 %v1507_v48 }
 0x29a   : > { %5604 = vmatpush3.bf16.msra.mxu1 %v6983_v39  ;;  %v1254_v49 = vpop.f32.mrb[20].mxu0  ;;  %v5565_v62 = vpop.f32.mrb[8].mxu1 }
 0x29b   : > { %5605 = vmatprep.subr.bf16.mxu1 %v6981_v38  ;;  %v1256_v23 = vpop.f32.mrb[21].mxu0  ;;  %v1349_v42 = vpop.f32.mrb[9].mxu1 }
 0x29c   : > { %v1258_v6 = vpop.f32.mrb[22].mxu0  ;;  %v5566_v47 = vpop.f32.mrb[10].mxu1 }
 0x29d   : > { %v7019_v22 = vpack.c.bf16 %v1258_v6, %v1254_v49  ;;  %v7021_v25 = vpack.c.bf16 %v5566_v47, %v5565_v62  ;;  %v1260_v56 = vpop.f32.mrb[23].mxu0  ;;  %v1352_v21 = vpop.f32.mrb[11].mxu1 }
 0x29e   : > { %v7023_v1 = vpack.c.bf16 %v1260_v56, %v1256_v23  ;;  %v7025_v24 = vpack.c.bf16 %v1352_v21, %v1349_v42  ;;  %5606 = vmatpush3.bf16.msra.mxu1 %v6981_v38 }
 0x29f   : > { %5607 = vmatprep.subr.bf16.mxu1 %v6997_v8 }
 0x2a0   : > { %5584 = vmatmul.mubr.msk.bf16.gmra.mrb[20].mxu1 %vm1404_vm0, %v6993_v12  ;;  %5752 = vmatprep.subr.msk.bf16.mxu0 %vm1404_vm0, %v7023_v1  ;;  %v1510_v15 = vsel %vm1404_vm0, %v7023_v1, 0 }
 0x2a1   : > { %5590 = vmatpush3.bf16.xpose.msra.mxu0 %v1510_v15 }
 0x2a2   : > { %5608 = vmatpush3.bf16.msra.mxu1 %v6997_v8  ;;  %v1264_v2 = vpop.f32.mrb[24].mxu0 }
 0x2a3   : > { %5609 = vmatprep.subr.bf16.mxu1 %v6995_v54  ;;  %v1266_v18 = vpop.f32.mrb[25].mxu0 }
 0x2a4   : > { %v1268_v26 = vpop.f32.mrb[26].mxu0 }
 0x2a5   : > { %v7037_v7 = vpack.c.bf16 %v1268_v26, %v1264_v2  ;;  %v1270_v19 = vpop.f32.mrb[27].mxu0 }
 0x2a6   : > { %v7039_v28 = vpack.c.bf16 %v1270_v19, %v1266_v18  ;;  %5610 = vmatpush3.bf16.msra.mxu1 %v6995_v54 }
 0x2a7   : > { %5619 = vmatprep.subr.bf16.mxu1 %v7025_v24 }
 0x2a8   : > { %5753 = vmatprep.subr.msk.bf16.mxu0 %vm1404_vm0, %v7039_v28  ;;  %v1513_v40 = vsel %vm1404_vm0, %v7039_v28, 0 }
 0x2a9   : > { %5592 = vmatpush3.bf16.xpose.msra.mxu0 %v1513_v40 }
 0x2aa   : > { %v1274_v41 = vpop.f32.mrb[28].mxu0  ;;  %v5569_v14 = vpop.f32.mrb[12].mxu1 }
 0x2ab   : > { %v1276_v43 = vpop.f32.mrb[29].mxu0  ;;  %v1365_v29 = vpop.f32.mrb[13].mxu1 }
 0x2ac   : > { %v1278_v44 = vpop.f32.mrb[30].mxu0  ;;  %v5570_v33 = vpop.f32.mrb[14].mxu1 }
 0x2ad   : > { %v7047_v34 = vpack.c.bf16 %v1278_v44, %v1274_v41  ;;  %v1280_v35 = vpop.f32.mrb[31].mxu0  ;;  %v7049_v30 = vpack.c.bf16 %v5570_v33, %v5569_v14  ;;  %v1368_v27 = vpop.f32.mrb[15].mxu1 }
 0x2ae   : > { %v7051_v9 = vpack.c.bf16 %v1280_v35, %v1276_v43  ;;  %v7053_v37 = vpack.c.bf16 %v1368_v27, %v1365_v29 }
 0x2b0   : > { %5754 = vmatprep.subr.msk.bf16.mxu0 %vm1404_vm0, %v7051_v9  ;;  %v1516_v52 = vsel %vm1404_vm0, %v7051_v9, 0 }
 0x2b1   : > { %5594 = vmatpush3.bf16.xpose.msra.mxu0 %v1516_v52 }
 0x2b8   : > { %5596 = vmatmul.mubr.msk.bf16.vlgmr.msra.gmra.mrb[32].mxu0 %vm1404_vm0, %v7019_v22 }
 0x2b9   : > { %5599 = vmatprep.mubr.msk.bf16.mxu0 %vm1404_vm0, %v7037_v7 }
 0x2c0   : > { %5600 = vmatmul.mubr.msk.bf16.gmra.mrb[36].mxu0 %vm1404_vm0, %v7047_v34 }
 0x2ea   : > { %v1938_v53 = vpop.permute.xlu0 %1937 }
 0x2eb   : > { %5755 = vmatprep.subr.msk.bf16.mxu0 %vm1404_vm0, %v1938_v53  ;;  %v1958_v45 = vsel %vm1404_vm0, %v1938_v53, 0 }
 0x2ec   : > { %5636 = vmatpush3.bf16.xpose.msra.mxu0 %v1958_v45 }
 0x2f2   : > { %v1940_v50 = vpop.permute.xlu1 %1939 }
 0x2f3   : > { %5756 = vmatprep.subr.msk.bf16.mxu0 %vm1404_vm0, %v1940_v50  ;;  %v1961_v31 = vsel %vm1404_vm0, %v1940_v50, 0 }
 0x2f4   : > { %5638 = vmatpush3.bf16.xpose.msra.mxu0 %v1961_v31 }
 0x2fa   : > { %v1942_v55 = vpop.permute.xlu0 %1941 }
 0x2fb   : > { %5757 = vmatprep.subr.msk.bf16.mxu0 %vm1404_vm0, %v1942_v55  ;;  %v1964_v57 = vsel %vm1404_vm0, %v1942_v55, 0 }
 0x2fc   : > { %5640 = vmatpush3.bf16.xpose.msra.mxu0 %v1964_v57 }
 0x302   : > { %v1944_v59 = vpop.permute.xlu0 %1943 }
 0x303   : > { %5758 = vmatprep.subr.msk.bf16.mxu0 %vm1404_vm0, %v1944_v59  ;;  %v1967_v60 = vsel %vm1404_vm0, %v1944_v59, 0 }
 0x304   : > { %5642 = vmatpush3.bf16.xpose.msra.mxu0 %v1967_v60 }
 0x36b   : > { %v5581_v51 = vpop.f32.mrb[16].mxu1 }
 0x36c   : > { %v1463_v63 = vpop.f32.mrb[17].mxu1  ;;  %v1589_v61 = vsel %vm1404_vm0, %v5581_v51, -inf }
 0x36d   : > { %1590 = vmax.xlane.f32.xlu0 %v1589_v61  ;;  %v5582_v13 = vpop.f32.mrb[18].mxu1  ;;  %v1583_v11 = vsel %vm1404_vm0, %v1463_v63, -inf }
 0x36e   : > { %v1466_v20 = vpop.f32.mrb[19].mxu1  ;;  %v1592_v17 = vsel %vm1404_vm0, %v5582_v13, -inf }
 0x36f   : > { %1593 = vmax.xlane.f32.xlu1 %v1592_v17  ;;  %v1586_v0 = vsel %vm1404_vm0, %v1466_v20, -inf }
 0x371   : > { %1584 = vmax.xlane.f32.xlu0 %v1583_v11 }
 0x373   : > { %1587 = vmax.xlane.f32.xlu1 %v1586_v0  ;;  %v5585_v58 = vpop.f32.mrb[20].mxu1 }
 0x374   : > { %v7077_v46 = vpop.f32.mrb[21].mxu1  ;;  %v1601_v36 = vsel %vm1404_vm0, %v5585_v58, -inf }
 0x375   : > { %1602 = vmax.xlane.f32.xlu0 %v1601_v36  ;;  %v5586_v48 = vpop.f32.mrb[22].mxu1  ;;  %v1595_v23 = vsel %vm1404_vm0, %v7077_v46, -inf }
 0x376   : > { %v7080_v49 = vpop.f32.mrb[23].mxu1  ;;  %v1604_v62 = vsel %vm1404_vm0, %v5586_v48, -inf }
 0x377   : > { %1605 = vmax.xlane.f32.xlu1 %v1604_v62  ;;  %v1598_v42 = vsel %vm1404_vm0, %v7080_v49, -inf }
 0x379   : > { %1596 = vmax.xlane.f32.xlu0 %v1595_v23 }
 0x37b   : > { %1599 = vmax.xlane.f32.xlu1 %v1598_v42 }
 0x38b   : > { %v7087_v6 = vpop.f32.mrb[32].mxu0 }
 0x38c   : > { %v7089_v47 = vpop.f32.mrb[33].mxu0  ;;  %v1613_v56 = vsel %vm1404_vm0, %v7087_v6, -inf }
 0x38d   : > { %1614 = vmax.xlane.f32.xlu0 %v1613_v56  ;;  %v7093_v21 = vpop.f32.mrb[34].mxu0  ;;  %v1607_v18 = vsel %vm1404_vm0, %v7089_v47, -inf }
 0x38e   : > { %v7095_v15 = vpop.f32.mrb[35].mxu0  ;;  %v1616_v2 = vsel %vm1404_vm0, %v7093_v21, -inf }
 0x38f   : > { %1617 = vmax.xlane.f32.xlu1 %v1616_v2  ;;  %v1610_v26 = vsel %vm1404_vm0, %v7095_v15, -inf }
 0x391   : > { %1608 = vmax.xlane.f32.xlu0 %v1607_v18 }
 0x393   : > { %1611 = vmax.xlane.f32.xlu1 %v1610_v26  ;;  %v7103_v19 = vpop.f32.mrb[36].mxu0 }
 0x394   : > { %v7105_v40 = vpop.f32.mrb[37].mxu0  ;;  %v1625_v41 = vsel %vm1404_vm0, %v7103_v19, -inf }
 0x395   : > { %1626 = vmax.xlane.f32.xlu0 %v1625_v41  ;;  %v7109_v14 = vpop.f32.mrb[38].mxu0  ;;  %v1619_v29 = vsel %vm1404_vm0, %v7105_v40, -inf }
 0x396   : > { %v7111_v43 = vpop.f32.mrb[39].mxu0  ;;  %v1628_v44 = vsel %vm1404_vm0, %v7109_v14, -inf }
 0x397   : > { %v1622_v33 = vsel %vm1404_vm0, %v7111_v43, -inf }
 0x399   : > { %1620 = vmax.xlane.f32.xlu0 %v1619_v29 }
 0x3a4   : > { %1927 = vrot.lane.b32.xlu1 %v6979_v5, %s6400_s21 }
 0x3a8   : > { %2050 = vrot.lane.b32.xlu1 %v7005_v16, %s6400_s21 }
 0x3ac   : > { %2052 = vrot.lane.b32.xlu1 %v7023_v1, %s6400_s21 }
 0x3af   : > { %1925 = vrot.lane.b32.xlu0 %v6972_v3, %s6400_s21 }
 0x3d0   : > { %1629 = vmax.xlane.f32.xlu1 %v1628_v44 }
 0x3d4   : > { %1623 = vmax.xlane.f32.xlu1 %v1622_v33 }
 0x3fa   : > { %v1591_v35 = vpop.xlane.xlu0 %1590 }
 0x3fb   : > { %v1633_v27 = vsub.f32 %v5581_v51, %v1591_v35 }
 0x3fc   : > { %v1594_v5 = vpop.xlane.xlu1 %1593 }
 0x3fd   : > { %v1651_v52 = vmul.f32 1.442695, %v1633_v27  ;;  %v1634_v53 = vsub.f32 %v5582_v13, %v1594_v5 }
 0x3fe   : > { %v1585_v16 = vpop.xlane.xlu0 %1584 }
 0x3ff   : > { %6015 = vpow2.f32 %v1651_v52  ;;  %v1653_v45 = vmul.f32 1.442695, %v1634_v53  ;;  %v1631_v1 = vsub.f32 %v1463_v63, %v1585_v16 }
 0x400   : > { %v1588_v50 = vpop.xlane.xlu1 %1587 }
 0x401   : > { %6017 = vpow2.f32 %v1653_v45  ;;  %v1647_v3 = vmul.f32 1.442695, %v1631_v1  ;;  %v1632_v31 = vsub.f32 %v1466_v20, %v1588_v50 }
 0x402   : > { %v1603_v55 = vpop.xlane.xlu0 %1602 }
 0x403   : > { %6019 = vpow2.f32 %v1647_v3  ;;  %v1649_v57 = vmul.f32 1.442695, %v1632_v31  ;;  %v1637_v59 = vsub.f32 %v5585_v58, %v1603_v55 }
 0x404   : > { %v1606_v60 = vpop.xlane.xlu1 %1605 }
 0x405   : > { %6021 = vpow2.f32 %v1649_v57  ;;  %v1659_v61 = vmul.f32 1.442695, %v1637_v59  ;;  %v1638_v17 = vsub.f32 %v5586_v48, %v1606_v60 }
 0x406   : > { %v1597_v51 = vpop.xlane.xlu0 %1596 }
 0x407   : > { %6023 = vpow2.f32 %v1659_v61  ;;  %v1661_v11 = vmul.f32 1.442695, %v1638_v17  ;;  %v1635_v13 = vsub.f32 %v7077_v46, %v1597_v51 }
 0x408   : > { %v1600_v0 = vpop.xlane.xlu1 %1599 }
 0x409   : > { %v7128_v36 = vpop.eup %6015  ;;  %6025 = vpow2.f32 %v1661_v11  ;;  %v1655_v63 = vmul.f32 1.442695, %v1635_v13  ;;  %v1636_v20 = vsub.f32 %v7080_v49, %v1600_v0 }
 0x40a   : > { %v1685_v62 = vsel %vm1404_vm0, %v7128_v36, 0.0 }
 0x40b   : > { %v7133_v58 = vpop.eup %6017  ;;  %6027 = vpow2.f32 %v1655_v63  ;;  %v1657_v23 = vmul.f32 1.442695, %v1636_v20  ;;  %1686 = vadd.xlane.f32.xlu0 %v1685_v62 }
 0x40c   : > { %v1688_v48 = vsel %vm1404_vm0, %v7133_v58, 0.0 }
 0x40d   : > { %v7137_v42 = vpop.eup %6019  ;;  %6029 = vpow2.f32 %v1657_v23  ;;  %1689 = vadd.xlane.f32.xlu1 %v1688_v48 }
 0x40e   : > { %v1679_v46 = vsel %vm1404_vm0, %v7137_v42, 0.0 }
 0x40f   : > { %v7141_v56 = vpop.eup %6021  ;;  %1680 = vadd.xlane.f32.xlu0 %v1679_v46 }
 0x410   : > { %v1682_v49 = vsel %vm1404_vm0, %v7141_v56, 0.0 }
 0x411   : > { %v7145_v2 = vpop.eup %6023  ;;  %1683 = vadd.xlane.f32.xlu1 %v1682_v49 }
 0x412   : > { %v1697_v18 = vsel %vm1404_vm0, %v7145_v2, 0.0 }
 0x413   : > { %v7149_v26 = vpop.eup %6025  ;;  %1698 = vadd.xlane.f32.xlu0 %v1697_v18 }
 0x414   : > { %v1700_v41 = vsel %vm1404_vm0, %v7149_v26, 0.0 }
 0x415   : > { %v7153_v29 = vpop.eup %6027  ;;  %1701 = vadd.xlane.f32.xlu1 %v1700_v41 }
 0x416   : > { %v1691_v44 = vsel %vm1404_vm0, %v7153_v29, 0.0 }
 0x417   : > { %v7157_v33 = vpop.eup %6029  ;;  %1692 = vadd.xlane.f32.xlu0 %v1691_v44 }
 0x418   : > { %v1694_v35 = vsel %vm1404_vm0, %v7157_v33, 0.0 }
 0x419   : > { %1695 = vadd.xlane.f32.xlu1 %v1694_v35 }
 0x41a   : > { %v1615_v27 = vpop.xlane.xlu0 %1614 }
 0x41b   : > { %v1641_v5 = vsub.f32 %v7087_v6, %v1615_v27 }
 0x41c   : > { %v1618_v52 = vpop.xlane.xlu1 %1617 }
 0x41d   : > { %v1667_v53 = vmul.f32 1.442695, %v1641_v5  ;;  %v1642_v16 = vsub.f32 %v7093_v21, %v1618_v52 }
 0x41e   : > { %v1609_v45 = vpop.xlane.xlu0 %1608 }
 0x41f   : > { %6031 = vpow2.f32 %v1667_v53  ;;  %v1639_v1 = vsub.f32 %v7089_v47, %v1609_v45  ;;  %v1669_v3 = vmul.f32 1.442695, %v1642_v16 }
 0x420   : > { %v1612_v50 = vpop.xlane.xlu1 %1611 }
 0x421   : > { %v1663_v31 = vmul.f32 1.442695, %v1639_v1  ;;  %v1640_v55 = vsub.f32 %v7095_v15, %v1612_v50 }
 0x422   : > { %v1627_v57 = vpop.xlane.xlu0 %1626 }
 0x423   : > { %6033 = vpow2.f32 %v1663_v31  ;;  %v1665_v59 = vmul.f32 1.442695, %v1640_v55  ;;  %v1645_v0 = vsub.f32 %v7103_v19, %v1627_v57 }
 0x424   : > { %6035 = vpow2.f32 %v1669_v3  ;;  %v1928_v17 = vpop.permute.xlu1 %1927 }
 0x425   : > { %6037 = vpow2.f32 %v1665_v59  ;;  %v1675_v20 = vmul.f32 1.442695, %v1645_v0 }
 0x426   : > { %v1621_v60 = vpop.xlane.xlu0 %1620 }
 0x427   : > { %6039 = vpow2.f32 %v1675_v20 }
 0x428   : > { %v7197_v49 = vpop.permute.xlu1 %2050 }
 0x429   : > { %v7165_v61 = vpop.eup %6031 }
 0x42a   : > { %v1926_v6 = vpop.permute.xlu0 %1925  ;;  %v1709_v21 = vsel %vm1404_vm0, %v7165_v61, 0.0 }
 0x42b   : > { %5643 = vmatprep.mubr.msk.bf16.mxu0 %vm1404_vm0, %v1926_v6  ;;  %1710 = vadd.xlane.f32.xlu1 %v1709_v21 }
 0x42c   : > { %5644 = vmatmul.mubr.msk.bf16.vlgmr.msra.gmra.mrb[40].mxu0 %vm1404_vm0, %v1928_v17 }
 0x42d   : > { %v7171_v47 = vpop.eup %6033  ;;  %1929 = vrot.lane.b32.xlu0 %v6988_v32, %s6400_s21  ;;  %v1643_v32 = vsub.f32 %v7105_v40, %v1621_v60  ;;  %v7199_v40 = vpop.permute.xlu1 %2052 }
 0x42e   : > { %v1703_v15 = vsel %vm1404_vm0, %v7171_v47, 0.0  ;;  %v7177_v51 = vpop.eup %6035 }
 0x42f   : > { %1704 = vadd.xlane.f32.xlu1 %v1703_v15  ;;  %v1712_v11 = vsel %vm1404_vm0, %v7177_v51, 0.0  ;;  %v7181_v13 = vpop.eup %6037  ;;  %v1671_v62 = vmul.f32 1.442695, %v1643_v32 }
 0x430   : > { %v1706_v63 = vsel %vm1404_vm0, %v7181_v13, 0.0 }
 0x431   : > { %6041 = vpow2.f32 %v1671_v62  ;;  %v7187_v23 = vpop.eup %6039 }
 0x432   : > { %v1721_v48 = vsel %vm1404_vm0, %v7187_v23, 0.0 }
 0x433   : > { %1713 = vadd.xlane.f32.xlu1 %v1712_v11 }
 0x437   : > { %1707 = vadd.xlane.f32.xlu1 %v1706_v63 }
 0x43b   : > { %v7193_v46 = vpop.eup %6041 }
 0x43c   : > { %v1715_v19 = vsel %vm1404_vm0, %v7193_v46, 0.0 }
 0x448   : > { %1931 = vrot.lane.b32.xlu1 %v6993_v12, %s6400_s21 }
 0x44c   : > { %1722 = vadd.xlane.f32.xlu0 %v1721_v48 }
 0x450   : > { %1716 = vadd.xlane.f32.xlu0 %v1715_v19 }
 0x45d   : > { %v1630_v18 = vpop.xlane.xlu1 %1629 }
 0x45e   : > { %v1646_v41 = vsub.f32 %v7109_v14, %v1630_v18 }
 0x460   : > { %v1677_v44 = vmul.f32 1.442695, %v1646_v41 }
 0x461   : > { %v1624_v35 = vpop.xlane.xlu1 %1623 }
 0x462   : > { %6043 = vpow2.f32 %v1677_v44  ;;  %v1644_v12 = vsub.f32 %v7111_v43, %v1624_v35 }
 0x464   : > { %v1673_v27 = vmul.f32 1.442695, %v1644_v12 }
 0x466   : > { %6045 = vpow2.f32 %v1673_v27 }
 0x46c   : > { %v7203_v5 = vpop.eup %6043 }
 0x46d   : > { %v1724_v52 = vsel %vm1404_vm0, %v7203_v5, 0.0 }
 0x46e   : > { %1725 = vadd.xlane.f32.xlu0 %v1724_v52 }
 0x470   : > { %v7207_v53 = vpop.eup %6045 }
 0x471   : > { %v1718_v16 = vsel %vm1404_vm0, %v7207_v53, 0.0 }
 0x472   : > { %1719 = vadd.xlane.f32.xlu1 %v1718_v16  ;;  %v2071_v16 = vsel %vm1404_vm0, %v7197_v49, 0 }
 0x483   : > { %2056 = vrot.lane.b32.xlu1 %v7051_v9, %s6400_s21 }
 0x484   : > { %2054 = vrot.lane.b32.xlu0 %v7039_v28, %s6400_s21 }
 0x487   : > { %2040 = vrot.lane.b32.xlu1 %v7019_v22, %s6400_s21 }
 0x488   : > { %2038 = vrot.lane.b32.xlu0 %v7003_v4, %s6400_s21 }
 0x48b   : > { %2044 = vrot.lane.b32.xlu1 %v7047_v34, %s6400_s21 }
 0x48c   : > { %2042 = vrot.lane.b32.xlu0 %v7037_v7, %s6400_s21 }
 0x498   : > { %v1687_v14 = vpop.xlane.xlu0 %1686 }
 0x49a   : > { %v1690_v43 = vpop.xlane.xlu1 %1689 }
 0x49b   : > { %6047 = vrcp.f32 %v1690_v43 }
 0x49c   : > { %v1681_v45 = vpop.xlane.xlu0 %1680 }
 0x49d   : > { %6049 = vrcp.f32 %v1681_v45 }
 0x49e   : > { %6051 = vrcp.f32 %v1687_v14  ;;  %v1684_v9 = vpop.xlane.xlu1 %1683 }
 0x49f   : > { %6053 = vrcp.f32 %v1684_v9 }
 0x4a0   : > { %v1699_v28 = vpop.xlane.xlu0 %1698 }
 0x4a2   : > { %v1702_v1 = vpop.xlane.xlu1 %1701 }
 0x4a3   : > { %6055 = vrcp.f32 %v1702_v1 }
 0x4a4   : > { %v1693_v22 = vpop.xlane.xlu0 %1692 }
 0x4a5   : > { %6057 = vrcp.f32 %v1693_v22  ;;  %v6048_v4 = vpop.eup %6047 }
 0x4a6   : > { %6059 = vrcp.f32 %v1699_v28  ;;  %v1696_v50 = vpop.xlane.xlu1 %1695  ;;  %v1746_v55 = vmul.f32 %v6048_v4, %v7133_v58 }
 0x4a7   : > { %v6050_v34 = vpop.eup %6049  ;;  %6061 = vrcp.f32 %v1696_v50 }
 0x4a8   : > { %v6052_v3 = vpop.eup %6051  ;;  %v1930_v7 = vpop.permute.xlu0 %1929  ;;  %v1743_v57 = vmul.f32 %v6050_v34, %v7137_v42 }
 0x4a9   : > { %v6054_v31 = vpop.eup %6053  ;;  %5647 = vmatprep.mubr.msk.bf16.mxu0 %vm1404_vm0, %v1930_v7  ;;  %v1745_v60 = vmul.f32 %v6052_v3, %v7128_v36 }
 0x4aa   : > { %v1744_v59 = vmul.f32 %v6054_v31, %v7141_v56 }
 0x4ab   : > { %v1760_v21 = vpack.c.bf16 %v1746_v55, %v1745_v60 }
 0x4ac   : > { %v1759_v6 = vpack.c.bf16 %v1744_v59, %v1743_v57 }
 0x4ad   : > { %v6056_v17 = vpop.eup %6055 }
 0x4ae   : > { %5611 = vmatprep.mubr.msk.bf16.mxu1 %vm1404_vm0, %v1759_v6  ;;  %v1750_v42 = vmul.f32 %v6056_v17, %v7149_v26 }
 0x4af   : > { %v6058_v15 = vpop.eup %6057  ;;  %5612 = vmatmul.mubr.msk.bf16.vlgmr.msra.gmra.mrb[24].mxu1 %vm1404_vm0, %v1760_v21 }
 0x4b0   : > { %v6060_v11 = vpop.eup %6059  ;;  %5620 = vmatpush3.bf16.msra.mxu1 %v7025_v24  ;;  %v1747_v56 = vmul.f32 %v6058_v15, %v7153_v29 }
 0x4b1   : > { %v6062_v58 = vpop.eup %6061  ;;  %5621 = vmatprep.subr.bf16.mxu1 %v7021_v25  ;;  %v1749_v0 = vmul.f32 %v6060_v11, %v7145_v2 }
 0x4b2   : > { %v1748_v36 = vmul.f32 %v6062_v58, %v7157_v33 }
 0x4b3   : > { %v1762_v20 = vpack.c.bf16 %v1750_v42, %v1749_v0 }
 0x4b4   : > { %5622 = vmatpush3.bf16.msra.mxu1 %v7021_v25  ;;  %v1761_v63 = vpack.c.bf16 %v1748_v36, %v1747_v56 }
 0x4b5   : > { %5623 = vmatprep.subr.bf16.mxu1 %v7053_v37 }
 0x4b6   : > { %5615 = vmatprep.mubr.msk.bf16.mxu1 %vm1404_vm0, %v1761_v63 }
 0x4b7   : > { %5616 = vmatmul.mubr.msk.bf16.gmra.mrb[28].mxu1 %vm1404_vm0, %v1762_v20 }
 0x4b8   : > { %5624 = vmatpush3.bf16.msra.mxu1 %v7053_v37  ;;  %v1711_v32 = vpop.xlane.xlu1 %1710 }
 0x4b9   : > { %5625 = vmatprep.subr.bf16.mxu1 %v7049_v30 }
 0x4bc   : > { %5626 = vmatpush3.bf16.msra.mxu1 %v7049_v30  ;;  %v1705_v26 = vpop.xlane.xlu1 %1704 }
 0x4bd   : > { %5759 = vmatprep.subr.msk.bf16.mxu1 %vm1404_vm0, %v7197_v49 }
 0x4c0   : > { %v1714_v2 = vpop.xlane.xlu1 %1713 }
 0x4c1   : > { %6063 = vrcp.f32 %v1714_v2 }
 0x4c2   : > { %6065 = vrcp.f32 %v1705_v26 }
 0x4c3   : > { %6067 = vrcp.f32 %v1711_v32 }
 0x4c4   : > { %v1708_v29 = vpop.xlane.xlu1 %1707 }
 0x4c5   : > { %6069 = vrcp.f32 %v1708_v29 }
 0x4c8   : > { %v1932_v33 = vpop.permute.xlu1 %1931 }
 0x4c9   : > { %5648 = vmatmul.mubr.msk.bf16.gmra.mrb[44].mxu0 %vm1404_vm0, %v1932_v33 }
 0x4cb   : > { %v6064_v62 = vpop.eup %6063 }
 0x4cc   : > { %v6066_v48 = vpop.eup %6065  ;;  %v1754_v41 = vmul.f32 %v6064_v62, %v7177_v51 }
 0x4cd   : > { %v6068_v19 = vpop.eup %6067  ;;  %v1751_v44 = vmul.f32 %v6066_v48, %v7171_v47  ;;  %v2074_v47 = vsel %vm1404_vm0, %v7199_v40, 0 }
 0x4ce   : > { %v1753_v12 = vmul.f32 %v6068_v19, %v7165_v61 }
 0x4cf   : > { %v6070_v18 = vpop.eup %6069 }
 0x4d0   : > { %v1752_v35 = vmul.f32 %v6070_v18, %v7181_v13  ;;  %v1764_v52 = vpack.c.bf16 %v1754_v41, %v1753_v12 }
 0x4d2   : > { %v1763_v27 = vpack.c.bf16 %v1752_v35, %v1751_v44 }
 0x4d4   : > { %5627 = vmatprep.mubr.msk.bf16.mxu1 %vm1404_vm0, %v1763_v27 }
 0x4d5   : > { %5628 = vmatmul.mubr.msk.bf16.vlgmr.msra.gmra.mrb[32].mxu1 %vm1404_vm0, %v1764_v52 }
 0x4d6   : > { %5652 = vmatpush3.bf16.xpose.msra.mxu1 %v2071_v16 }
 0x4d7   : > { %5760 = vmatprep.subr.msk.bf16.mxu1 %vm1404_vm0, %v7199_v40 }
 0x4d9   : > { %v1723_v51 = vpop.xlane.xlu0 %1722 }
 0x4dd   : > { %v1717_v13 = vpop.xlane.xlu0 %1716 }
 0x4de   : > { %5654 = vmatpush3.bf16.xpose.msra.mxu1 %v2074_v47 }
 0x4fb   : > { %v1726_v61 = vpop.xlane.xlu0 %1725 }
 0x4fc   : > { %6071 = vrcp.f32 %v1726_v61 }
 0x4fd   : > { %6073 = vrcp.f32 %v1717_v13 }
 0x4fe   : > { %6075 = vrcp.f32 %v1723_v51 }
 0x4ff   : > { %v5645_v14 = vpop.f32.mrb[40].mxu0  ;;  %v2055_v43 = vpop.permute.xlu0 %2054 }
 0x500   : > { %v2077_v45 = vsel %vm1404_vm0, %v2055_v43, 0  ;;  %v1720_v9 = vpop.xlane.xlu1 %1719  ;;  %v2003_v49 = vpop.f32.mrb[41].mxu0  ;;  %5761 = vmatprep.subr.msk.bf16.mxu1 %vm1404_vm0, %v2055_v43  ;;  %v2153_v50 = vsel %vm1404_vm0, %v5645_v14, -inf }
 0x501   : > { %6077 = vrcp.f32 %v1720_v9  ;;  %v5646_v28 = vpop.f32.mrb[42].mxu0  ;;  %5656 = vmatpush3.bf16.xpose.msra.mxu1 %v2077_v45  ;;  %v2147_v40 = vsel %vm1404_vm0, %v2003_v49, -inf }
 0x502   : > { %v2006_v1 = vpop.f32.mrb[43].mxu0  ;;  %2148 = vmax.xlane.f32.xlu0 %v2147_v40  ;;  %v2156_v31 = vsel %vm1404_vm0, %v5646_v28, -inf }
 0x503   : > { %v2150_v22 = vsel %vm1404_vm0, %v2006_v1, -inf  ;;  %v2039_v11 = vpop.permute.xlu0 %2038 }
 0x504   : > { %v2057_v4 = vpop.permute.xlu1 %2056  ;;  %2151 = vmax.xlane.f32.xlu1 %v2150_v22 }
 0x505   : > { %5762 = vmatprep.subr.msk.bf16.mxu1 %vm1404_vm0, %v2057_v4  ;;  %v2080_v3 = vsel %vm1404_vm0, %v2057_v4, 0 }
 0x506   : > { %2154 = vmax.xlane.f32.xlu0 %v2153_v50  ;;  %v6072_v34 = vpop.eup %6071 }
 0x507   : > { %v6074_v7 = vpop.eup %6073  ;;  %v1758_v59 = vmul.f32 %v6072_v34, %v7203_v5  ;;  %v2043_v42 = vpop.permute.xlu0 %2042 }
 0x508   : > { %v6076_v55 = vpop.eup %6075  ;;  %v1755_v60 = vmul.f32 %v6074_v7, %v7193_v46  ;;  %v2041_v58 = vpop.permute.xlu1 %2040 }
 0x509   : > { %5658 = vmatpush3.bf16.xpose.msra.mxu1 %v2080_v3  ;;  %v1757_v21 = vmul.f32 %v6076_v55, %v7187_v23 }
 0x50a   : > { %2157 = vmax.xlane.f32.xlu0 %v2156_v31 }
 0x50b   : > { %v6078_v57 = vpop.eup %6077  ;;  %v1766_v15 = vpack.c.bf16 %v1758_v59, %v1757_v21 }
 0x50c   : > { %v1756_v6 = vmul.f32 %v6078_v57, %v7207_v53  ;;  %v2045_v46 = vpop.permute.xlu1 %2044 }
 0x50e   : > { %v1765_v17 = vpack.c.bf16 %v1756_v6, %v1755_v60 }
 0x510   : > { %5631 = vmatprep.mubr.msk.bf16.mxu1 %vm1404_vm0, %v1765_v17 }
 0x511   : > { %5632 = vmatmul.mubr.msk.bf16.gmra.mrb[36].mxu1 %vm1404_vm0, %v1766_v15 }
 0x512   : > { %5659 = vmatprep.mubr.msk.bf16.mxu1 %vm1404_vm0, %v2039_v11 }
 0x519   : > { %5660 = vmatmul.mubr.msk.bf16.vlgmr.msra.gmra.mrb[40].mxu1 %vm1404_vm0, %v2041_v58 }
 0x51a   : > { %5663 = vmatprep.mubr.msk.bf16.mxu1 %vm1404_vm0, %v2043_v42 }
 0x521   : > { %5664 = vmatmul.mubr.msk.bf16.gmra.mrb[44].mxu1 %vm1404_vm0, %v2045_v46 }
 0x582   : > { %v7276_v5 = vpop.f32.mrb[24].mxu1 }
 0x583   : > { %v7278_v23 = vpop.f32.mrb[25].mxu1 }
 0x584   : > { %v7280_v53 = vpop.f32.mrb[26].mxu1 }
 0x585   : > { %v7282_v56 = vpop.f32.mrb[27].mxu1 }
 0x58a   : > { %v7284_v36 = vpop.f32.mrb[28].mxu1 }
 0x58b   : > { %v7286_v0 = vpop.f32.mrb[29].mxu1 }
 0x58c   : > { %v7288_v63 = vpop.f32.mrb[30].mxu1 }
 0x58d   : > { %v7290_v20 = vpop.f32.mrb[31].mxu1 }
 0x58f   : > { %v2149_v32 = vpop.xlane.xlu0 %2148 }
 0x590   : > { %v2195_v33 = vsub.f32 %v2003_v49, %v2149_v32 }
 0x591   : > { %v2152_v2 = vpop.xlane.xlu1 %2151 }
 0x592   : > { %v2196_v48 = vsub.f32 %v2006_v1, %v2152_v2  ;;  %v2211_v41 = vmul.f32 1.442695, %v2195_v33 }
 0x593   : > { %v2155_v26 = vpop.xlane.xlu0 %2154 }
 0x594   : > { %v2197_v29 = vsub.f32 %v5645_v14, %v2155_v26  ;;  %v2213_v35 = vmul.f32 1.442695, %v2196_v48 }
 0x596   : > { %v2215_v62 = vmul.f32 1.442695, %v2197_v29 }
 0x597   : > { %v2158_v19 = vpop.xlane.xlu0 %2157 }
 0x598   : > { %v2198_v18 = vsub.f32 %v5646_v28, %v2158_v19  ;;  %6079 = vpow2.f32 %v2215_v62 }
 0x59a   : > { %v2217_v44 = vmul.f32 1.442695, %v2198_v18 }
 0x59c   : > { %6081 = vpow2.f32 %v2217_v44  ;;  %v5649_v12 = vpop.f32.mrb[44].mxu0 }
 0x59d   : > { %6083 = vpow2.f32 %v2211_v41  ;;  %v2019_v27 = vpop.f32.mrb[45].mxu0  ;;  %v2165_v13 = vsel %vm1404_vm0, %v5649_v12, -inf }
 0x59e   : > { %v5650_v52 = vpop.f32.mrb[46].mxu0  ;;  %v2159_v16 = vsel %vm1404_vm0, %v2019_v27, -inf  ;;  %6085 = vpow2.f32 %v2213_v35 }
 0x59f   : > { %2160 = vmax.xlane.f32.xlu0 %v2159_v16  ;;  %v2022_v47 = vpop.f32.mrb[47].mxu0  ;;  %v2168_v14 = vsel %vm1404_vm0, %v5650_v52, -inf }
 0x5a0   : > { %v2162_v51 = vsel %vm1404_vm0, %v2022_v47, -inf }
 0x5a1   : > { %2163 = vmax.xlane.f32.xlu1 %v2162_v51 }
 0x5a2   : > { %v7295_v61 = vpop.eup %6079 }
 0x5a3   : > { %2166 = vmax.xlane.f32.xlu0 %v2165_v13  ;;  %v2249_v45 = vsel %vm1404_vm0, %v7295_v61, 0.0 }
 0x5a5   : > { %2169 = vmax.xlane.f32.xlu1 %v2168_v14 }
 0x5a6   : > { %v7298_v43 = vpop.eup %6081 }
 0x5a7   : > { %v7302_v9 = vpop.eup %6083  ;;  %2250 = vadd.xlane.f32.xlu0 %v2249_v45  ;;  %v2252_v49 = vsel %vm1404_vm0, %v7298_v43, 0.0 }
 0x5a8   : > { %v7306_v28 = vpop.f32.mrb[32].mxu1  ;;  %v7308_v40 = vpop.eup %6085  ;;  %v2243_v4 = vsel %vm1404_vm0, %v7302_v9, 0.0 }
 0x5a9   : > { %v7310_v1 = vpop.f32.mrb[33].mxu1  ;;  %2253 = vadd.xlane.f32.xlu1 %v2252_v49  ;;  %v2246_v34 = vsel %vm1404_vm0, %v7308_v40, 0.0 }
 0x5aa   : > { %v7312_v22 = vpop.f32.mrb[34].mxu1 }
 0x5ab   : > { %v7316_v50 = vpop.f32.mrb[35].mxu1  ;;  %2244 = vadd.xlane.f32.xlu0 %v2243_v4 }
 0x5ad   : > { %2247 = vadd.xlane.f32.xlu1 %v2246_v34 }
 0x5e4   : > { %v7320_v3 = vpop.f32.mrb[36].mxu1 }
 0x5e5   : > { %v7322_v7 = vpop.f32.mrb[37].mxu1 }
 0x5e6   : > { %v7324_v31 = vpop.f32.mrb[38].mxu1 }
 0x5e7   : > { %v7326_v55 = vpop.f32.mrb[39].mxu1 }
 0x5ec   : > { %v7328_v57 = vpop.f32.mrb[40].mxu1 }
 0x5ed   : > { %v7330_v59 = vpop.f32.mrb[41].mxu1  ;;  %v2177_v60 = vsel %vm1404_vm0, %v7328_v57, -inf }
 0x5ee   : > { %2178 = vmax.xlane.f32.xlu0 %v2177_v60  ;;  %v7334_v6 = vpop.f32.mrb[42].mxu1  ;;  %v2171_v17 = vsel %vm1404_vm0, %v7330_v59, -inf }
 0x5ef   : > { %v7336_v21 = vpop.f32.mrb[43].mxu1 }
 0x5f2   : > { %2172 = vmax.xlane.f32.xlu0 %v2171_v17 }
 0x5f4   : > { %v7340_v15 = vpop.f32.mrb[44].mxu1 }
 0x5f5   : > { %v7342_v11 = vpop.f32.mrb[45].mxu1  ;;  %v2189_v46 = vsel %vm1404_vm0, %v7340_v15, -inf }
 0x5f6   : > { %v7344_v58 = vpop.f32.mrb[46].mxu1  ;;  %v2183_v32 = vsel %vm1404_vm0, %v7342_v11, -inf }
 0x5f7   : > { %v7346_v42 = vpop.f32.mrb[47].mxu1 }
 0x608   : > { %2335 = vrot.lane.b32.xlu0 %v6983_v39, %s6400_s21 }
 0x627   : > { %2190 = vmax.xlane.f32.xlu0 %v2189_v46 }
 0x62b   : > { %2184 = vmax.xlane.f32.xlu0 %v2183_v32 }
 0x62c   : > { %v2161_v26 = vpop.xlane.xlu0 %2160 }
 0x62d   : > { %v2199_v2 = vsub.f32 %v2019_v27, %v2161_v26 }
 0x62e   : > { %v2164_v29 = vpop.xlane.xlu1 %2163 }
 0x62f   : > { %v2219_v33 = vmul.f32 1.442695, %v2199_v2  ;;  %v2200_v62 = vsub.f32 %v2022_v47, %v2164_v29 }
 0x630   : > { %v2167_v48 = vpop.xlane.xlu0 %2166 }
 0x631   : > { %6087 = vpow2.f32 %v2219_v33  ;;  %v2221_v19 = vmul.f32 1.442695, %v2200_v62  ;;  %v2201_v18 = vsub.f32 %v5649_v12, %v2167_v48  ;;  %v2180_v33 = vsel %vm1404_vm0, %v7334_v6, -inf }
 0x632   : > { %v2170_v41 = vpop.xlane.xlu1 %2169 }
 0x633   : > { %6089 = vpow2.f32 %v2221_v19  ;;  %v2223_v39 = vmul.f32 1.442695, %v2201_v18  ;;  %v2202_v44 = vsub.f32 %v5650_v52, %v2170_v41 }
 0x634   : > { %v2251_v35 = vpop.xlane.xlu0 %2250 }
 0x635   : > { %v2225_v16 = vmul.f32 1.442695, %v2202_v44  ;;  %6091 = vrcp.f32 %v2251_v35 }
 0x636   : > { %v2254_v51 = vpop.xlane.xlu1 %2253  ;;  %6093 = vpow2.f32 %v2223_v39 }
 0x637   : > { %6095 = vrcp.f32 %v2254_v51 }
 0x638   : > { %v2245_v13 = vpop.xlane.xlu0 %2244 }
 0x639   : > { %6097 = vrcp.f32 %v2245_v13 }
 0x63a   : > { %6099 = vpow2.f32 %v2225_v16  ;;  %v2248_v27 = vpop.xlane.xlu1 %2247 }
 0x63b   : > { %v7354_v14 = vpop.eup %6087  ;;  %6101 = vrcp.f32 %v2248_v27 }
 0x63c   : > { %v2255_v12 = vsel %vm1404_vm0, %v7354_v14, 0.0 }
 0x63d   : > { %v7358_v47 = vpop.eup %6089  ;;  %2256 = vadd.xlane.f32.xlu1 %v2255_v12 }
 0x63e   : > { %v2258_v45 = vsel %vm1404_vm0, %v7358_v47, 0.0 }
 0x63f   : > { %v6092_v52 = vpop.eup %6091 }
 0x640   : > { %v7362_v49 = vpop.eup %6093  ;;  %v7367_v60 = vmul.f32 %v6092_v52, %v7295_v61 }
 0x641   : > { %2339 = vrot.lane.b32.xlu0 %v6997_v8, %s6400_s21  ;;  %2259 = vadd.xlane.f32.xlu1 %v2258_v45  ;;  %v6096_v4 = vpop.eup %6095  ;;  %v2261_v32 = vsel %vm1404_vm0, %v7362_v49, 0.0 }
 0x642   : > { %v7370_v17 = vmul.f32 %v6096_v4, %v7298_v43 }
 0x643   : > { %v6098_v34 = vpop.eup %6097 }
 0x644   : > { %v7372_v46 = vpop.eup %6099  ;;  %v2324_v2 = vpack.c.bf16 %v7370_v17, %v7367_v60  ;;  %v2307_v8 = vmul.f32 %v6098_v34, %v7302_v9  ;;  %v2192_v9 = vsel %vm1404_vm0, %v7344_v58, -inf }
 0x645   : > { %v6102_v26 = vpop.eup %6101  ;;  %2341 = vrot.lane.b32.xlu0 %v6995_v54, %s6400_s21  ;;  %2262 = vadd.xlane.f32.xlu1 %v2261_v32  ;;  %v2264_v43 = vsel %vm1404_vm0, %v7372_v46, 0.0  ;;  %v2174_v54 = vsel %vm1404_vm0, %v7336_v21, -inf }
 0x646   : > { %v2308_v61 = vmul.f32 %v6102_v26, %v7308_v40  ;;  %v2186_v40 = vsel %vm1404_vm0, %v7346_v42, -inf }
 0x648   : > { %v2323_v29 = vpack.c.bf16 %v2308_v61, %v2307_v8 }
 0x649   : > { %2428 = vrot.lane.b32.xlu0 %v7025_v24, %s6400_s21  ;;  %2265 = vadd.xlane.f32.xlu1 %v2264_v43 }
 0x64a   : > { %5675 = vmatprep.mubr.msk.bf16.mxu1 %vm1404_vm0, %v2323_v29 }
 0x64d   : > { %2181 = vmax.xlane.f32.xlu1 %v2180_v33 }
 0x651   : > { %2175 = vmax.xlane.f32.xlu1 %v2174_v54 }
 0x655   : > { %2193 = vmax.xlane.f32.xlu1 %v2192_v9 }
 0x659   : > { %2187 = vmax.xlane.f32.xlu1 %v2186_v40 }
 0x66a   : > { %2337 = vrot.lane.b32.xlu1 %v6981_v38, %s6400_s21 }
 0x67b   : > { %v2179_v24 = vpop.xlane.xlu0 %2178 }
 0x67c   : > { %v2205_v62 = vsub.f32 %v7328_v57, %v2179_v24 }
 0x67e   : > { %v2231_v48 = vmul.f32 1.442695, %v2205_v62 }
 0x67f   : > { %v2173_v19 = vpop.xlane.xlu0 %2172 }
 0x680   : > { %6103 = vpow2.f32 %v2231_v48  ;;  %v2203_v18 = vsub.f32 %v7330_v59, %v2173_v19 }
 0x682   : > { %v2227_v41 = vmul.f32 1.442695, %v2203_v18 }
 0x683   : > { %v2336_v39 = vpop.permute.xlu0 %2335 }
 0x684   : > { %6105 = vpow2.f32 %v2227_v41  ;;  %5667 = vmatprep.subr.bf16.mxu1 %v2336_v39 }
 0x685   : > { %5668 = vmatpush3.bf16.msra.mxu1 %v2336_v39 }
 0x68a   : > { %v7399_v44 = vpop.eup %6103 }
 0x68b   : > { %v2273_v35 = vsel %vm1404_vm0, %v7399_v44, 0.0 }
 0x68c   : > { %2274 = vadd.xlane.f32.xlu0 %v2273_v35 }
 0x68e   : > { %v7403_v38 = vpop.eup %6105 }
 0x68f   : > { %v2267_v57 = vsel %vm1404_vm0, %v7403_v38, 0.0 }
 0x690   : > { %2268 = vadd.xlane.f32.xlu0 %v2267_v57 }
 0x6b4   : > { %v2191_v27 = vpop.xlane.xlu0 %2190 }
 0x6b5   : > { %v2209_v45 = vsub.f32 %v7340_v15, %v2191_v27 }
 0x6b7   : > { %v2239_v8 = vmul.f32 1.442695, %v2209_v45 }
 0x6b8   : > { %v2185_v34 = vpop.xlane.xlu0 %2184 }
 0x6b9   : > { %v2207_v61 = vsub.f32 %v7342_v11, %v2185_v34  ;;  %v5898_v34 = vld [vmem:[%s6499_s11 + $0x18] sm:$0xff]  }
 0x6bb   : > { %v2235_v33 = vmul.f32 1.442695, %v2207_v61 }
 0x6bc   : > { %v2340_v15 = vpop.permute.xlu0 %2339 }
 0x6c0   : > { %v2342_v19 = vpop.permute.xlu0 %2341 }
 0x6ca   : > { %v2257_v16 = vpop.xlane.xlu1 %2256 }
 0x6ce   : > { %v2260_v51 = vpop.xlane.xlu1 %2259 }
 0x6d2   : > { %v2263_v59 = vpop.xlane.xlu1 %2262 }
 0x6d6   : > { %v2266_v13 = vpop.xlane.xlu1 %2265 }
 0x6da   : > { %v2182_v12 = vpop.xlane.xlu1 %2181 }
 0x6db   : > { %v2206_v52 = vsub.f32 %v7334_v6, %v2182_v12 }
 0x6dd   : > { %v2233_v4 = vmul.f32 1.442695, %v2206_v52 }
 0x6de   : > { %v2176_v32 = vpop.xlane.xlu1 %2175 }
 0x6df   : > { %6107 = vpow2.f32 %v2233_v4  ;;  %v2204_v26 = vsub.f32 %v7336_v21, %v2176_v32  ;;  %v5901_v32 = vld [vmem:[%s6499_s11 + $0x30] sm:$0xff]  }
 0x6e1   : > { %v2229_v43 = vmul.f32 1.442695, %v2204_v26 }
 0x6e2   : > { %v2194_v29 = vpop.xlane.xlu1 %2193 }
 0x6e3   : > { %6109 = vpow2.f32 %v2229_v43  ;;  %v2210_v54 = vsub.f32 %v7344_v58, %v2194_v29 }
 0x6e4   : > { %6111 = vpow2.f32 %v2239_v8 }
 0x6e5   : > { %6113 = vrcp.f32 %v2260_v51  ;;  %v2241_v40 = vmul.f32 1.442695, %v2210_v54 }
 0x6e6   : > { %v2188_v6 = vpop.xlane.xlu1 %2187  ;;  %6115 = vrcp.f32 %v2257_v16  ;;  %v2429_v16 = vpop.permute.xlu0 %2428 }
 0x6e7   : > { %6117 = vpow2.f32 %v2235_v33  ;;  %v2208_v21 = vsub.f32 %v7346_v42, %v2188_v6 }
 0x6e8   : > { %6119 = vrcp.f32 %v2266_v13 }
 0x6e9   : > { %v7412_v9 = vpop.eup %6107  ;;  %6121 = vpow2.f32 %v2241_v40  ;;  %v2237_v58 = vmul.f32 1.442695, %v2208_v21 }
 0x6ea   : > { %v2338_v24 = vpop.permute.xlu1 %2337  ;;  %v2276_v11 = vsel %vm1404_vm0, %v7412_v9, 0.0  ;;  %6123 = vrcp.f32 %v2263_v59 }
 0x6eb   : > { %2277 = vadd.xlane.f32.xlu0 %v2276_v11  ;;  %5669 = vmatprep.subr.bf16.mxu1 %v2338_v24  ;;  %6125 = vpow2.f32 %v2237_v58 }
 0x6ec   : > { %5670 = vmatpush3.bf16.msra.mxu1 %v2338_v24 }
 0x6ed   : > { %v7417_v62 = vpop.eup %6109  ;;  %5671 = vmatprep.subr.bf16.mxu1 %v2340_v15 }
 0x6ee   : > { %v7419_v48 = vpop.eup %6111  ;;  %v2270_v42 = vsel %vm1404_vm0, %v7417_v62, 0.0 }
 0x6ef   : > { %v6114_v18 = vpop.eup %6113  ;;  %2271 = vadd.xlane.f32.xlu1 %v2270_v42  ;;  %v2285_v39 = vsel %vm1404_vm0, %v7419_v48, 0.0 }
 0x6f0   : > { %5672 = vmatpush3.bf16.msra.mxu1 %v2340_v15  ;;  %v6116_v41 = vpop.eup %6115  ;;  %v2312_v35 = vmul.f32 %v6114_v18, %v7358_v47 }
 0x6f1   : > { %5673 = vmatprep.subr.bf16.mxu1 %v2342_v19  ;;  %v7426_v57 = vpop.eup %6117  ;;  %v2311_v51 = vmul.f32 %v6116_v41, %v7354_v14 }
 0x6f2   : > { %v6120_v59 = vpop.eup %6119  ;;  %v2279_v13 = vsel %vm1404_vm0, %v7426_v57, 0.0 }
 0x6f3   : > { %2286 = vadd.xlane.f32.xlu1 %v2285_v39  ;;  %v2325_v27 = vpack.c.bf16 %v2312_v35, %v2311_v51  ;;  %v7431_v12 = vpop.eup %6121  ;;  %v2314_v14 = vmul.f32 %v6120_v59, %v7372_v46  ;;  %v5896_v46 = vld [vmem:[%s6499_s11 + $0x8] sm:$0xff]  }
 0x6f4   : > { %5674 = vmatpush3.bf16.msra.mxu1 %v2342_v19  ;;  %v6124_v47 = vpop.eup %6123  ;;  %v2288_v52 = vsel %vm1404_vm0, %v7431_v12, 0.0 }
 0x6f5   : > { %5683 = vmatprep.subr.bf16.mxu1 %v2429_v16  ;;  %v7441_v45 = vpop.eup %6125  ;;  %v2313_v4 = vmul.f32 %v6124_v47, %v7362_v49  ;;  %v5895_v49 = vld [vmem:[%s6499_s11] sm:$0xff]  }
 0x6f6   : > { %v2282_v17 = vsel %vm1404_vm0, %v7441_v45, 0.0  ;;  %5699 = vmatprep.subr.bf16.mxu0 %v5895_v49 }
 0x6f7   : > { %2280 = vadd.xlane.f32.xlu1 %v2279_v13  ;;  %5676 = vmatmul.mubr.msk.bf16.vlgmr.msra.gmra.mrb[48].mxu1 %vm1404_vm0, %v2324_v2  ;;  %v2326_v60 = vpack.c.bf16 %v2314_v14, %v2313_v4  ;;  %v5897_v2 = vld [vmem:[%s6499_s11 + $0x10] sm:$0xff]  }
 0x6f8   : > { %5679 = vmatprep.mubr.msk.bf16.mxu1 %vm1404_vm0, %v2325_v27  ;;  %5684 = vmatpush3.bf16.msra.mxu1 %v2429_v16 }
 0x6f9   : > { %5700 = vmatpush3.bf16.msra.mxu0 %v5895_v49 }
 0x6fa   : > { %5701 = vmatprep.subr.bf16.mxu0 %v5896_v46 }
 0x6fb   : > { %2289 = vadd.xlane.f32.xlu1 %v2288_v52 }
 0x6fd   : > { %5702 = vmatpush3.bf16.msra.mxu0 %v5896_v46 }
 0x6fe   : > { %5703 = vmatprep.subr.bf16.mxu0 %v5897_v2 }
 0x6ff   : > { %2283 = vadd.xlane.f32.xlu1 %v2282_v17  ;;  %5680 = vmatmul.mubr.msk.bf16.gmra.mrb[52].mxu1 %vm1404_vm0, %v2326_v60 }
 0x701   : > { %2432 = vrot.lane.b32.xlu0 %v7053_v37, %s6400_s21  ;;  %5704 = vmatpush3.bf16.msra.mxu0 %v5897_v2  ;;  %v5899_v37 = vld [vmem:[%s6499_s11 + $0x20] sm:$0xff]  }
 0x702   : > { %5705 = vmatprep.subr.bf16.mxu0 %v5898_v34 }
 0x705   : > { %2434 = vrot.lane.b32.xlu0 %v7049_v30, %s6400_s21  ;;  %5706 = vmatpush3.bf16.msra.mxu0 %v5898_v34  ;;  %v5900_v30 = vld [vmem:[%s6499_s11 + $0x28] sm:$0xff]  }
 0x706   : > { %5707 = vmatprep.subr.bf16.mxu0 %v5899_v37 }
 0x709   : > { %5708 = vmatpush3.bf16.msra.mxu0 %v5899_v37 }
 0x70a   : > { %5709 = vmatprep.subr.bf16.mxu0 %v5900_v30 }
 0x70d   : > { %5710 = vmatpush3.bf16.msra.mxu0 %v5900_v30 }
 0x70e   : > { %5711 = vmatprep.subr.bf16.mxu0 %v5901_v32 }
 0x710   : > { %2430 = vrot.lane.b32.xlu1 %v7021_v25, %s6400_s21 }
 0x711   : > { %5712 = vmatpush3.bf16.msra.mxu0 %v5901_v32 }
 0x719   : > { %v2275_v25 = vpop.xlane.xlu0 %2274 }
 0x71d   : > { %v2269_v26 = vpop.xlane.xlu0 %2268 }
 0x71e   : > { %6127 = vrcp.f32 %v2269_v26 }
 0x728   : > { %v6128_v29 = vpop.eup %6127 }
 0x729   : > { %v2315_v15 = vmul.f32 %v6128_v29, %v7403_v38 }
 0x778   : > { %v2278_v54 = vpop.xlane.xlu0 %2277 }
 0x77c   : > { %v2272_v8 = vpop.xlane.xlu1 %2271  ;;  %v2433_v11 = vpop.permute.xlu0 %2432 }
 0x77d   : > { %6129 = vrcp.f32 %v2272_v8 }
 0x77e   : > { %6131 = vrcp.f32 %v2278_v54 }
 0x77f   : > { %6133 = vrcp.f32 %v2275_v25 }
 0x780   : > { %v2287_v61 = vpop.xlane.xlu1 %2286  ;;  %v2435_v18 = vpop.permute.xlu0 %2434 }
 0x784   : > { %v2281_v43 = vpop.xlane.xlu1 %2280 }
 0x785   : > { %6135 = vrcp.f32 %v2281_v43 }
 0x787   : > { %v6130_v33 = vpop.eup %6129 }
 0x788   : > { %v2290_v6 = vpop.xlane.xlu1 %2289  ;;  %v2316_v40 = vmul.f32 %v6130_v33, %v7417_v62  ;;  %v6132_v19 = vpop.eup %6131 }
 0x789   : > { %v6134_v42 = vpop.eup %6133  ;;  %v2318_v41 = vmul.f32 %v6132_v19, %v7412_v9 }
 0x78a   : > { %v2327_v21 = vpack.c.bf16 %v2316_v40, %v2315_v15  ;;  %v2317_v35 = vmul.f32 %v6134_v42, %v7399_v44  ;;  %v5902_v44 = vld [vmem:[%s6499_s11 + $0x38] sm:$0xff]  }
 0x78b   : > { %5713 = vmatprep.subr.bf16.mxu0 %v5902_v44 }
 0x78c   : > { %5691 = vmatprep.mubr.msk.bf16.mxu1 %vm1404_vm0, %v2327_v21  ;;  %v2284_v24 = vpop.xlane.xlu1 %2283  ;;  %v2328_v51 = vpack.c.bf16 %v2318_v41, %v2317_v35  ;;  %5714 = vmatpush3.bf16.msra.mxu0 %v5902_v44 }
 0x78d   : > { %6137 = vrcp.f32 %v2284_v24 }
 0x78e   : > { %6139 = vrcp.f32 %v2290_v6 }
 0x78f   : > { %6141 = vrcp.f32 %v2287_v61  ;;  %v6136_v38 = vpop.eup %6135 }
 0x790   : > { %v2431_v58 = vpop.permute.xlu1 %2430  ;;  %v2319_v16 = vmul.f32 %v6136_v38, %v7426_v57 }
 0x791   : > { %5685 = vmatprep.subr.bf16.mxu1 %v2431_v58 }
 0x792   : > { %5686 = vmatpush3.bf16.msra.mxu1 %v2431_v58 }
 0x793   : > { %5687 = vmatprep.subr.bf16.mxu1 %v2433_v11 }
 0x796   : > { %5688 = vmatpush3.bf16.msra.mxu1 %v2433_v11 }
 0x797   : > { %v6138_v62 = vpop.eup %6137  ;;  %5689 = vmatprep.subr.bf16.mxu1 %v2435_v18 }
 0x798   : > { %v2320_v39 = vmul.f32 %v6138_v62, %v7441_v45  ;;  %v6140_v59 = vpop.eup %6139 }
 0x799   : > { %v6142_v27 = vpop.eup %6141  ;;  %v2322_v47 = vmul.f32 %v6140_v59, %v7431_v12  ;;  %v5903_v59 = vld [vmem:[%s6505_s20] ss:$16 sps:$4 sm:$0xff]  }
 0x79a   : > { %5690 = vmatpush3.bf16.msra.mxu1 %v2435_v18  ;;  %v2329_v13 = vpack.c.bf16 %v2320_v39, %v2319_v16  ;;  %v2321_v9 = vmul.f32 %v6142_v27, %v7419_v48  ;;  %v5906_v27 = vld [vmem:[%s6505_s20 + $0x8] ss:$16 sps:$4 sm:$0xff]  }
 0x79c   : > { %v2330_v14 = vpack.c.bf16 %v2322_v47, %v2321_v9  ;;  %v5908_v47 = vld [vmem:[%s6505_s20 + $0xc] ss:$16 sps:$4 sm:$0xff]  }
 0x79d   : > { %5692 = vmatmul.mubr.msk.bf16.vlgmr.msra.gmra.mrb[56].mxu1 %vm1404_vm0, %v2328_v51  ;;  %3326 = vmatprep.subr.bf16.mxu0 %v5908_v47  ;;  %v5926_v47 = vld [vmem:[%s6505_s20 + $0x6c] ss:$16 sps:$4 sm:$0xff]  }
 0x79e   : > { %5695 = vmatprep.mubr.msk.bf16.mxu1 %vm1404_vm0, %v2329_v13  ;;  %v5905_v13 = vld [vmem:[%s6505_s20 + $0x4] ss:$16 sps:$4 sm:$0xff]  }
 0x79f   : > { %3213 = vmatprep.subr.bf16.mxu1 %v5905_v13 }
 0x7a0   : > { %3214 = vmatpush1.bf16.msra.mxu1 %v5903_v59 }
 0x7a5   : > { %5696 = vmatmul.mubr.msk.bf16.gmra.mrb[60].mxu1 %vm1404_vm0, %v2330_v14 }
 0x7a6   : > { %3245 = vmatprep.mubr.bf16.mxu1 %v6399_v10 }
 0x7ca   : > { %v5677_v57 = vpop.f32.mrb[48].mxu1 }
 0x7cb   : > { %v2393_v52 = vpop.f32.mrb[49].mxu1 }
 0x7cc   : > { %v5678_v45 = vpop.f32.mrb[50].mxu1 }
 0x7cd   : > { %v5828_v4 = vpack.i.bf16 %v5678_v45, %v5677_v57  ;;  %v2396_v60 = vpop.f32.mrb[51].mxu1 }
 0x7ce   : > { %v5823_v17 = vpack.i.bf16 %v2396_v60, %v2393_v52 }
 0x7cf   : > { %5829 = vrot.lane.b32.xlu1 %v5828_v4, %s6400_s21 }
 0x7d0   : > { %5824 = vrot.lane.b32.xlu0 %v5823_v17, %s6400_s21 }
 0x7d2   : > { %v5681_v12 = vpop.f32.mrb[52].mxu1 }
 0x7d3   : > { %v2409_v48 = vpop.f32.mrb[53].mxu1 }
 0x7d4   : > { %v5682_v49 = vpop.f32.mrb[54].mxu1 }
 0x7d5   : > { %v5838_v46 = vpack.i.bf16 %v5682_v49, %v5681_v12  ;;  %v2412_v2 = vpop.f32.mrb[55].mxu1 }
 0x7d6   : > { %v5833_v34 = vpack.i.bf16 %v2412_v2, %v2409_v48 }
 0x7d7   : > { %5839 = vrot.lane.b32.xlu1 %v5838_v46, %s6400_s21 }
 0x7d8   : > { %5834 = vrot.lane.b32.xlu0 %v5833_v34, %s6400_s21 }
 0x841   : > { %v5830_v37 = vpop.permute.xlu1 %5829 }
 0x842   : > { %v5832_v30 = vunpack.i.h.bf16 %v5830_v37  ;;  %v5831_v32 = vunpack.i.l.bf16 %v5830_v37  ;;  %v5825_v25 = vpop.permute.xlu0 %5824 }
 0x843   : > { %v5827_v26 = vunpack.i.h.bf16 %v5825_v25  ;;  %v5826_v8 = vunpack.i.l.bf16 %v5825_v25 }
 0x844   : > { %v2584_v61 = vsel %vm1404_vm0, %v7280_v53, %v5832_v30  ;;  %v2583_v43 = vsel %vm1404_vm0, %v7276_v5, %v5831_v32 }
 0x845   : > { %v2598_v29 = vpack.c.bf16 %v2584_v61, %v2583_v43  ;;  %v2581_v33 = vsel %vm1404_vm0, %v7278_v23, %v5826_v8  ;;  %v2582_v54 = vsel %vm1404_vm0, %v7282_v56, %v5827_v26  ;;  %v6303_v43 = vld [vmem:[#allocation2] sm:$0xff] }
 0x846   : > { %v2597_v6 = vpack.c.bf16 %v2582_v54, %v2581_v33 }
 0x848   : > { %5715 = vmatprep.mubr.bf16.mxu0 %v2597_v6 }
 0x849   : > { %v5840_v15 = vpop.permute.xlu1 %5839  ;;  %5716 = vmatmul.mubr.bf16.vlgmr.msra.gmra.mrb[48].mxu0 %v2598_v29 }
 0x84a   : > { %v5842_v40 = vunpack.i.h.bf16 %v5840_v15  ;;  %v5841_v21 = vunpack.i.l.bf16 %v5840_v15  ;;  %v5835_v24 = vpop.permute.xlu0 %5834  ;;  %3327 = vmatpush1.bf16.msra.mxu0 %v5906_v27  ;;  %v5923_v27 = vld [vmem:[%s6505_s20 + $0x64] ss:$16 sps:$4 sm:$0xff]  }
 0x84b   : > { %v5837_v11 = vunpack.i.h.bf16 %v5835_v24  ;;  %v5836_v58 = vunpack.i.l.bf16 %v5835_v24 }
 0x84c   : > { %v2587_v53 = vsel %vm1404_vm0, %v7284_v36, %v5841_v21  ;;  %v2588_v5 = vsel %vm1404_vm0, %v7288_v63, %v5842_v40 }
 0x84d   : > { %v2585_v23 = vsel %vm1404_vm0, %v7286_v0, %v5836_v58  ;;  %v2586_v56 = vsel %vm1404_vm0, %v7290_v20, %v5837_v11  ;;  %v2600_v19 = vpack.c.bf16 %v2588_v5, %v2587_v53  ;;  %v6306_v53 = vld [vmem:[#allocation2 + $0x10] sm:$0xff] }
 0x84e   : > { %v2599_v42 = vpack.c.bf16 %v2586_v56, %v2585_v23  ;;  %v6307_v23 = vld [vmem:[#allocation2 + $0x28] sm:$0xff] }
 0x850   : > { %5719 = vmatprep.mubr.bf16.mxu0 %v2599_v42 }
 0x851   : > { %5720 = vmatmul.mubr.bf16.gmra.mrb[52].mxu0 %v2600_v19 }
 0x870   : > { %v5693_v38 = vpop.f32.mrb[56].mxu1 }
 0x871   : > { %v2486_v18 = vpop.f32.mrb[57].mxu1 }
 0x872   : > { %v5694_v62 = vpop.f32.mrb[58].mxu1 }
 0x873   : > { %v5848_v36 = vpack.i.bf16 %v5694_v62, %v5693_v38  ;;  %v2489_v41 = vpop.f32.mrb[59].mxu1  ;;  %v5911_v38 = vld [vmem:[%s6505_s20 + $0x24] ss:$16 sps:$4 sm:$0xff]   ;;  %v5909_v62 = vld [vmem:[%s6505_s20 + $0x20] ss:$16 sps:$4 sm:$0xff]  }
 0x874   : > { %v5843_v63 = vpack.i.bf16 %v2489_v41, %v2486_v18  ;;  %v5914_v18 = vld [vmem:[%s6505_s20 + $0x2c] ss:$16 sps:$4 sm:$0xff]   ;;  %v6308_v41 = vld [vmem:[#allocation2 + $0x20] sm:$0xff]  ;;  %3215 = vmatprep.subr.bf16.mxu1 %v5911_v38 }
 0x875   : > { %5849 = vrot.lane.b32.xlu1 %v5848_v36, %s6400_s21  ;;  %v5912_v36 = vld [vmem:[%s6505_s20 + $0x28] ss:$16 sps:$4 sm:$0xff]   ;;  %3328 = vmatprep.subr.bf16.mxu0 %v5914_v18 }
 0x876   : > { %5844 = vrot.lane.b32.xlu0 %v5843_v63, %s6400_s21  ;;  %3216 = vmatpush1.bf16.msra.mxu1 %v5909_v62 }
 0x877   : > { %3329 = vmatpush1.bf16.msra.mxu0 %v5912_v36 }
 0x878   : > { %v5697_v0 = vpop.f32.mrb[60].mxu1 }
 0x879   : > { %v2502_v20 = vpop.f32.mrb[61].mxu1 }
 0x87a   : > { %v5698_v39 = vpop.f32.mrb[62].mxu1 }
 0x87b   : > { %v5858_v35 = vpack.i.bf16 %v5698_v39, %v5697_v0  ;;  %v2505_v16 = vpop.f32.mrb[63].mxu1  ;;  %v6309_v0 = vld [vmem:[#allocation2 + $0x38] sm:$0xff]  ;;  %v5917_v39 = vld [vmem:[%s6505_s20 + $0x44] ss:$16 sps:$4 sm:$0xff]  }
 0x87c   : > { %v5853_v51 = vpack.i.bf16 %v2505_v16, %v2502_v20  ;;  %v5915_v16 = vld [vmem:[%s6505_s20 + $0x40] ss:$16 sps:$4 sm:$0xff]   ;;  %3217 = vmatprep.subr.bf16.mxu1 %v5917_v39 }
 0x87d   : > { %5859 = vrot.lane.b32.xlu1 %v5858_v35, %s6400_s21  ;;  %v5920_v35 = vld [vmem:[%s6505_s20 + $0x4c] ss:$16 sps:$4 sm:$0xff]   ;;  %3218 = vmatpush1.bf16.msra.mxu1 %v5915_v16 }
 0x87e   : > { %5854 = vrot.lane.b32.xlu0 %v5853_v51, %s6400_s21  ;;  %v5918_v51 = vld [vmem:[%s6505_s20 + $0x48] ss:$16 sps:$4 sm:$0xff]   ;;  %3330 = vmatprep.subr.bf16.mxu0 %v5920_v35 }
 0x87f   : > { %3331 = vmatpush1.bf16.msra.mxu0 %v5918_v51  ;;  %3219 = vmatprep.subr.bf16.mxu1 %v5923_v27 }
 0x880   : > { %3332 = vmatprep.subr.bf16.mxu0 %v5926_v47 }
 0x8e7   : > { %v5850_v9 = vpop.permute.xlu1 %5849 }
 0x8e8   : > { %v5852_v14 = vunpack.i.h.bf16 %v5850_v9  ;;  %v5851_v44 = vunpack.i.l.bf16 %v5850_v9  ;;  %v5845_v57 = vpop.permute.xlu0 %5844  ;;  %v5921_v9 = vld [vmem:[%s6505_s20 + $0x60] ss:$16 sps:$4 sm:$0xff]  }
 0x8e9   : > { %v5847_v52 = vunpack.i.h.bf16 %v5845_v57  ;;  %v5846_v45 = vunpack.i.l.bf16 %v5845_v57  ;;  %3220 = vmatpush1.bf16.msra.mxu1 %v5921_v9 }
 0x8ea   : > { %v2591_v4 = vsel %vm1404_vm0, %v7306_v28, %v5851_v44  ;;  %v2592_v60 = vsel %vm1404_vm0, %v7312_v22, %v5852_v14  ;;  %v5924_v14 = vld [vmem:[%s6505_s20 + $0x68] ss:$16 sps:$4 sm:$0xff]   ;;  %v6310_v44 = vld [vmem:[#allocation2 + $0x30] sm:$0xff] }
 0x8eb   : > { %v2589_v17 = vsel %vm1404_vm0, %v7310_v1, %v5846_v45  ;;  %v2590_v12 = vsel %vm1404_vm0, %v7316_v50, %v5847_v52  ;;  %v2602_v48 = vpack.c.bf16 %v2592_v60, %v2591_v4  ;;  %3333 = vmatpush1.bf16.msra.mxu0 %v5924_v14  ;;  %v5929_v52 = vld [vmem:[%s6505_s20 + $0x84] ss:$16 sps:$4 sm:$0xff]   ;;  %v5932_v45 = vld [vmem:[%s6505_s20 + $0x8c] ss:$16 sps:$4 sm:$0xff]   ;;  %v5927_v4 = vld [vmem:[%s6505_s20 + $0x80] ss:$16 sps:$4 sm:$0xff]  }
 0x8ec   : > { %v2601_v49 = vpack.c.bf16 %v2590_v12, %v2589_v17  ;;  %v5930_v60 = vld [vmem:[%s6505_s20 + $0x88] ss:$16 sps:$4 sm:$0xff]   ;;  %3221 = vmatprep.subr.bf16.mxu1 %v5929_v52  ;;  %3334 = vmatprep.subr.bf16.mxu0 %v5932_v45  ;;  %v5935_v12 = vld [vmem:[%s6505_s20 + $0xa4] ss:$16 sps:$4 sm:$0xff]  }
 0x8ed   : > { %3222 = vmatpush1.bf16.msra.mxu1 %v5927_v4 }
 0x8ee   : > { %5723 = vmatprep.mubr.bf16.mxu0 %v2601_v49  ;;  %v5933_v49 = vld [vmem:[%s6505_s20 + $0xa0] ss:$16 sps:$4 sm:$0xff]   ;;  %3223 = vmatprep.subr.bf16.mxu1 %v5935_v12 }
 0x8ef   : > { %v5860_v46 = vpop.permute.xlu1 %5859  ;;  %5724 = vmatmul.mubr.bf16.gmra.mrb[56].mxu0 %v2602_v48  ;;  %v5938_v48 = vld [vmem:[%s6505_s20 + $0xac] ss:$16 sps:$4 sm:$0xff]  }
 0x8f0   : > { %v5862_v2 = vunpack.i.h.bf16 %v5860_v46  ;;  %v5861_v34 = vunpack.i.l.bf16 %v5860_v46  ;;  %v5855_v37 = vpop.permute.xlu0 %5854  ;;  %3335 = vmatpush1.bf16.msra.mxu0 %v5930_v60  ;;  %v5936_v46 = vld [vmem:[%s6505_s20 + $0xa8] ss:$16 sps:$4 sm:$0xff]  }
 0x8f1   : > { %v5857_v30 = vunpack.i.h.bf16 %v5855_v37  ;;  %v5856_v32 = vunpack.i.l.bf16 %v5855_v37  ;;  %3336 = vmatprep.subr.bf16.mxu0 %v5938_v48  ;;  %3224 = vmatpush1.bf16.msra.mxu1 %v5933_v49  ;;  %v5939_v37 = vld [vmem:[%s6505_s20 + $0xc0] ss:$16 sps:$4 sm:$0xff]  }
 0x8f2   : > { %v2595_v28 = vsel %vm1404_vm0, %v7320_v3, %v5861_v34  ;;  %v2596_v22 = vsel %vm1404_vm0, %v7324_v31, %v5862_v2  ;;  %v6304_v31 = vld [vmem:[#allocation2 + $0x8] sm:$0xff]  ;;  %v5941_v2 = vld [vmem:[%s6505_s20 + $0xc4] ss:$16 sps:$4 sm:$0xff]  }
 0x8f3   : > { %v2593_v1 = vsel %vm1404_vm0, %v7322_v7, %v5856_v32  ;;  %v2594_v50 = vsel %vm1404_vm0, %v7326_v55, %v5857_v30  ;;  %v2604_v25 = vpack.c.bf16 %v2596_v22, %v2595_v28  ;;  %v6305_v55 = vld [vmem:[#allocation2 + $0x18] sm:$0xff]  ;;  %3225 = vmatprep.subr.bf16.mxu1 %v5941_v2  ;;  %v5947_v32 = vld [vmem:[%s6505_s20 + $0xe4] ss:$16 sps:$4 sm:$0xff]   ;;  %v5945_v22 = vld [vmem:[%s6505_s20 + $0xe0] ss:$16 sps:$4 sm:$0xff]  }
 0x8f4   : > { %v2603_v26 = vpack.c.bf16 %v2594_v50, %v2593_v1  ;;  %3337 = vmatpush1.bf16.msra.mxu0 %v5936_v46  ;;  %v5944_v34 = vld [vmem:[%s6505_s20 + $0xcc] ss:$16 sps:$4 sm:$0xff]   ;;  %v5942_v30 = vld [vmem:[%s6505_s20 + $0xc8] ss:$16 sps:$4 sm:$0xff]   ;;  %v6311_v46 = vld [vmem:[#allocation2 + $0x40] sm:$0xff] }
 0x8f5   : > { %3338 = vmatprep.subr.bf16.mxu0 %v5944_v34  ;;  %3226 = vmatpush1.bf16.msra.mxu1 %v5939_v37  ;;  %v5950_v28 = vld [vmem:[%s6505_s20 + $0xec] ss:$16 sps:$4 sm:$0xff]   ;;  %v5948_v1 = vld [vmem:[%s6505_s20 + $0xe8] ss:$16 sps:$4 sm:$0xff]  }
 0x8f6   : > { %5727 = vmatprep.mubr.bf16.mxu0 %v2603_v26  ;;  %3227 = vmatprep.subr.bf16.mxu1 %v5947_v32 }
 0x8f7   : > { %5728 = vmatmul.mubr.bf16.gmra.mrb[60].mxu0 %v2604_v25 }
 0x8f8   : > { %3358 = vmatprep.mubr.bf16.mxu0 %v6399_v10  ;;  %3339 = vmatpush1.bf16.msra.mxu0 %v5942_v30 }
 0x8f9   : > { %3340 = vmatprep.subr.bf16.mxu0 %v5950_v28  ;;  %3228 = vmatpush1.bf16.msra.mxu1 %v5945_v22  ;;  %v6312_v22 = vld [vmem:[#allocation2 + $0x48] sm:$0xff] }
 0x8fc   : > { %3341 = vmatpush1.bf16.msra.mxu0 %v5948_v1 }
 0x91c   : > { %v5717_v8 = vpop.f32.mrb[48].mxu0 }
 0x91d   : > { %v2703_v61 = vpop.f32.mrb[49].mxu0  ;;  %v7534_v5 = vadd.f32 %v6306_v53, %v5717_v8 }
 0x91e   : > { %v7519_v29 = vadd.f32 %v6303_v43, %v2703_v61  ;;  %v5718_v3 = vpop.f32.mrb[50].mxu0 }
 0x91f   : > { %v2706_v33 = vpop.f32.mrb[51].mxu0  ;;  %v7527_v6 = vadd.f32 %v6305_v55, %v5718_v3  ;;  %v2833_v19 = vmul.f32 %v7534_v5, %v7534_v5 }
 0x920   : > { %v7521_v54 = vadd.f32 %v6304_v31, %v2706_v33  ;;  %2783 = vadd.xlane.f32.xlu0 %v7519_v29  ;;  %v2831_v7 = vmul.f32 %v7519_v29, %v7519_v29 }
 0x921   : > { %v2834_v58 = vmul.f32 %v7527_v6, %v7527_v6 }
 0x922   : > { %2785 = vadd.xlane.f32.xlu1 %v7521_v54  ;;  %v2832_v24 = vmul.f32 %v7521_v54, %v7521_v54 }
 0x924   : > { %2847 = vadd.xlane.f32.xlu0 %v2831_v7  ;;  %v5721_v15 = vpop.f32.mrb[52].mxu0 }
 0x925   : > { %v2719_v40 = vpop.f32.mrb[53].mxu0  ;;  %v7566_v57 = vadd.f32 %v6310_v44, %v5721_v15 }
 0x926   : > { %2789 = vadd.xlane.f32.xlu1 %v7527_v6  ;;  %v5722_v21 = vpop.f32.mrb[54].mxu0  ;;  %v7548_v63 = vadd.f32 %v6308_v41, %v2719_v40 }
 0x927   : > { %v2722_v11 = vpop.f32.mrb[55].mxu0  ;;  %v7550_v20 = vadd.f32 %v6309_v0, %v5722_v21  ;;  %8722 = vst [vmem:[#allocation7_spill] sm:$0xff] %v7566_v57  ;;  %v2837_v17 = vmul.f32 %v7566_v57, %v7566_v57 }
 0x928   : > { %2849 = vadd.xlane.f32.xlu0 %v2832_v24  ;;  %v7536_v56 = vadd.f32 %v6307_v23, %v2722_v11  ;;  %v2835_v59 = vmul.f32 %v7548_v63, %v7548_v63 }
 0x929   : > { %8721 = vst [vmem:[#allocation6_spill] sm:$0xff] %v7550_v20  ;;  %v2838_v13 = vmul.f32 %v7550_v20, %v7550_v20 }
 0x92a   : > { %2853 = vadd.xlane.f32.xlu1 %v2834_v58  ;;  %8720 = vst [vmem:[#allocation5_spill] sm:$0xff] %v7536_v56  ;;  %v2836_v42 = vmul.f32 %v7536_v56, %v7536_v56 }
 0x92c   : > { %2787 = vadd.xlane.f32.xlu0 %v7534_v5 }
 0x92e   : > { %2793 = vadd.xlane.f32.xlu1 %v7536_v56 }
 0x930   : > { %2851 = vadd.xlane.f32.xlu0 %v2833_v19 }
 0x932   : > { %2857 = vadd.xlane.f32.xlu1 %v2836_v42 }
 0x934   : > { %2791 = vadd.xlane.f32.xlu0 %v7548_v63 }
 0x936   : > { %2797 = vadd.xlane.f32.xlu1 %v7550_v20 }
 0x938   : > { %2855 = vadd.xlane.f32.xlu0 %v2835_v59 }
 0x93a   : > { %2861 = vadd.xlane.f32.xlu1 %v2838_v13 }
 0x93c   : > { %2795 = vadd.xlane.f32.xlu0 %v7566_v57 }
 0x940   : > { %2859 = vadd.xlane.f32.xlu0 %v2837_v17 }
 0x9ad   : > { %v2784_v50 = vpop.xlane.xlu0 %2783 }
 0x9ae   : > { %v2815_v25 = vmul.f32 0.0078125, %v2784_v50  ;;  %v7616_v50 = vld [vmem:[%s467_s25] ss:$0 sm:$0xff] }
 0x9af   : > { %v2786_v26 = vpop.xlane.xlu1 %2785 }
 0x9b0   : > { %v2895_v61 = vmul.f32 %v2815_v25, %v2815_v25  ;;  %v2816_v43 = vmul.f32 0.0078125, %v2786_v26  ;;  %v2927_v52 = vsub.f32 %v7519_v29, %v2815_v25 }
 0x9b1   : > { %v2848_v8 = vpop.xlane.xlu0 %2847 }
 0x9b2   : > { %v2879_v3 = vmul.f32 0.0078125, %v2848_v8  ;;  %v2896_v15 = vmul.f32 %v2816_v43, %v2816_v43  ;;  %v2928_v12 = vsub.f32 %v7521_v54, %v2816_v43 }
 0x9b3   : > { %v2790_v33 = vpop.xlane.xlu1 %2789 }
 0x9b4   : > { %v2911_v31 = vsub.f32 %v2879_v3, %v2895_v61  ;;  %v7587_v7 = vmul.f32 0.0078125, %v2790_v33 }
 0x9b5   : > { %v2850_v55 = vpop.xlane.xlu0 %2849 }
 0x9b6   : > { %v2943_v40 = vadd.f32 1e-05, %v2911_v31  ;;  %v2880_v21 = vmul.f32 0.0078125, %v2850_v55  ;;  %v2898_v11 = vmul.f32 %v7587_v7, %v7587_v7 }
 0x9b7   : > { %v2854_v24 = vpop.xlane.xlu1 %2853 }
 0x9b8   : > { %6143 = vrsqrt.f32 %v2943_v40  ;;  %v2912_v58 = vsub.f32 %v2880_v21, %v2896_v15  ;;  %v2882_v53 = vmul.f32 0.0078125, %v2854_v24 }
 0x9b9   : > { %v2788_v23 = vpop.xlane.xlu0 %2787 }
 0x9ba   : > { %v2944_v19 = vadd.f32 1e-05, %v2912_v58  ;;  %v2914_v42 = vsub.f32 %v2882_v53, %v2898_v11  ;;  %v7591_v38 = vmul.f32 0.0078125, %v2788_v23  ;;  %v2930_v53 = vsub.f32 %v7527_v6, %v7587_v7 }
 0x9bb   : > { %v2794_v18 = vpop.xlane.xlu1 %2793 }
 0x9bc   : > { %6145 = vrsqrt.f32 %v2944_v19  ;;  %v2946_v62 = vadd.f32 1e-05, %v2914_v42  ;;  %v7593_v36 = vmul.f32 0.0078125, %v2794_v18  ;;  %v2897_v0 = vmul.f32 %v7591_v38, %v7591_v38 }
 0x9bd   : > { %v2852_v41 = vpop.xlane.xlu0 %2851 }
 0x9be   : > { %v2881_v39 = vmul.f32 0.0078125, %v2852_v41  ;;  %6147 = vrsqrt.f32 %v2946_v62  ;;  %v2900_v16 = vmul.f32 %v7593_v36, %v7593_v36  ;;  %v2929_v62 = vsub.f32 %v7534_v5, %v7591_v38  ;;  %v6313_v41 = vld [vmem:[#allocation2 + $0x50] sm:$0xff] }
 0x9bf   : > { %v2858_v35 = vpop.xlane.xlu1 %2857 }
 0x9c0   : > { %v2913_v51 = vsub.f32 %v2881_v39, %v2897_v0  ;;  %v2884_v59 = vmul.f32 0.0078125, %v2858_v35 }
 0x9c1   : > { %v2792_v13 = vpop.xlane.xlu0 %2791 }
 0x9c2   : > { %v6144_v27 = vpop.eup %6143  ;;  %v2945_v47 = vadd.f32 1e-05, %v2913_v51  ;;  %v2916_v9 = vsub.f32 %v2884_v59, %v2900_v16  ;;  %v7599_v14 = vmul.f32 0.0078125, %v2792_v13  ;;  %v5725_v44 = vpop.f32.mrb[56].mxu0  ;;  %v6314_v51 = vld [vmem:[#allocation2 + $0x58] sm:$0xff] }
 0x9c3   : > { %v2798_v45 = vpop.xlane.xlu1 %2797  ;;  %v2735_v4 = vpop.f32.mrb[57].mxu0  ;;  %v2975_v48 = vmul.f32 %v6144_v27, %v2927_v52  ;;  %v7638_v0 = vadd.f32 %v6313_v41, %v5725_v44  ;;  %v5955_v41 = vld [vmem:[%s6510_s23 + $0x48] sm:$0xff]  }
 0x9c4   : > { %6149 = vrsqrt.f32 %v2945_v47  ;;  %v2948_v60 = vadd.f32 1e-05, %v2916_v9  ;;  %v5726_v17 = vpop.f32.mrb[58].mxu0  ;;  %v7603_v49 = vmul.f32 0.0078125, %v2798_v45  ;;  %v7605_v2 = vadd.f32 %v6311_v46, %v2735_v4  ;;  %v6315_v46 = vld [vmem:[#allocation2 + $0x60] sm:$0xff] }
 0x9c5   : > { %v2856_v34 = vpop.xlane.xlu0 %2855  ;;  %v2738_v37 = vpop.f32.mrb[59].mxu0  ;;  %v2899_v32 = vmul.f32 %v7599_v14, %v7599_v14  ;;  %v2997_v31 = vmul.f32 %v7616_v50, %v2975_v48  ;;  %8725 = vst [vmem:[#allocation10_spill] sm:$0xff] %v7638_v0  ;;  %v7640_v59 = vadd.f32 %v6314_v51, %v5726_v17  ;;  %v2841_v9 = vmul.f32 %v7638_v0, %v7638_v0  ;;  %v5960_v51 = vld [vmem:[%s6510_s23 + $0xd0] sm:$0xff]  }
 0x9c6   : > { %8723 = vst [vmem:[#allocation8_spill] sm:$0xff] %v7605_v2  ;;  %v6146_v30 = vpop.eup %6145  ;;  %v2883_v28 = vmul.f32 0.0078125, %v2856_v34  ;;  %v7609_v1 = vadd.f32 %v6312_v22, %v2738_v37  ;;  %2799 = vadd.xlane.f32.xlu0 %v7605_v2  ;;  %6151 = vrsqrt.f32 %v2948_v60  ;;  %v2902_v8 = vmul.f32 %v7603_v49, %v7603_v49 }
 0x9c7   : > { %v2976_v25 = vmul.f32 %v6146_v30, %v2928_v12  ;;  %v2862_v26 = vpop.xlane.xlu1 %2861  ;;  %v2839_v33 = vmul.f32 %v7605_v2, %v7605_v2  ;;  %8726 = vst [vmem:[#allocation11_spill] sm:$0xff] %v7640_v59  ;;  %v2842_v60 = vmul.f32 %v7640_v59, %v7640_v59  ;;  %v2932_v17 = vsub.f32 %v7536_v56, %v7593_v36 }
 0x9c8   : > { %8724 = vst [vmem:[#allocation9_spill] sm:$0xff] %v7609_v1  ;;  %v2915_v61 = vsub.f32 %v2883_v28, %v2899_v32  ;;  %v2886_v43 = vmul.f32 0.0078125, %v2862_v26  ;;  %2801 = vadd.xlane.f32.xlu1 %v7609_v1  ;;  %v6148_v15 = vpop.eup %6147  ;;  %v2840_v58 = vmul.f32 %v7609_v1, %v7609_v1  ;;  %v2931_v48 = vsub.f32 %v7548_v63, %v7599_v14  ;;  %v6316_v32 = vld [vmem:[#allocation2 + $0x68] sm:$0xff] }
 0x9c9   : > { %v2796_v3 = vpop.xlane.xlu0 %2795  ;;  %v2998_v55 = vmul.f32 %v7616_v50, %v2976_v25  ;;  %v2978_v16 = vmul.f32 %v6148_v15, %v2930_v53 }
 0x9ca   : > { %v2947_v40 = vadd.f32 1e-05, %v2915_v61  ;;  %v2918_v21 = vsub.f32 %v2886_v43, %v2902_v8  ;;  %v7626_v24 = vmul.f32 0.0078125, %v2796_v3  ;;  %v7628_v11 = vpop.f32.mrb[60].mxu0  ;;  %2863 = vadd.xlane.f32.xlu0 %v2839_v33  ;;  %v2934_v61 = vsub.f32 %v7550_v20, %v7603_v49  ;;  %v6317_v33 = vld [vmem:[#allocation2 + $0x70] sm:$0xff] }
 0x9cb   : > { %v2751_v23 = vpop.f32.mrb[61].mxu0  ;;  %v3013_v19 = vpack.c.bf16 %v2998_v55, %v2997_v31  ;;  %v3000_v52 = vmul.f32 %v7616_v50, %v2978_v16  ;;  %v7677_v31 = vadd.f32 %v6317_v33, %v7628_v11  ;;  %v5958_v16 = vld [vmem:[%s6510_s23 + $0x88] sm:$0xff]  }
 0x9cc   : > { %6153 = vrsqrt.f32 %v2947_v40  ;;  %v2950_v42 = vadd.f32 1e-05, %v2918_v21  ;;  %2865 = vadd.xlane.f32.xlu1 %v2840_v58  ;;  %v7634_v18 = vpop.f32.mrb[62].mxu0  ;;  %v2901_v13 = vmul.f32 %v7626_v24, %v7626_v24  ;;  %v7658_v34 = vadd.f32 %v6315_v46, %v2751_v23  ;;  %v6318_v40 = vld [vmem:[#allocation2 + $0x78] sm:$0xff]  ;;  %v5974_v46 = vld [vmem:[%s6510_s23 + $0xa8] sm:$0xff]  }
 0x9cd   : > { %3246 = vmatmul.mubr.bf16.vlgmr.msra.gmra.mrb[64].mxu1 %v3013_v19  ;;  %3359 = vmatmul.mubr.bf16.vlgmr.msra.gmra.mrb[64].mxu0 %v3013_v19  ;;  %v2860_v39 = vpop.xlane.xlu0 %2859  ;;  %v2754_v35 = vpop.f32.mrb[63].mxu0  ;;  %v2933_v3 = vsub.f32 %v7566_v57, %v7626_v24  ;;  %8729 = vst [vmem:[#allocation14_spill] sm:$0xff] %v7677_v31  ;;  %v7680_v21 = vadd.f32 %v6318_v40, %v7634_v18  ;;  %v5951_v19 = vld [vmem:[%s6510_s23 + $0x40] sm:$0xff]   ;;  %v5977_v40 = vld [vmem:[%s6510_s23 + $0x30] sm:$0xff]  }
 0x9ce   : > { %v6150_v7 = vpop.eup %6149  ;;  %v2885_v27 = vmul.f32 0.0078125, %v2860_v39  ;;  %3255 = vmatprep.mubr.bf16.mxu1 %v6399_v10  ;;  %3368 = vmatprep.mubr.bf16.mxu0 %v6399_v10  ;;  %6155 = vrsqrt.f32 %v2950_v42  ;;  %8727 = vst [vmem:[#allocation12_spill] sm:$0xff] %v7658_v34  ;;  %v7660_v28 = vadd.f32 %v6316_v32, %v2754_v35  ;;  %v2843_v14 = vmul.f32 %v7658_v34, %v7658_v34  ;;  %v5952_v42 = vld [vmem:[%s6510_s23 + $0xc0] sm:$0xff]   ;;  %v5956_v39 = vld [vmem:[%s6510_s23 + $0xc8] sm:$0xff]  }
 0x9cf   : > { %2803 = vadd.xlane.f32.xlu0 %v7638_v0  ;;  %v2977_v38 = vmul.f32 %v6150_v7, %v2929_v62  ;;  %8730 = vst [vmem:[#allocation15_spill] sm:$0xff] %v7680_v21  ;;  %v2845_v24 = vmul.f32 %v7677_v31, %v7677_v31  ;;  %v2846_v53 = vmul.f32 %v7680_v21, %v7680_v21  ;;  %v5953_v18 = vld [vmem:[%s6510_s23] sm:$0xff]   ;;  %v5957_v35 = vld [vmem:[%s6510_s23 + $0x8] sm:$0xff]   ;;  %v5959_v7 = vld [vmem:[%s6510_s23 + $0x50] sm:$0xff]  }
 0x9d0   : > { %v2917_v47 = vsub.f32 %v2885_v27, %v2901_v13  ;;  %2805 = vadd.xlane.f32.xlu1 %v7640_v59  ;;  %v6152_v45 = vpop.eup %6151  ;;  %8728 = vst [vmem:[#allocation13_spill] sm:$0xff] %v7660_v28  ;;  %v2844_v8 = vmul.f32 %v7660_v28, %v7660_v28  ;;  %5411 = vmatprep.subr.bf16.mxu1 %v5951_v19  ;;  %v5954_v62 = vld [vmem:[%s6510_s23 + $0x80] sm:$0xff]   ;;  %v5961_v13 = vld [vmem:[%s6510_s23 + $0x10] sm:$0xff]   ;;  %v5979_v19 = vld [vmem:[%s6510_s23 + $0x78] sm:$0xff]  }
 0x9d1   : > { %v2999_v44 = vmul.f32 %v7616_v50, %v2977_v38  ;;  %v2980_v37 = vmul.f32 %v6152_v45, %v2932_v17  ;;  %5475 = vmatprep.subr.bf16.mxu0 %v5952_v42  ;;  %5412 = vmatpush3.bf16.msra.mxu1 %v5953_v18  ;;  %v5962_v27 = vld [vmem:[%s6510_s23 + $0x90] sm:$0xff]   ;;  %v5963_v38 = vld [vmem:[%s6510_s23 + $0x58] sm:$0xff]   ;;  %v5968_v45 = vld [vmem:[%s6510_s23 + $0xe0] sm:$0xff]  }
 0x9d2   : > { %v2949_v4 = vadd.f32 1e-05, %v2917_v47  ;;  %5476 = vmatpush3.bf16.msra.mxu0 %v5954_v62  ;;  %5413 = vmatprep.subr.bf16.mxu1 %v5955_v41  ;;  %v5964_v47 = vld [vmem:[%s6510_s23 + $0xd8] sm:$0xff]   ;;  %v5971_v17 = vld [vmem:[%s6510_s23 + $0x68] sm:$0xff]  }
 0x9d3   : > { %2867 = vadd.xlane.f32.xlu0 %v2841_v9  ;;  %v3014_v12 = vpack.c.bf16 %v3000_v52, %v2999_v44  ;;  %v3002_v25 = vmul.f32 %v7616_v50, %v2980_v37  ;;  %5477 = vmatprep.subr.bf16.mxu0 %v5956_v39  ;;  %v5965_v9 = vld [vmem:[%s6510_s23 + $0x18] sm:$0xff]   ;;  %v5967_v52 = vld [vmem:[%s6510_s23 + $0x60] sm:$0xff]  }
 0x9d4   : > { %6157 = vrsqrt.f32 %v2949_v4  ;;  %2869 = vadd.xlane.f32.xlu1 %v2842_v60  ;;  %v5966_v44 = vld [vmem:[%s6510_s23 + $0x98] sm:$0xff]   ;;  %v5969_v4 = vld [vmem:[%s6510_s23 + $0x20] sm:$0xff]  }
 0x9d5   : > { %3256 = vmatmul.mubr.bf16.gmra.mrb[68].mxu1 %v3014_v12  ;;  %3369 = vmatmul.mubr.bf16.gmra.mrb[68].mxu0 %v3014_v12  ;;  %v5970_v60 = vld [vmem:[%s6510_s23 + $0xa0] sm:$0xff]   ;;  %v5972_v12 = vld [vmem:[%s6510_s23 + $0xe8] sm:$0xff]   ;;  %v5980_v42 = vld [vmem:[%s6510_s23 + $0xf8] sm:$0xff]  }
 0x9d6   : > { %v6154_v30 = vpop.eup %6153  ;;  %3265 = vmatprep.mubr.bf16.mxu1 %v6399_v10  ;;  %3378 = vmatprep.mubr.bf16.mxu0 %v6399_v10  ;;  %v5981_v62 = vld [vmem:[%s6510_s23 + $0x38] sm:$0xff]  }
 0x9d7   : > { %2807 = vadd.xlane.f32.xlu0 %v7658_v34  ;;  %v2979_v36 = vmul.f32 %v6154_v30, %v2931_v48  ;;  %5414 = vmatpush3.bf16.msra.mxu1 %v5957_v35  ;;  %v5973_v48 = vld [vmem:[%s6510_s23 + $0x28] sm:$0xff]   ;;  %v5982_v41 = vld [vmem:[%s6510_s23 + $0xb8] sm:$0xff]  }
 0x9d8   : > { %2809 = vadd.xlane.f32.xlu1 %v7660_v28  ;;  %v6156_v26 = vpop.eup %6155  ;;  %5478 = vmatpush3.bf16.msra.mxu0 %v5958_v16 }
 0x9d9   : > { %v3001_v22 = vmul.f32 %v7616_v50, %v2979_v36  ;;  %v2982_v55 = vmul.f32 %v6156_v26, %v2934_v61  ;;  %5415 = vmatprep.subr.bf16.mxu1 %v5959_v7  ;;  %5479 = vmatprep.subr.bf16.mxu0 %v5960_v51 }
 0x9db   : > { %2871 = vadd.xlane.f32.xlu0 %v2843_v14  ;;  %v3015_v43 = vpack.c.bf16 %v3002_v25, %v3001_v22  ;;  %v3004_v58 = vmul.f32 %v7616_v50, %v2982_v55  ;;  %5416 = vmatpush3.bf16.msra.mxu1 %v5961_v13  ;;  %v5975_v14 = vld [vmem:[%s6510_s23 + $0x70] sm:$0xff]  }
 0x9dc   : > { %2873 = vadd.xlane.f32.xlu1 %v2844_v8  ;;  %5480 = vmatpush3.bf16.msra.mxu0 %v5962_v27  ;;  %v5976_v22 = vld [vmem:[%s6510_s23 + $0xf0] sm:$0xff]  }
 0x9dd   : > { %3266 = vmatmul.mubr.bf16.gmra.mrb[72].mxu1 %v3015_v43  ;;  %3379 = vmatmul.mubr.bf16.gmra.mrb[72].mxu0 %v3015_v43 }
 0x9de   : > { %v6158_v15 = vpop.eup %6157  ;;  %3275 = vmatprep.mubr.bf16.mxu1 %v6399_v10  ;;  %3388 = vmatprep.mubr.bf16.mxu0 %v6399_v10 }
 0x9df   : > { %2811 = vadd.xlane.f32.xlu0 %v7677_v31  ;;  %v2981_v49 = vmul.f32 %v6158_v15, %v2933_v3  ;;  %5417 = vmatprep.subr.bf16.mxu1 %v5963_v38 }
 0x9e0   : > { %2813 = vadd.xlane.f32.xlu1 %v7680_v21  ;;  %5481 = vmatprep.subr.bf16.mxu0 %v5964_v47 }
 0x9e1   : > { %v3003_v11 = vmul.f32 %v7616_v50, %v2981_v49  ;;  %5418 = vmatpush3.bf16.msra.mxu1 %v5965_v9  ;;  %5482 = vmatpush3.bf16.msra.mxu0 %v5966_v44  ;;  %v5978_v49 = vld [vmem:[%s6510_s23 + $0xb0] sm:$0xff]  }
 0x9e2   : > { %5419 = vmatprep.subr.bf16.mxu1 %v5967_v52  ;;  %5483 = vmatprep.subr.bf16.mxu0 %v5968_v45 }
 0x9e3   : > { %2875 = vadd.xlane.f32.xlu0 %v2845_v24  ;;  %v3016_v23 = vpack.c.bf16 %v3004_v58, %v3003_v11 }
 0x9e4   : > { %2877 = vadd.xlane.f32.xlu1 %v2846_v53 }
 0x9e5   : > { %3276 = vmatmul.mubr.bf16.gmra.mrb[76].mxu1 %v3016_v23  ;;  %3389 = vmatmul.mubr.bf16.gmra.mrb[76].mxu0 %v3016_v23 }
 0x9e6   : > { %3285 = vmatprep.mubr.bf16.mxu1 %v6399_v10  ;;  %3398 = vmatprep.mubr.bf16.mxu0 %v6399_v10 }
 0x9e7   : > { %5420 = vmatpush3.bf16.msra.mxu1 %v5969_v4  ;;  %5484 = vmatpush3.bf16.msra.mxu0 %v5970_v60 }
 0x9e8   : > { %5421 = vmatprep.subr.bf16.mxu1 %v5971_v17  ;;  %5485 = vmatprep.subr.bf16.mxu0 %v5972_v12 }
 0x9eb   : > { %5422 = vmatpush3.bf16.msra.mxu1 %v5973_v48  ;;  %5486 = vmatpush3.bf16.msra.mxu0 %v5974_v46 }
 0x9ec   : > { %5423 = vmatprep.subr.bf16.mxu1 %v5975_v14  ;;  %5487 = vmatprep.subr.bf16.mxu0 %v5976_v22 }
 0x9ef   : > { %5424 = vmatpush3.bf16.msra.mxu1 %v5977_v40  ;;  %5488 = vmatpush3.bf16.msra.mxu0 %v5978_v49 }
 0x9f0   : > { %5425 = vmatprep.subr.bf16.mxu1 %v5979_v19  ;;  %5489 = vmatprep.subr.bf16.mxu0 %v5980_v42 }
 0x9f3   : > { %5426 = vmatpush3.bf16.msra.mxu1 %v5981_v62  ;;  %5490 = vmatpush3.bf16.msra.mxu0 %v5982_v41 }
 0xa53   : > { %v2800_v37 = vpop.xlane.xlu0 %2799 }
 0xa54   : > { %v2823_v30 = vmul.f32 0.0078125, %v2800_v37 }
 0xa55   : > { %v2802_v32 = vpop.xlane.xlu1 %2801 }
 0xa56   : > { %v2824_v36 = vmul.f32 0.0078125, %v2802_v32  ;;  %v2903_v26 = vmul.f32 %v2823_v30, %v2823_v30  ;;  %v2935_v4 = vsub.f32 %v7605_v2, %v2823_v30 }
 0xa57   : > { %v2864_v25 = vpop.xlane.xlu0 %2863 }
 0xa58   : > { %v2887_v8 = vmul.f32 0.0078125, %v2864_v25  ;;  %v2904_v43 = vmul.f32 %v2824_v36, %v2824_v36  ;;  %v2936_v12 = vsub.f32 %v7609_v1, %v2824_v36 }
 0xa59   : > { %v2866_v61 = vpop.xlane.xlu1 %2865 }
 0xa5a   : > { %v2888_v3 = vmul.f32 0.0078125, %v2866_v61  ;;  %v2919_v33 = vsub.f32 %v2887_v8, %v2903_v26 }
 0xa5c   : > { %v2920_v55 = vsub.f32 %v2888_v3, %v2904_v43  ;;  %v2804_v15 = vpop.xlane.xlu0 %2803  ;;  %v2951_v24 = vadd.f32 1e-05, %v2919_v33 }
 0xa5d   : > { %v7722_v11 = vmul.f32 0.0078125, %v2804_v15  ;;  %v2806_v58 = vpop.xlane.xlu1 %2805 }
 0xa5e   : > { %v2952_v53 = vadd.f32 1e-05, %v2920_v55  ;;  %v7724_v23 = vmul.f32 0.0078125, %v2806_v58  ;;  %6159 = vrsqrt.f32 %v2951_v24 }
 0xa5f   : > { %v2905_v39 = vmul.f32 %v7722_v11, %v7722_v11  ;;  %v2937_v24 = vsub.f32 %v7638_v0, %v7722_v11 }
 0xa60   : > { %6161 = vrsqrt.f32 %v2952_v53  ;;  %v2868_v18 = vpop.xlane.xlu0 %2867  ;;  %v2906_v7 = vmul.f32 %v7724_v23, %v7724_v23  ;;  %v2938_v19 = vsub.f32 %v7640_v59, %v7724_v23 }
 0xa61   : > { %v2889_v35 = vmul.f32 0.0078125, %v2868_v18  ;;  %v2870_v16 = vpop.xlane.xlu1 %2869 }
 0xa62   : > { %v2890_v51 = vmul.f32 0.0078125, %v2870_v16 }
 0xa63   : > { %v2921_v13 = vsub.f32 %v2889_v35, %v2905_v39 }
 0xa64   : > { %v2922_v27 = vsub.f32 %v2890_v51, %v2906_v7  ;;  %v2808_v38 = vpop.xlane.xlu0 %2807 }
 0xa65   : > { %v2953_v47 = vadd.f32 1e-05, %v2921_v13  ;;  %v7734_v9 = vmul.f32 0.0078125, %v2808_v38  ;;  %v2810_v44 = vpop.xlane.xlu1 %2809 }
 0xa66   : > { %v2954_v52 = vadd.f32 1e-05, %v2922_v27  ;;  %v7736_v45 = vmul.f32 0.0078125, %v2810_v44 }
 0xa67   : > { %6163 = vrsqrt.f32 %v2953_v47  ;;  %v2907_v48 = vmul.f32 %v7734_v9, %v7734_v9  ;;  %v2939_v44 = vsub.f32 %v7658_v34, %v7734_v9 }
 0xa68   : > { %6165 = vrsqrt.f32 %v2954_v52  ;;  %v2872_v60 = vpop.xlane.xlu0 %2871  ;;  %v6160_v17 = vpop.eup %6159  ;;  %v2908_v14 = vmul.f32 %v7736_v45, %v7736_v45 }
 0xa69   : > { %v2891_v46 = vmul.f32 0.0078125, %v2872_v60  ;;  %v2874_v37 = vpop.xlane.xlu1 %2873  ;;  %v2983_v25 = vmul.f32 %v6160_v17, %v2935_v4  ;;  %v2940_v4 = vsub.f32 %v7660_v28, %v7736_v45 }
 0xa6a   : > { %v6162_v32 = vpop.eup %6161  ;;  %v2892_v22 = vmul.f32 0.0078125, %v2874_v37 }
 0xa6b   : > { %v2923_v26 = vsub.f32 %v2891_v46, %v2907_v48  ;;  %v2984_v8 = vmul.f32 %v6162_v32, %v2936_v12  ;;  %v3005_v36 = vmul.f32 %v7616_v50, %v2983_v25 }
 0xa6c   : > { %v2924_v61 = vsub.f32 %v2892_v22, %v2908_v14  ;;  %v2812_v30 = vpop.xlane.xlu0 %2811 }
 0xa6d   : > { %v2955_v43 = vadd.f32 1e-05, %v2923_v26  ;;  %v2829_v3 = vmul.f32 0.0078125, %v2812_v30  ;;  %v2814_v33 = vpop.xlane.xlu1 %2813  ;;  %v3006_v55 = vmul.f32 %v7616_v50, %v2984_v8 }
 0xa6e   : > { %v2956_v15 = vadd.f32 1e-05, %v2924_v61  ;;  %v2830_v40 = vmul.f32 0.0078125, %v2814_v33 }
 0xa6f   : > { %6167 = vrsqrt.f32 %v2955_v43  ;;  %v3017_v49 = vpack.c.bf16 %v3006_v55, %v3005_v36  ;;  %v2909_v42 = vmul.f32 %v2829_v3, %v2829_v3  ;;  %v2941_v9 = vsub.f32 %v7677_v31, %v2829_v3 }
 0xa70   : > { %6169 = vrsqrt.f32 %v2956_v15  ;;  %v2876_v58 = vpop.xlane.xlu0 %2875  ;;  %v2910_v39 = vmul.f32 %v2830_v40, %v2830_v40  ;;  %v2942_v14 = vsub.f32 %v7680_v21, %v2830_v40 }
 0xa71   : > { %v6164_v53 = vpop.eup %6163  ;;  %v2893_v18 = vmul.f32 0.0078125, %v2876_v58  ;;  %3286 = vmatmul.mubr.bf16.gmra.mrb[80].mxu1 %v3017_v49  ;;  %3399 = vmatmul.mubr.bf16.gmra.mrb[80].mxu0 %v3017_v49  ;;  %v2878_v62 = vpop.xlane.xlu1 %2877 }
 0xa72   : > { %v6166_v41 = vpop.eup %6165  ;;  %v2894_v35 = vmul.f32 0.0078125, %v2878_v62  ;;  %3295 = vmatprep.mubr.bf16.mxu1 %v6399_v10  ;;  %3408 = vmatprep.mubr.bf16.mxu0 %v6399_v10  ;;  %v2985_v16 = vmul.f32 %v6164_v53, %v2937_v24 }
 0xa73   : > { %v2925_v11 = vsub.f32 %v2893_v18, %v2909_v42  ;;  %v2986_v7 = vmul.f32 %v6166_v41, %v2938_v19 }
 0xa74   : > { %v2926_v51 = vsub.f32 %v2894_v35, %v2910_v39  ;;  %v3007_v27 = vmul.f32 %v7616_v50, %v2985_v16 }
 0xa75   : > { %v2957_v13 = vadd.f32 1e-05, %v2925_v11  ;;  %v3008_v23 = vmul.f32 %v7616_v50, %v2986_v7 }
 0xa76   : > { %v2958_v38 = vadd.f32 1e-05, %v2926_v51 }
 0xa77   : > { %6171 = vrsqrt.f32 %v2957_v13  ;;  %v3018_v47 = vpack.c.bf16 %v3008_v23, %v3007_v27 }
 0xa78   : > { %6173 = vrsqrt.f32 %v2958_v38 }
 0xa79   : > { %v6168_v52 = vpop.eup %6167  ;;  %3296 = vmatmul.mubr.bf16.gmra.mrb[84].mxu1 %v3018_v47  ;;  %3409 = vmatmul.mubr.bf16.gmra.mrb[84].mxu0 %v3018_v47 }
 0xa7a   : > { %v6170_v60 = vpop.eup %6169  ;;  %3305 = vmatprep.mubr.bf16.mxu1 %v6399_v10  ;;  %3418 = vmatprep.mubr.bf16.mxu0 %v6399_v10  ;;  %v2987_v17 = vmul.f32 %v6168_v52, %v2939_v44 }
 0xa7b   : > { %v2988_v12 = vmul.f32 %v6170_v60, %v2940_v4 }
 0xa7c   : > { %v3009_v48 = vmul.f32 %v7616_v50, %v2987_v17 }
 0xa7d   : > { %v3010_v46 = vmul.f32 %v7616_v50, %v2988_v12 }
 0xa7f   : > { %v3019_v37 = vpack.c.bf16 %v3010_v46, %v3009_v48 }
 0xa81   : > { %v6172_v32 = vpop.eup %6171  ;;  %3306 = vmatmul.mubr.bf16.gmra.mrb[88].mxu1 %v3019_v37  ;;  %3419 = vmatmul.mubr.bf16.gmra.mrb[88].mxu0 %v3019_v37 }
 0xa82   : > { %v6174_v45 = vpop.eup %6173  ;;  %3315 = vmatprep.mubr.bf16.mxu1 %v6399_v10  ;;  %3428 = vmatprep.mubr.bf16.mxu0 %v6399_v10  ;;  %v2989_v22 = vmul.f32 %v6172_v32, %v2941_v9 }
 0xa83   : > { %v2990_v25 = vmul.f32 %v6174_v45, %v2942_v14 }
 0xa84   : > { %v3011_v26 = vmul.f32 %v7616_v50, %v2989_v22 }
 0xa85   : > { %v3012_v8 = vmul.f32 %v7616_v50, %v2990_v25 }
 0xa87   : > { %v3020_v61 = vpack.c.bf16 %v3012_v8, %v3011_v26 }
 0xa89   : > { %3316 = vmatmul.mubr.bf16.gmra.mrb[92].mxu1 %v3020_v61  ;;  %3429 = vmatmul.mubr.bf16.gmra.mrb[92].mxu0 %v3020_v61 }
 0xaa0   : > { %v7768_v30 = vpop.f32.mrb[64].mxu1  ;;  %v7770_v43 = vpop.f32.mrb[64].mxu0 }
 0xaa1   : > { %v3439_v3 = vmul.f32 %v7768_v30, %v7768_v30  ;;  %v3441_v33 = vmul.f32 %v7770_v43, %v7770_v43  ;;  %v7776_v10 = vpop.f32.mrb[65].mxu1  ;;  %v7778_v36 = vpop.f32.mrb[65].mxu0 }
 0xaa2   : > { %v3440_v50 = vmul.f32 %v7776_v10, %v7776_v10  ;;  %v3442_v55 = vmul.f32 %v7778_v36, %v7778_v36  ;;  %v7784_v15 = vpop.f32.mrb[66].mxu1  ;;  %v7786_v40 = vpop.f32.mrb[66].mxu0 }
 0xaa3   : > { %v3503_v49 = vmul.f32 %v3439_v3, %v7768_v30  ;;  %v3505_v24 = vmul.f32 %v3441_v33, %v7770_v43  ;;  %v3443_v58 = vmul.f32 %v7784_v15, %v7784_v15  ;;  %v3445_v53 = vmul.f32 %v7786_v40, %v7786_v40  ;;  %v7794_v19 = vpop.f32.mrb[67].mxu1  ;;  %v7796_v42 = vpop.f32.mrb[67].mxu0 }
 0xaa4   : > { %v3504_v18 = vmul.f32 %v3440_v50, %v7776_v10  ;;  %v3506_v62 = vmul.f32 %v3442_v55, %v7778_v36  ;;  %v3444_v41 = vmul.f32 %v7794_v19, %v7794_v19  ;;  %v3446_v39 = vmul.f32 %v7796_v42, %v7796_v42 }
 0xaa5   : > { %v3567_v35 = vmul.f32 0.044715, %v3503_v49  ;;  %v3569_v16 = vmul.f32 0.044715, %v3505_v24  ;;  %v3507_v11 = vmul.f32 %v3443_v58, %v7784_v15  ;;  %v3509_v7 = vmul.f32 %v3445_v53, %v7786_v40 }
 0xaa6   : > { %v3568_v51 = vmul.f32 0.044715, %v3504_v18  ;;  %v3570_v13 = vmul.f32 0.044715, %v3506_v62  ;;  %v3508_v27 = vmul.f32 %v3444_v41, %v7794_v19  ;;  %v3510_v23 = vmul.f32 %v3446_v39, %v7796_v42 }
 0xaa7   : > { %v3631_v38 = vadd.f32 %v3567_v35, %v7768_v30  ;;  %v3633_v47 = vadd.f32 %v3569_v16, %v7770_v43  ;;  %v3571_v44 = vmul.f32 0.044715, %v3507_v11  ;;  %v3573_v52 = vmul.f32 0.044715, %v3509_v7 }
 0xaa8   : > { %v3632_v4 = vadd.f32 %v3568_v51, %v7776_v10  ;;  %v3634_v60 = vadd.f32 %v3570_v13, %v7778_v36  ;;  %v3572_v17 = vmul.f32 0.044715, %v3508_v27  ;;  %v3574_v12 = vmul.f32 0.044715, %v3510_v23  ;;  %v7812_v48 = vpop.f32.mrb[68].mxu1  ;;  %v7814_v46 = vpop.f32.mrb[68].mxu0 }
 0xaa9   : > { %v3695_v37 = vmul.f32 0.7978846, %v3631_v38  ;;  %v3697_v9 = vmul.f32 0.7978846, %v3633_v47  ;;  %v3635_v32 = vadd.f32 %v3571_v44, %v7784_v15  ;;  %v3637_v14 = vadd.f32 %v3573_v52, %v7786_v40  ;;  %v7818_v45 = vpop.f32.mrb[69].mxu1  ;;  %v7820_v22 = vpop.f32.mrb[69].mxu0 }
 0xaaa   : > { %v3696_v25 = vmul.f32 0.7978846, %v3632_v4  ;;  %v3698_v26 = vmul.f32 0.7978846, %v3634_v60  ;;  %v3636_v8 = vadd.f32 %v3572_v17, %v7794_v19  ;;  %v3638_v61 = vadd.f32 %v3574_v12, %v7796_v42  ;;  %v7824_v3 = vpop.f32.mrb[70].mxu1  ;;  %v7826_v33 = vpop.f32.mrb[70].mxu0 }
 0xaab   : > { %6175 = vtanh.f32 %v3695_v37  ;;  %v3699_v50 = vmul.f32 0.7978846, %v3635_v32  ;;  %v3701_v55 = vmul.f32 0.7978846, %v3637_v14  ;;  %v3447_v49 = vmul.f32 %v7812_v48, %v7812_v48  ;;  %v7830_v24 = vpop.f32.mrb[71].mxu1  ;;  %v7832_v58 = vpop.f32.mrb[71].mxu0 }
 0xaac   : > { %6177 = vtanh.f32 %v3697_v9  ;;  %v3700_v53 = vmul.f32 0.7978846, %v3636_v8  ;;  %v3702_v18 = vmul.f32 0.7978846, %v3638_v61  ;;  %v3449_v62 = vmul.f32 %v7814_v46, %v7814_v46 }
 0xaad   : > { %6179 = vtanh.f32 %v3696_v25  ;;  %v3511_v41 = vmul.f32 %v3447_v49, %v7812_v48  ;;  %v3448_v39 = vmul.f32 %v7818_v45, %v7818_v45  ;;  %v3450_v35 = vmul.f32 %v7820_v22, %v7820_v22 }
 0xaae   : > { %6181 = vtanh.f32 %v3698_v26  ;;  %v3513_v16 = vmul.f32 %v3449_v62, %v7814_v46  ;;  %v3451_v11 = vmul.f32 %v7824_v3, %v7824_v3  ;;  %v3453_v7 = vmul.f32 %v7826_v33, %v7826_v33 }
 0xaaf   : > { %6183 = vtanh.f32 %v3699_v50  ;;  %v3575_v51 = vmul.f32 0.044715, %v3511_v41  ;;  %v3512_v13 = vmul.f32 %v3448_v39, %v7818_v45  ;;  %v3514_v27 = vmul.f32 %v3450_v35, %v7820_v22 }
 0xab0   : > { %6185 = vtanh.f32 %v3701_v55  ;;  %v3577_v23 = vmul.f32 0.044715, %v3513_v16  ;;  %v3515_v38 = vmul.f32 %v3451_v11, %v7824_v3  ;;  %v3517_v47 = vmul.f32 %v3453_v7, %v7826_v33  ;;  %v7850_v44 = vpop.f32.mrb[72].mxu1  ;;  %v7852_v52 = vpop.f32.mrb[72].mxu0 }
 0xab1   : > { %6187 = vtanh.f32 %v3700_v53  ;;  %v3639_v4 = vadd.f32 %v3575_v51, %v7812_v48  ;;  %v3576_v60 = vmul.f32 0.044715, %v3512_v13  ;;  %v3578_v17 = vmul.f32 0.044715, %v3514_v27  ;;  %v7855_v12 = vpop.f32.mrb[73].mxu1  ;;  %v7857_v37 = vpop.f32.mrb[73].mxu0 }
 0xab2   : > { %6189 = vtanh.f32 %v3702_v18  ;;  %v3641_v9 = vadd.f32 %v3577_v23, %v7814_v46  ;;  %v3579_v32 = vmul.f32 0.044715, %v3515_v38  ;;  %v3581_v14 = vmul.f32 0.044715, %v3517_v47  ;;  %v7860_v25 = vpop.f32.mrb[74].mxu1  ;;  %v7862_v26 = vpop.f32.mrb[74].mxu0 }
 0xab3   : > { %v3703_v8 = vmul.f32 0.7978846, %v3639_v4  ;;  %v3640_v61 = vadd.f32 %v3576_v60, %v7818_v45  ;;  %v3642_v50 = vadd.f32 %v3578_v17, %v7820_v22  ;;  %v3452_v55 = vmul.f32 %v7830_v24, %v7830_v24  ;;  %v7868_v49 = vpop.f32.mrb[75].mxu1  ;;  %v7870_v53 = vpop.f32.mrb[75].mxu0 }
 0xab4   : > { %v3705_v18 = vmul.f32 0.7978846, %v3641_v9  ;;  %v3643_v62 = vadd.f32 %v3579_v32, %v7824_v3  ;;  %v3645_v41 = vadd.f32 %v3581_v14, %v7826_v33  ;;  %v3454_v39 = vmul.f32 %v7832_v58, %v7832_v58 }
 0xab5   : > { %v6176_v35 = vpop.eup %6175  ;;  %6191 = vtanh.f32 %v3703_v8  ;;  %v3704_v16 = vmul.f32 0.7978846, %v3640_v61  ;;  %v3706_v11 = vmul.f32 0.7978846, %v3642_v50  ;;  %v3516_v7 = vmul.f32 %v3452_v55, %v7830_v24 }
 0xab6   : > { %v6178_v51 = vpop.eup %6177  ;;  %v3823_v13 = vadd.f32 1.0, %v6176_v35  ;;  %6193 = vtanh.f32 %v3705_v18  ;;  %v3707_v27 = vmul.f32 0.7978846, %v3643_v62  ;;  %v3709_v23 = vmul.f32 0.7978846, %v3645_v41 }
 0xab7   : > { %v6180_v38 = vpop.eup %6179  ;;  %v3825_v47 = vadd.f32 1.0, %v6178_v51  ;;  %6195 = vtanh.f32 %v3704_v16  ;;  %v3580_v4 = vmul.f32 0.044715, %v3516_v7  ;;  %v3518_v32 = vmul.f32 %v3454_v39, %v7832_v58 }
 0xab8   : > { %v6182_v60 = vpop.eup %6181  ;;  %v3887_v17 = vmul.f32 0.5, %v3823_v13  ;;  %v3824_v9 = vadd.f32 1.0, %v6180_v38  ;;  %6197 = vtanh.f32 %v3706_v11  ;;  %v7878_v14 = vpop.f32.mrb[76].mxu1  ;;  %v3455_v39 = vmul.f32 %v7850_v44, %v7850_v44 }
 0xab9   : > { %v7880_v8 = vpop.f32.mrb[76].mxu0  ;;  %v6184_v61 = vpop.eup %6183  ;;  %v3889_v50 = vmul.f32 0.5, %v3825_v47  ;;  %6199 = vtanh.f32 %v3707_v27  ;;  %v3644_v55 = vadd.f32 %v3580_v4, %v7830_v24  ;;  %v3826_v35 = vadd.f32 1.0, %v6182_v60 }
 0xaba   : > { %v7883_v18 = vpop.f32.mrb[77].mxu1  ;;  %v7885_v62 = vpop.f32.mrb[77].mxu0  ;;  %v3827_v16 = vadd.f32 1.0, %v6184_v61  ;;  %6201 = vtanh.f32 %v3709_v23  ;;  %v3888_v13 = vmul.f32 0.5, %v3824_v9  ;;  %v7898_v60 = vmul.f32 %v3887_v17, %v7768_v30 }
 0xabb   : > { %v6186_v41 = vpop.eup %6185  ;;  %v7889_v11 = vpop.f32.mrb[78].mxu1  ;;  %v3708_v38 = vmul.f32 0.7978846, %v3644_v55  ;;  %v3582_v31 = vmul.f32 0.044715, %v3518_v32  ;;  %v7901_v28 = vmul.f32 %v3889_v50, %v7770_v43  ;;  %v3890_v9 = vmul.f32 0.5, %v3826_v35 }
 0xabc   : > { %v7891_v7 = vpop.f32.mrb[78].mxu0  ;;  %v6188_v51 = vpop.eup %6187  ;;  %v3829_v27 = vadd.f32 1.0, %v6186_v41  ;;  %v3891_v23 = vmul.f32 0.5, %v3827_v16  ;;  %v3519_v0 = vmul.f32 %v3455_v39, %v7850_v44  ;;  %v7909_v30 = vmul.f32 %v3888_v13, %v7776_v10 }
 0xabd   : > { %v7893_v47 = vpop.f32.mrb[79].mxu1  ;;  %v7895_v4 = vpop.f32.mrb[79].mxu0  ;;  %v3828_v61 = vadd.f32 1.0, %v6188_v51  ;;  %6203 = vtanh.f32 %v3708_v38  ;;  %v3646_v41 = vadd.f32 %v3582_v31, %v7832_v58  ;;  %v3457_v43 = vmul.f32 %v7852_v52, %v7852_v52 }
 0xabe   : > { %v6190_v21 = vpop.eup %6189  ;;  %v3893_v34 = vmul.f32 0.5, %v3829_v27  ;;  %v7904_v55 = vmul.f32 %v3891_v23, %v7784_v15  ;;  %v7926_v15 = vmul.f32 %v3890_v9, %v7778_v36 }
 0xabf   : > { %v3830_v59 = vadd.f32 1.0, %v6190_v21  ;;  %v6192_v1 = vpop.eup %6191  ;;  %v3456_v21 = vmul.f32 %v7855_v12, %v7855_v12  ;;  %v3892_v31 = vmul.f32 0.5, %v3828_v61  ;;  %v3710_v35 = vmul.f32 0.7978846, %v3646_v41 }
 0xac0   : > { %v7912_v17 = vmul.f32 %v3893_v34, %v7786_v40  ;;  %v6194_v32 = vpop.eup %6193  ;;  %v3831_v50 = vadd.f32 1.0, %v6192_v1  ;;  %v3583_v40 = vmul.f32 0.044715, %v3519_v0  ;;  %v3521_v38 = vmul.f32 %v3457_v43, %v7852_v52 }
 0xac1   : > { %v6196_v16 = vpop.eup %6195  ;;  %v3894_v39 = vmul.f32 0.5, %v3830_v59  ;;  %v3833_v34 = vadd.f32 1.0, %v6194_v32  ;;  %6205 = vtanh.f32 %v3710_v35  ;;  %v3520_v1 = vmul.f32 %v3456_v21, %v7855_v12 }
 0xac2   : > { %v4017_v10 = vpack.c.bf16 %v7912_v17, %v7901_v28  ;;  %v6198_v51 = vpop.eup %6197  ;;  %v3895_v13 = vmul.f32 0.5, %v3831_v50  ;;  %v3832_v27 = vadd.f32 1.0, %v6196_v16  ;;  %v3647_v61 = vadd.f32 %v3583_v40, %v7850_v44 }
 0xac3   : > { %v6200_v23 = vpop.eup %6199  ;;  %v3897_v2 = vmul.f32 0.5, %v3833_v34  ;;  %v3834_v20 = vadd.f32 1.0, %v6198_v51  ;;  %v3585_v0 = vmul.f32 0.044715, %v3521_v38  ;;  %v7929_v50 = vmul.f32 %v3892_v31, %v7794_v19 }
 0xac4   : > { %v6202_v41 = vpop.eup %6201  ;;  %v3896_v59 = vmul.f32 0.5, %v3832_v27  ;;  %v3835_v32 = vadd.f32 1.0, %v6200_v23  ;;  %v3711_v43 = vmul.f32 0.7978846, %v3647_v61  ;;  %v7932_v34 = vmul.f32 %v3894_v39, %v7796_v42 }
 0xac5   : > { %v3898_v35 = vmul.f32 0.5, %v3834_v20  ;;  %v3837_v16 = vadd.f32 1.0, %v6202_v41  ;;  %v7935_v40 = vmul.f32 %v3895_v13, %v7812_v48  ;;  %v3649_v21 = vadd.f32 %v3585_v0, %v7852_v52 }
 0xac6   : > { %v3584_v51 = vmul.f32 0.044715, %v3520_v1  ;;  %v7939_v9 = vmul.f32 %v3897_v2, %v7814_v46  ;;  %v7942_v27 = vmul.f32 %v3896_v59, %v7818_v45  ;;  %6207 = vtanh.f32 %v3711_v43 }
 0xac7   : > { %v6204_v36 = vpop.eup %6203  ;;  %v3458_v20 = vmul.f32 %v7857_v37, %v7857_v37  ;;  %v7947_v19 = vmul.f32 %v3898_v35, %v7820_v22  ;;  %v3899_v42 = vmul.f32 0.5, %v3835_v32  ;;  %v3713_v48 = vmul.f32 0.7978846, %v3649_v21 }
 0xac8   : > { %v3648_v31 = vadd.f32 %v3584_v51, %v7855_v12  ;;  %v3901_v39 = vmul.f32 0.5, %v3837_v16  ;;  %v3459_v2 = vmul.f32 %v7860_v25, %v7860_v25  ;;  %v3461_v46 = vmul.f32 %v7862_v26, %v7862_v26 }
 0xac9   : > { %v3522_v13 = vmul.f32 %v3458_v20, %v7857_v37  ;;  %v3836_v45 = vadd.f32 1.0, %v6204_v36  ;;  %6209 = vtanh.f32 %v3713_v48  ;;  %v3460_v22 = vmul.f32 %v7868_v49, %v7868_v49 }
 0xaca   : > { %v3712_v38 = vmul.f32 0.7978846, %v3648_v31  ;;  %v3523_v61 = vmul.f32 %v3459_v2, %v7860_v25  ;;  %v3525_v1 = vmul.f32 %v3461_v46, %v7862_v26  ;;  %v3462_v41 = vmul.f32 %v7870_v53, %v7870_v53 }
 0xacb   : > { %v3586_v23 = vmul.f32 0.044715, %v3522_v13  ;;  %v6206_v59 = vpop.eup %6205  ;;  %v7962_v32 = vmul.f32 %v3899_v42, %v7824_v3  ;;  %v3524_v0 = vmul.f32 %v3460_v22, %v7868_v49  ;;  %v3463_v35 = vmul.f32 %v7878_v14, %v7878_v14 }
 0xacc   : > { %6211 = vtanh.f32 %v3712_v38  ;;  %v3838_v16 = vadd.f32 1.0, %v6206_v59  ;;  %v3587_v21 = vmul.f32 0.044715, %v3523_v61  ;;  %v3589_v51 = vmul.f32 0.044715, %v3525_v1 }
 0xacd   : > { %v3650_v43 = vadd.f32 %v3586_v23, %v7857_v37  ;;  %v3588_v36 = vmul.f32 0.044715, %v3524_v0  ;;  %v3526_v20 = vmul.f32 %v3462_v41, %v7870_v53  ;;  %v3527_v48 = vmul.f32 %v3463_v35, %v7878_v14 }
 0xace   : > { %v3465_v3 = vmul.f32 %v7880_v8, %v7880_v8  ;;  %v3900_v42 = vmul.f32 0.5, %v3836_v45  ;;  %v3651_v13 = vadd.f32 %v3587_v21, %v7860_v25  ;;  %v3653_v2 = vadd.f32 %v3589_v51, %v7862_v26 }
 0xacf   : > { %v3714_v31 = vmul.f32 0.7978846, %v3650_v43  ;;  %v3652_v46 = vadd.f32 %v3588_v36, %v7868_v49  ;;  %v3590_v38 = vmul.f32 0.044715, %v3526_v20  ;;  %v3591_v22 = vmul.f32 0.044715, %v3527_v48 }
 0xad0   : > { %v3529_v23 = vmul.f32 %v3465_v3, %v7880_v8  ;;  %v6208_v61 = vpop.eup %6207  ;;  %v3902_v1 = vmul.f32 0.5, %v3838_v16  ;;  %v3715_v41 = vmul.f32 0.7978846, %v3651_v13  ;;  %v3717_v59 = vmul.f32 0.7978846, %v3653_v2 }
 0xad1   : > { %6213 = vtanh.f32 %v3714_v31  ;;  %v3839_v0 = vadd.f32 1.0, %v6208_v61  ;;  %v3716_v35 = vmul.f32 0.7978846, %v3652_v46  ;;  %v3654_v45 = vadd.f32 %v3590_v38, %v7870_v53 }
 0xad2   : > { %v3655_v43 = vadd.f32 %v3591_v22, %v7878_v14  ;;  %6215 = vtanh.f32 %v3715_v41  ;;  %v3593_v21 = vmul.f32 0.044715, %v3529_v23  ;;  %v3464_v51 = vmul.f32 %v7883_v18, %v7883_v18 }
 0xad3   : > { %v3466_v36 = vmul.f32 %v7885_v62, %v7885_v62  ;;  %v6210_v20 = vpop.eup %6209  ;;  %v3903_v48 = vmul.f32 0.5, %v3839_v0  ;;  %6217 = vtanh.f32 %v3717_v59  ;;  %v3718_v16 = vmul.f32 0.7978846, %v3654_v45 }
 0xad4   : > { %v3719_v3 = vmul.f32 0.7978846, %v3655_v43  ;;  %v3841_v31 = vadd.f32 1.0, %v6210_v20  ;;  %6219 = vtanh.f32 %v3716_v35  ;;  %v3657_v13 = vadd.f32 %v3593_v21, %v7880_v8 }
 0xad5   : > { %v3528_v2 = vmul.f32 %v3464_v51, %v7883_v18  ;;  %v7985_v38 = vmul.f32 %v3901_v39, %v7826_v33  ;;  %6221 = vtanh.f32 %v3718_v16  ;;  %v3530_v22 = vmul.f32 %v3466_v36, %v7885_v62 }
 0xad6   : > { %v6212_v46 = vpop.eup %6211  ;;  %v3467_v23 = vmul.f32 %v7889_v11, %v7889_v11  ;;  %v7991_v61 = vmul.f32 %v3900_v42, %v7830_v24  ;;  %v7994_v41 = vmul.f32 %v3902_v1, %v7832_v58  ;;  %v3905_v59 = vmul.f32 0.5, %v3841_v31 }
 0xad7   : > { %v3721_v0 = vmul.f32 0.7978846, %v3657_v13  ;;  %v3592_v35 = vmul.f32 0.044715, %v3528_v2  ;;  %v3594_v45 = vmul.f32 0.044715, %v3530_v22  ;;  %v3469_v33 = vmul.f32 %v7891_v7, %v7891_v7 }
 0xad8   : > { %v3531_v43 = vmul.f32 %v3467_v23, %v7889_v11  ;;  %v8000_v39 = vmul.f32 %v3903_v48, %v7850_v44  ;;  %v3840_v21 = vadd.f32 1.0, %v6212_v46  ;;  %6223 = vtanh.f32 %v3719_v3 }
 0xad9   : > { %v3468_v24 = vmul.f32 %v7893_v47, %v7893_v47  ;;  %v3656_v58 = vadd.f32 %v3592_v35, %v7883_v18  ;;  %v3658_v42 = vadd.f32 %v3594_v45, %v7885_v62  ;;  %v3533_v51 = vmul.f32 %v3469_v33, %v7891_v7 }
 0xada   : > { %v3595_v1 = vmul.f32 0.044715, %v3531_v43  ;;  %v8008_v20 = vmul.f32 %v3905_v59, %v7852_v52  ;;  %v3470_v44 = vmul.f32 %v7895_v4, %v7895_v4  ;;  %v4016_v48 = vpack.c.bf16 %v7929_v50, %v7909_v30 }
 0xadb   : > { %v6214_v36 = vpop.eup %6213  ;;  %v3532_v16 = vmul.f32 %v3468_v24, %v7893_v47  ;;  %6225 = vtanh.f32 %v3721_v0  ;;  %v3720_v31 = vmul.f32 0.7978846, %v3656_v58  ;;  %v3722_v46 = vmul.f32 0.7978846, %v3658_v42 }
 0xadc   : > { %v3842_v3 = vadd.f32 1.0, %v6214_v36  ;;  %v3659_v13 = vadd.f32 %v3595_v1, %v7889_v11  ;;  %v6216_v2 = vpop.eup %6215  ;;  %v3597_v22 = vmul.f32 0.044715, %v3533_v51  ;;  %4335 = vmatprep.mubr.bf16.mxu1 %v4016_v48  ;;  %v4018_v52 = vpack.c.bf16 %v7932_v34, %v7926_v15 }
 0xadd   : > { %v3596_v23 = vmul.f32 0.044715, %v3532_v16  ;;  %v6218_v59 = vpop.eup %6217  ;;  %v3843_v35 = vadd.f32 1.0, %v6216_v2  ;;  %6227 = vtanh.f32 %v3720_v31  ;;  %v3534_v43 = vmul.f32 %v3470_v44, %v7895_v4 }
 0xade   : > { %v3723_v45 = vmul.f32 0.7978846, %v3659_v13  ;;  %v8731_v30 = vpack.c.bf16 %v7904_v55, %v7898_v60  ;;  %v6220_v50 = vpop.eup %6219  ;;  %v3904_v0 = vmul.f32 0.5, %v3840_v21  ;;  %v3845_v33 = vadd.f32 1.0, %v6218_v59  ;;  %4432 = vmatprep.mubr.bf16.mxu0 %v4018_v52 }
 0xadf   : > { %v3661_v24 = vadd.f32 %v3597_v22, %v7891_v7  ;;  %v3660_v58 = vadd.f32 %v3596_v23, %v7893_v47  ;;  %v6222_v42 = vpop.eup %6221  ;;  %v3906_v15 = vmul.f32 0.5, %v3842_v3  ;;  %v3907_v34 = vmul.f32 0.5, %v3843_v35  ;;  %4433 = vmatmul.mubr.bf16.vlgmr.msra.gmra.mrb[96].mxu0 %v4017_v10 }
 0xae0   : > { %4336 = vmatmul.mubr.bf16.vlgmr.msra.gmra.mrb[96].mxu1 %v8731_v30  ;;  %v3844_v1 = vadd.f32 1.0, %v6220_v50  ;;  %6229 = vtanh.f32 %v3723_v45  ;;  %v3909_v51 = vmul.f32 0.5, %v3845_v33  ;;  %v3846_v60 = vadd.f32 1.0, %v6222_v42 }
 0xae1   : > { %v3725_v55 = vmul.f32 0.7978846, %v3661_v24  ;;  %v3724_v36 = vmul.f32 0.7978846, %v3660_v58  ;;  %v3971_v21 = vmul.f32 %v3907_v34, %v7860_v25  ;;  %6231 = vtanh.f32 %v3722_v46 }
 0xae2   : > { %v3908_v16 = vmul.f32 0.5, %v3844_v1  ;;  %v3598_v44 = vmul.f32 0.044715, %v3534_v43  ;;  %v6224_v48 = vpop.eup %6223  ;;  %v3973_v31 = vmul.f32 %v3909_v51, %v7862_v26  ;;  %v3910_v3 = vmul.f32 0.5, %v3846_v60 }
 0xae3   : > { %6233 = vtanh.f32 %v3725_v55  ;;  %v4020_v13 = vpack.c.bf16 %v7991_v61, %v7942_v27  ;;  %v3968_v28 = vmul.f32 %v3904_v0, %v7855_v12  ;;  %v3970_v17 = vmul.f32 %v3906_v15, %v7857_v37 }
 0xae4   : > { %v3972_v10 = vmul.f32 %v3908_v16, %v7868_v49  ;;  %6235 = vtanh.f32 %v3724_v36  ;;  %v3974_v25 = vmul.f32 %v3910_v3, %v7870_v53  ;;  %v3662_v2 = vadd.f32 %v3598_v44, %v7895_v4 }
 0xae5   : > { %4343 = vmatprep.mubr.bf16.mxu1 %v4020_v13  ;;  %v4022_v26 = vpack.c.bf16 %v7994_v41, %v7947_v19  ;;  %v4019_v46 = vpack.c.bf16 %v7962_v32, %v7935_v40  ;;  %v6226_v22 = vpop.eup %6225  ;;  %v3847_v27 = vadd.f32 1.0, %v6224_v48  ;;  %v4021_v12 = vpack.c.bf16 %v7985_v38, %v7939_v9 }
 0xae6   : > { %v4024_v37 = vpack.c.bf16 %v3972_v10, %v3968_v28  ;;  %v3726_v61 = vmul.f32 0.7978846, %v3662_v2  ;;  %v4026_v49 = vpack.c.bf16 %v3974_v25, %v3970_v17  ;;  %v4023_v53 = vpack.c.bf16 %v3971_v21, %v8000_v39 }
 0xae7   : > { %4440 = vmatprep.mubr.bf16.mxu0 %v4022_v26  ;;  %v4025_v23 = vpack.c.bf16 %v3973_v31, %v8008_v20  ;;  %v6228_v52 = vpop.eup %6227  ;;  %v3849_v19 = vadd.f32 1.0, %v6226_v22  ;;  %v3911_v32 = vmul.f32 0.5, %v3847_v27 }
 0xae8   : > { %4344 = vmatmul.mubr.bf16.gmra.mrb[100].mxu1 %v4019_v46  ;;  %4441 = vmatmul.mubr.bf16.gmra.mrb[100].mxu0 %v4021_v12  ;;  %6237 = vtanh.f32 %v3726_v61  ;;  %v3848_v41 = vadd.f32 1.0, %v6228_v52 }
 0xae9   : > { %4351 = vmatprep.mubr.bf16.mxu1 %v4024_v37  ;;  %4448 = vmatprep.mubr.bf16.mxu0 %v4026_v49  ;;  %v3913_v43 = vmul.f32 0.5, %v3849_v19  ;;  %v3975_v39 = vmul.f32 %v3911_v32, %v7878_v14 }
 0xaea   : > { %v6230_v40 = vpop.eup %6229  ;;  %v3912_v50 = vmul.f32 0.5, %v3848_v41 }
 0xaeb   : > { %v3851_v59 = vadd.f32 1.0, %v6230_v40  ;;  %v6232_v9 = vpop.eup %6231  ;;  %v3977_v15 = vmul.f32 %v3913_v43, %v7880_v8 }
 0xaec   : > { %v3850_v33 = vadd.f32 1.0, %v6232_v9  ;;  %v3976_v51 = vmul.f32 %v3912_v50, %v7883_v18 }
 0xaed   : > { %v6234_v38 = vpop.eup %6233  ;;  %v3915_v35 = vmul.f32 0.5, %v3851_v59 }
 0xaee   : > { %v6236_v45 = vpop.eup %6235  ;;  %v3853_v30 = vadd.f32 1.0, %v6234_v38  ;;  %v3914_v14 = vmul.f32 0.5, %v3850_v33 }
 0xaef   : > { %v3979_v20 = vmul.f32 %v3915_v35, %v7889_v11  ;;  %v3852_v0 = vadd.f32 1.0, %v6236_v45 }
 0xaf0   : > { %4352 = vmatmul.mubr.bf16.gmra.mrb[104].mxu1 %v4023_v53  ;;  %v3917_v24 = vmul.f32 0.5, %v3853_v30  ;;  %4449 = vmatmul.mubr.bf16.gmra.mrb[104].mxu0 %v4025_v23  ;;  %v3978_v16 = vmul.f32 %v3914_v14, %v7885_v62 }
 0xaf1   : > { %v3916_v58 = vmul.f32 0.5, %v3852_v0  ;;  %v4027_v42 = vpack.c.bf16 %v3979_v20, %v3975_v39 }
 0xaf2   : > { %v3981_v34 = vmul.f32 %v3917_v24, %v7891_v7  ;;  %v6238_v1 = vpop.eup %6237 }
 0xaf3   : > { %v3980_v60 = vmul.f32 %v3916_v58, %v7893_v47  ;;  %v3854_v55 = vadd.f32 1.0, %v6238_v1 }
 0xaf4   : > { %v4029_v36 = vpack.c.bf16 %v3981_v34, %v3977_v15 }
 0xaf5   : > { %v4028_v11 = vpack.c.bf16 %v3980_v60, %v3976_v51  ;;  %v3918_v21 = vmul.f32 0.5, %v3854_v55 }
 0xaf7   : > { %4359 = vmatprep.mubr.bf16.mxu1 %v4028_v11  ;;  %v3982_v44 = vmul.f32 %v3918_v21, %v7895_v4 }
 0xaf8   : > { %4360 = vmatmul.mubr.bf16.gmra.mrb[108].mxu1 %v4027_v42 }
 0xaf9   : > { %v4030_v48 = vpack.c.bf16 %v3982_v44, %v3978_v16 }
 0xafb   : > { %4456 = vmatprep.mubr.bf16.mxu0 %v4030_v48 }
 0xafc   : > { %4457 = vmatmul.mubr.bf16.gmra.mrb[108].mxu0 %v4029_v36 }
 0xb44   : > { %v8052_v8 = vpop.f32.mrb[80].mxu1  ;;  %v8054_v7 = vpop.f32.mrb[80].mxu0 }
 0xb45   : > { %v3471_v18 = vmul.f32 %v8052_v8, %v8052_v8  ;;  %v3473_v47 = vmul.f32 %v8054_v7, %v8054_v7  ;;  %v8060_v31 = vpop.f32.mrb[81].mxu1  ;;  %v8062_v3 = vpop.f32.mrb[81].mxu0 }
 0xb46   : > { %v3472_v62 = vmul.f32 %v8060_v31, %v8060_v31  ;;  %v3474_v4 = vmul.f32 %v8062_v3, %v8062_v3  ;;  %v8068_v13 = vpop.f32.mrb[82].mxu1  ;;  %v8070_v28 = vpop.f32.mrb[82].mxu0 }
 0xb47   : > { %v3535_v17 = vmul.f32 %v3471_v18, %v8052_v8  ;;  %v3537_v10 = vmul.f32 %v3473_v47, %v8054_v7  ;;  %v3475_v25 = vmul.f32 %v8068_v13, %v8068_v13  ;;  %v3477_v2 = vmul.f32 %v8070_v28, %v8070_v28  ;;  %v8078_v26 = vpop.f32.mrb[83].mxu1  ;;  %v8080_v46 = vpop.f32.mrb[83].mxu0 }
 0xb48   : > { %v3536_v22 = vmul.f32 %v3472_v62, %v8060_v31  ;;  %v3538_v27 = vmul.f32 %v3474_v4, %v8062_v3  ;;  %v3476_v12 = vmul.f32 %v8078_v26, %v8078_v26  ;;  %v3478_v37 = vmul.f32 %v8080_v46, %v8080_v46 }
 0xb49   : > { %v3599_v61 = vmul.f32 0.044715, %v3535_v17  ;;  %v3601_v49 = vmul.f32 0.044715, %v3537_v10  ;;  %v3539_v53 = vmul.f32 %v3475_v25, %v8068_v13  ;;  %v3541_v23 = vmul.f32 %v3477_v2, %v8070_v28 }
 0xb4a   : > { %v3600_v52 = vmul.f32 0.044715, %v3536_v22  ;;  %v3602_v40 = vmul.f32 0.044715, %v3538_v27  ;;  %v3540_v19 = vmul.f32 %v3476_v12, %v8078_v26  ;;  %v3542_v32 = vmul.f32 %v3478_v37, %v8080_v46 }
 0xb4b   : > { %v3663_v41 = vadd.f32 %v3599_v61, %v8052_v8  ;;  %v3665_v59 = vadd.f32 %v3601_v49, %v8054_v7  ;;  %v3603_v9 = vmul.f32 0.044715, %v3539_v53  ;;  %v3605_v38 = vmul.f32 0.044715, %v3541_v23 }
 0xb4c   : > { %v3664_v35 = vadd.f32 %v3600_v52, %v8060_v31  ;;  %v3666_v45 = vadd.f32 %v3602_v40, %v8062_v3  ;;  %v3604_v43 = vmul.f32 0.044715, %v3540_v19  ;;  %v3606_v30 = vmul.f32 0.044715, %v3542_v32  ;;  %v8096_v39 = vpop.f32.mrb[84].mxu1  ;;  %v8098_v50 = vpop.f32.mrb[84].mxu0 }
 0xb4d   : > { %v3727_v20 = vmul.f32 0.7978846, %v3663_v41  ;;  %v3729_v0 = vmul.f32 0.7978846, %v3665_v59  ;;  %v3667_v33 = vadd.f32 %v3603_v9, %v8068_v13  ;;  %v3669_v24 = vadd.f32 %v3605_v38, %v8070_v28  ;;  %v8102_v58 = vpop.f32.mrb[85].mxu1  ;;  %v8104_v42 = vpop.f32.mrb[85].mxu0 }
 0xb4e   : > { %v3728_v15 = vmul.f32 0.7978846, %v3664_v35  ;;  %v3730_v34 = vmul.f32 0.7978846, %v3666_v45  ;;  %v3668_v1 = vadd.f32 %v3604_v43, %v8078_v26  ;;  %v3670_v51 = vadd.f32 %v3606_v30, %v8080_v46  ;;  %v8108_v60 = vpop.f32.mrb[86].mxu1  ;;  %v8110_v14 = vpop.f32.mrb[86].mxu0 }
 0xb4f   : > { %6239 = vtanh.f32 %v3727_v20  ;;  %v3731_v55 = vmul.f32 0.7978846, %v3667_v33  ;;  %v3733_v36 = vmul.f32 0.7978846, %v3669_v24  ;;  %v3479_v11 = vmul.f32 %v8096_v39, %v8096_v39  ;;  %v8114_v21 = vpop.f32.mrb[87].mxu1  ;;  %v8116_v16 = vpop.f32.mrb[87].mxu0 }
 0xb50   : > { %6241 = vtanh.f32 %v3729_v0  ;;  %v3732_v44 = vmul.f32 0.7978846, %v3668_v1  ;;  %v3734_v48 = vmul.f32 0.7978846, %v3670_v51  ;;  %v3481_v18 = vmul.f32 %v8098_v50, %v8098_v50 }
 0xb51   : > { %6243 = vtanh.f32 %v3728_v15  ;;  %v3543_v47 = vmul.f32 %v3479_v11, %v8096_v39  ;;  %v3480_v62 = vmul.f32 %v8102_v58, %v8102_v58  ;;  %v3482_v4 = vmul.f32 %v8104_v42, %v8104_v42 }
 0xb52   : > { %6245 = vtanh.f32 %v3730_v34  ;;  %v3545_v17 = vmul.f32 %v3481_v18, %v8098_v50  ;;  %v3483_v10 = vmul.f32 %v8108_v60, %v8108_v60  ;;  %v3485_v25 = vmul.f32 %v8110_v14, %v8110_v14 }
 0xb53   : > { %6247 = vtanh.f32 %v3731_v55  ;;  %v3607_v2 = vmul.f32 0.044715, %v3543_v47  ;;  %v3544_v22 = vmul.f32 %v3480_v62, %v8102_v58  ;;  %v3546_v27 = vmul.f32 %v3482_v4, %v8104_v42 }
 0xb54   : > { %6249 = vtanh.f32 %v3733_v36  ;;  %v3609_v12 = vmul.f32 0.044715, %v3545_v17  ;;  %v3547_v37 = vmul.f32 %v3483_v10, %v8108_v60  ;;  %v3549_v61 = vmul.f32 %v3485_v25, %v8110_v14  ;;  %v8134_v49 = vpop.f32.mrb[88].mxu1  ;;  %v8136_v53 = vpop.f32.mrb[88].mxu0 }
 0xb55   : > { %6251 = vtanh.f32 %v3732_v44  ;;  %v3671_v23 = vadd.f32 %v3607_v2, %v8096_v39  ;;  %v3608_v52 = vmul.f32 0.044715, %v3544_v22  ;;  %v3610_v40 = vmul.f32 0.044715, %v3546_v27  ;;  %v8139_v19 = vpop.f32.mrb[89].mxu1  ;;  %v8141_v32 = vpop.f32.mrb[89].mxu0 }
 0xb56   : > { %6253 = vtanh.f32 %v3734_v48  ;;  %v3673_v41 = vadd.f32 %v3609_v12, %v8098_v50  ;;  %v3611_v59 = vmul.f32 0.044715, %v3547_v37  ;;  %v3613_v9 = vmul.f32 0.044715, %v3549_v61  ;;  %v8144_v38 = vpop.f32.mrb[90].mxu1  ;;  %v8146_v35 = vpop.f32.mrb[90].mxu0 }
 0xb57   : > { %v3735_v45 = vmul.f32 0.7978846, %v3671_v23  ;;  %v3672_v43 = vadd.f32 %v3608_v52, %v8102_v58  ;;  %v3674_v30 = vadd.f32 %v3610_v40, %v8104_v42  ;;  %v3484_v20 = vmul.f32 %v8114_v21, %v8114_v21  ;;  %v8152_v0 = vpop.f32.mrb[91].mxu1  ;;  %v8154_v33 = vpop.f32.mrb[91].mxu0 }
 0xb58   : > { %v3737_v24 = vmul.f32 0.7978846, %v3673_v41  ;;  %v3675_v15 = vadd.f32 %v3611_v59, %v8108_v60  ;;  %v3677_v34 = vadd.f32 %v3613_v9, %v8110_v14  ;;  %v3486_v1 = vmul.f32 %v8116_v16, %v8116_v16 }
 0xb59   : > { %v6240_v51 = vpop.eup %6239  ;;  %6255 = vtanh.f32 %v3735_v45  ;;  %v3736_v55 = vmul.f32 0.7978846, %v3672_v43  ;;  %v3738_v36 = vmul.f32 0.7978846, %v3674_v30  ;;  %v3548_v11 = vmul.f32 %v3484_v20, %v8114_v21 }
 0xb5a   : > { %v6242_v44 = vpop.eup %6241  ;;  %v3855_v48 = vadd.f32 1.0, %v6240_v51  ;;  %6257 = vtanh.f32 %v3737_v24  ;;  %v3739_v18 = vmul.f32 0.7978846, %v3675_v15  ;;  %v3741_v4 = vmul.f32 0.7978846, %v3677_v34 }
 0xb5b   : > { %v6244_v47 = vpop.eup %6243  ;;  %v3857_v62 = vadd.f32 1.0, %v6242_v44  ;;  %6259 = vtanh.f32 %v3736_v55  ;;  %v3612_v17 = vmul.f32 0.044715, %v3548_v11  ;;  %v3550_v22 = vmul.f32 %v3486_v1, %v8116_v16 }
 0xb5c   : > { %v6246_v10 = vpop.eup %6245  ;;  %v3919_v25 = vmul.f32 0.5, %v3855_v48  ;;  %v3856_v2 = vadd.f32 1.0, %v6244_v47  ;;  %6261 = vtanh.f32 %v3738_v36  ;;  %v8162_v27 = vpop.f32.mrb[92].mxu1  ;;  %v3487_v43 = vmul.f32 %v8134_v49, %v8134_v49 }
 0xb5d   : > { %v8164_v12 = vpop.f32.mrb[92].mxu0  ;;  %v6248_v37 = vpop.eup %6247  ;;  %v3921_v61 = vmul.f32 0.5, %v3857_v62  ;;  %v3858_v23 = vadd.f32 1.0, %v6246_v10  ;;  %6263 = vtanh.f32 %v3739_v18  ;;  %v3676_v52 = vadd.f32 %v3612_v17, %v8114_v21 }
 0xb5e   : > { %v8167_v40 = vpop.f32.mrb[93].mxu1  ;;  %v8169_v41 = vpop.f32.mrb[93].mxu0  ;;  %v3920_v9 = vmul.f32 0.5, %v3856_v2  ;;  %v3859_v45 = vadd.f32 1.0, %v6248_v37  ;;  %6265 = vtanh.f32 %v3741_v4  ;;  %v3614_v11 = vmul.f32 0.044715, %v3550_v22 }
 0xb5f   : > { %v6250_v59 = vpop.eup %6249  ;;  %v8173_v30 = vpop.f32.mrb[94].mxu1  ;;  %v3740_v34 = vmul.f32 0.7978846, %v3676_v52  ;;  %v8182_v44 = vmul.f32 %v3919_v25, %v8052_v8  ;;  %v8185_v48 = vmul.f32 %v3921_v61, %v8054_v7  ;;  %v3922_v18 = vmul.f32 0.5, %v3858_v23 }
 0xb60   : > { %v8175_v20 = vpop.f32.mrb[94].mxu0  ;;  %v6252_v24 = vpop.eup %6251  ;;  %v3861_v15 = vadd.f32 1.0, %v6250_v59  ;;  %v8188_v62 = vmul.f32 %v3920_v9, %v8060_v31  ;;  %v3923_v4 = vmul.f32 0.5, %v3859_v45  ;;  %v3678_v17 = vadd.f32 %v3614_v11, %v8116_v16 }
 0xb61   : > { %v8177_v1 = vpop.f32.mrb[95].mxu1  ;;  %v8179_v51 = vpop.f32.mrb[95].mxu0  ;;  %v3860_v36 = vadd.f32 1.0, %v6252_v24  ;;  %v3551_v10 = vmul.f32 %v3487_v43, %v8134_v49  ;;  %6267 = vtanh.f32 %v3740_v34  ;;  %v3489_v8 = vmul.f32 %v8136_v53, %v8136_v53 }
 0xb62   : > { %v6254_v55 = vpop.eup %6253  ;;  %v3925_v37 = vmul.f32 0.5, %v3861_v15  ;;  %v3488_v7 = vmul.f32 %v8139_v19, %v8139_v19  ;;  %v3742_v23 = vmul.f32 0.7978846, %v3678_v17  ;;  %v8200_v17 = vmul.f32 %v3922_v18, %v8062_v3 }
 0xb63   : > { %v3862_v47 = vadd.f32 1.0, %v6254_v55  ;;  %v6256_v2 = vpop.eup %6255  ;;  %v3924_v22 = vmul.f32 0.5, %v3860_v36  ;;  %v3615_v31 = vmul.f32 0.044715, %v3551_v10  ;;  %v3553_v45 = vmul.f32 %v3489_v8, %v8136_v53 }
 0xb64   : > { %v6258_v25 = vpop.eup %6257  ;;  %v3863_v61 = vadd.f32 1.0, %v6256_v2  ;;  %v3552_v43 = vmul.f32 %v3488_v7, %v8139_v19  ;;  %6269 = vtanh.f32 %v3742_v23 }
 0xb65   : > { %v6260_v52 = vpop.eup %6259  ;;  %v3926_v59 = vmul.f32 0.5, %v3862_v47  ;;  %v3865_v9 = vadd.f32 1.0, %v6258_v25  ;;  %v3679_v55 = vadd.f32 %v3615_v31, %v8134_v49  ;;  %v3617_v36 = vmul.f32 0.044715, %v3553_v45 }
 0xb66   : > { %v6262_v24 = vpop.eup %6261  ;;  %v3927_v15 = vmul.f32 0.5, %v3863_v61  ;;  %v3864_v34 = vadd.f32 1.0, %v6260_v52  ;;  %v3616_v2 = vmul.f32 0.044715, %v3552_v43  ;;  %v8203_v47 = vmul.f32 %v3923_v4, %v8068_v13 }
 0xb67   : > { %v6264_v11 = vpop.eup %6263  ;;  %v3929_v57 = vmul.f32 0.5, %v3865_v9  ;;  %v3866_v56 = vadd.f32 1.0, %v6262_v24  ;;  %v3743_v8 = vmul.f32 0.7978846, %v3679_v55  ;;  %v8206_v25 = vmul.f32 %v3925_v37, %v8070_v28 }
 0xb68   : > { %v3928_v10 = vmul.f32 0.5, %v3864_v34  ;;  %v6266_v7 = vpop.eup %6265  ;;  %v8209_v61 = vmul.f32 %v3924_v22, %v8078_v26  ;;  %v3867_v23 = vadd.f32 1.0, %v6264_v11  ;;  %v3681_v31 = vadd.f32 %v3617_v36, %v8136_v53 }
 0xb69   : > { %v8213_v52 = vmul.f32 %v3926_v59, %v8080_v46  ;;  %v3930_v3 = vmul.f32 0.5, %v3866_v56  ;;  %6271 = vtanh.f32 %v3743_v8  ;;  %v3680_v13 = vadd.f32 %v3616_v2, %v8139_v19 }
 0xb6a   : > { %v8217_v18 = vmul.f32 %v3927_v15, %v8096_v39  ;;  %v8220_v4 = vmul.f32 %v3929_v57, %v8098_v50  ;;  %v3745_v28 = vmul.f32 0.7978846, %v3681_v31  ;;  %v3490_v26 = vmul.f32 %v8141_v32, %v8141_v32 }
 0xb6b   : > { %v8225_v37 = vmul.f32 %v3928_v10, %v8102_v58  ;;  %v3869_v22 = vadd.f32 1.0, %v6266_v7  ;;  %v3744_v46 = vmul.f32 0.7978846, %v3680_v13  ;;  %v3491_v56 = vmul.f32 %v8144_v38, %v8144_v38  ;;  %v6268_v59 = vpop.eup %6267 }
 0xb6c   : > { %v3931_v9 = vmul.f32 0.5, %v3867_v23  ;;  %6273 = vtanh.f32 %v3745_v28  ;;  %v3554_v39 = vmul.f32 %v3490_v26, %v8141_v32  ;;  %v3493_v57 = vmul.f32 %v8146_v35, %v8146_v35 }
 0xb6d   : > { %v8233_v50 = vmul.f32 %v3930_v3, %v8104_v42  ;;  %6275 = vtanh.f32 %v3744_v46  ;;  %v3555_v58 = vmul.f32 %v3491_v56, %v8144_v38  ;;  %v3492_v45 = vmul.f32 %v8152_v0, %v8152_v0 }
 0xb6e   : > { %v3618_v43 = vmul.f32 0.044715, %v3554_v39  ;;  %v3557_v24 = vmul.f32 %v3493_v57, %v8146_v35  ;;  %v3494_v15 = vmul.f32 %v8154_v33, %v8154_v33  ;;  %v3495_v34 = vmul.f32 %v8162_v27, %v8162_v27  ;;  %v6270_v55 = vpop.eup %6269 }
 0xb6f   : > { %v3868_v11 = vadd.f32 1.0, %v6268_v59  ;;  %v3619_v36 = vmul.f32 0.044715, %v3555_v58  ;;  %v3556_v42 = vmul.f32 %v3492_v45, %v8152_v0  ;;  %v3497_v2 = vmul.f32 %v8164_v12, %v8164_v12 }
 0xb70   : > { %v3870_v10 = vadd.f32 1.0, %v6270_v55  ;;  %v3682_v8 = vadd.f32 %v3618_v43, %v8141_v32  ;;  %v3621_v7 = vmul.f32 0.044715, %v3557_v24  ;;  %v3558_v23 = vmul.f32 %v3494_v15, %v8154_v33 }
 0xb71   : > { %v3683_v31 = vadd.f32 %v3619_v36, %v8144_v38  ;;  %v3620_v3 = vmul.f32 0.044715, %v3556_v42  ;;  %v3559_v13 = vmul.f32 %v3495_v34, %v8162_v27  ;;  %v3561_v28 = vmul.f32 %v3497_v2, %v8164_v12 }
 0xb72   : > { %v3933_v26 = vmul.f32 0.5, %v3869_v22  ;;  %v3746_v46 = vmul.f32 0.7978846, %v3682_v8  ;;  %v3685_v56 = vadd.f32 %v3621_v7, %v8146_v35  ;;  %v3622_v59 = vmul.f32 0.044715, %v3558_v23 }
 0xb73   : > { %v6272_v39 = vpop.eup %6271  ;;  %v3747_v57 = vmul.f32 0.7978846, %v3683_v31  ;;  %v3684_v58 = vadd.f32 %v3620_v3, %v8152_v0  ;;  %v3623_v45 = vmul.f32 0.044715, %v3559_v13  ;;  %v3625_v43 = vmul.f32 0.044715, %v3561_v28 }
 0xb74   : > { %v3932_v24 = vmul.f32 0.5, %v3868_v11  ;;  %v3934_v15 = vmul.f32 0.5, %v3870_v10  ;;  %6277 = vtanh.f32 %v3746_v46  ;;  %v3749_v55 = vmul.f32 0.7978846, %v3685_v56 }
 0xb75   : > { %6279 = vtanh.f32 %v3747_v57  ;;  %v3748_v36 = vmul.f32 0.7978846, %v3684_v58  ;;  %v3686_v34 = vadd.f32 %v3622_v59, %v8154_v33  ;;  %v3687_v22 = vadd.f32 %v3623_v45, %v8162_v27 }
 0xb76   : > { %v6274_v42 = vpop.eup %6273  ;;  %v8256_v2 = vmul.f32 %v3931_v9, %v8108_v60  ;;  %v3871_v8 = vadd.f32 1.0, %v6272_v39  ;;  %6281 = vtanh.f32 %v3749_v55  ;;  %v3496_v7 = vmul.f32 %v8167_v40, %v8167_v40 }
 0xb77   : > { %v6276_v23 = vpop.eup %6275  ;;  %v3873_v11 = vadd.f32 1.0, %v6274_v42  ;;  %6283 = vtanh.f32 %v3748_v36  ;;  %v3750_v10 = vmul.f32 0.7978846, %v3686_v34  ;;  %v3689_v31 = vadd.f32 %v3625_v43, %v8164_v12 }
 0xb78   : > { %v8262_v3 = vmul.f32 %v3933_v26, %v8110_v14  ;;  %v8265_v13 = vmul.f32 %v3932_v24, %v8114_v21  ;;  %v3751_v28 = vmul.f32 0.7978846, %v3687_v22  ;;  %v3560_v60 = vmul.f32 %v3496_v7, %v8167_v40 }
 0xb79   : > { %v8269_v9 = vmul.f32 %v3934_v15, %v8116_v16  ;;  %6285 = vtanh.f32 %v3750_v10  ;;  %v3498_v46 = vmul.f32 %v8169_v41, %v8169_v41  ;;  %v3499_v56 = vmul.f32 %v8173_v30, %v8173_v30 }
 0xb7a   : > { %v3935_v59 = vmul.f32 0.5, %v3871_v8  ;;  %v3872_v39 = vadd.f32 1.0, %v6276_v23  ;;  %v3624_v14 = vmul.f32 0.044715, %v3560_v60  ;;  %v3501_v21 = vmul.f32 %v8175_v20, %v8175_v20 }
 0xb7b   : > { %v3937_v26 = vmul.f32 0.5, %v3873_v11  ;;  %v3753_v57 = vmul.f32 0.7978846, %v3689_v31  ;;  %v3562_v58 = vmul.f32 %v3498_v46, %v8169_v41  ;;  %v3563_v16 = vmul.f32 %v3499_v56, %v8173_v30 }
 0xb7c   : > { %6287 = vtanh.f32 %v3751_v28  ;;  %v3688_v45 = vadd.f32 %v3624_v14, %v8167_v40  ;;  %v3565_v43 = vmul.f32 %v3501_v21, %v8175_v20  ;;  %v3500_v24 = vmul.f32 %v8177_v1, %v8177_v1 }
 0xb7d   : > { %v3626_v15 = vmul.f32 0.044715, %v3562_v58  ;;  %v3627_v55 = vmul.f32 0.044715, %v3563_v16  ;;  %v3502_v36 = vmul.f32 %v8179_v51, %v8179_v51  ;;  %v4032_v34 = vpack.c.bf16 %v8209_v61, %v8188_v62 }
 0xb7e   : > { %v6278_v22 = vpop.eup %6277  ;;  %v3752_v42 = vmul.f32 0.7978846, %v3688_v45  ;;  %v3629_v8 = vmul.f32 0.044715, %v3565_v43  ;;  %v3564_v7 = vmul.f32 %v3500_v24, %v8177_v1  ;;  %v4034_v23 = vpack.c.bf16 %v8213_v52, %v8200_v17 }
 0xb7f   : > { %v6280_v11 = vpop.eup %6279  ;;  %6289 = vtanh.f32 %v3753_v57  ;;  %v3690_v10 = vadd.f32 %v3626_v15, %v8169_v41  ;;  %v3691_v31 = vadd.f32 %v3627_v55, %v8173_v30  ;;  %v3566_v28 = vmul.f32 %v3502_v36, %v8179_v51  ;;  %4367 = vmatprep.mubr.bf16.mxu1 %v4032_v34 }
 0xb80   : > { %v6282_v60 = vpop.eup %6281  ;;  %v3874_v46 = vadd.f32 1.0, %v6278_v22  ;;  %v3875_v62 = vadd.f32 1.0, %v6280_v11  ;;  %v3693_v61 = vadd.f32 %v3629_v8, %v8175_v20  ;;  %v3628_v56 = vmul.f32 0.044715, %v3564_v7  ;;  %4464 = vmatprep.mubr.bf16.mxu0 %v4034_v23 }
 0xb81   : > { %v6284_v14 = vpop.eup %6283  ;;  %v3877_v21 = vadd.f32 1.0, %v6282_v60  ;;  %6291 = vtanh.f32 %v3752_v42  ;;  %v3754_v17 = vmul.f32 0.7978846, %v3690_v10  ;;  %v3755_v52 = vmul.f32 0.7978846, %v3691_v31 }
 0xb82   : > { %v3939_v57 = vmul.f32 0.5, %v3875_v62  ;;  %v3876_v58 = vadd.f32 1.0, %v6284_v14  ;;  %v3757_v16 = vmul.f32 0.7978846, %v3693_v61  ;;  %v3692_v45 = vadd.f32 %v3628_v56, %v8177_v1 }
 0xb83   : > { %v6286_v43 = vpop.eup %6285  ;;  %v8296_v24 = vmul.f32 %v3935_v59, %v8134_v49  ;;  %v3941_v15 = vmul.f32 0.5, %v3877_v21  ;;  %6293 = vtanh.f32 %v3754_v17  ;;  %v3630_v55 = vmul.f32 0.044715, %v3566_v28 }
 0xb84   : > { %v3936_v36 = vmul.f32 0.5, %v3872_v39  ;;  %v3940_v34 = vmul.f32 0.5, %v3876_v58  ;;  %v3878_v22 = vadd.f32 1.0, %v6286_v43  ;;  %6295 = vtanh.f32 %v3755_v52 }
 0xb85   : > { %v8299_v42 = vmul.f32 %v3937_v26, %v8136_v53  ;;  %v3938_v8 = vmul.f32 0.5, %v3874_v46  ;;  %6297 = vtanh.f32 %v3757_v16  ;;  %v3756_v7 = vmul.f32 0.7978846, %v3692_v45 }
 0xb86   : > { %v6288_v23 = vpop.eup %6287  ;;  %v8302_v11 = vmul.f32 %v3939_v57, %v8144_v38  ;;  %v4004_v49 = vmul.f32 %v3940_v34, %v8152_v0  ;;  %v3942_v59 = vmul.f32 0.5, %v3878_v22  ;;  %v3694_v10 = vadd.f32 %v3630_v55, %v8179_v51 }
 0xb87   : > { %v4005_v39 = vmul.f32 %v3941_v15, %v8146_v35  ;;  %6299 = vtanh.f32 %v3756_v7  ;;  %v4031_v31 = vpack.c.bf16 %v8203_v47, %v8182_v44  ;;  %v4033_v53 = vpack.c.bf16 %v8206_v25, %v8185_v48 }
 0xb88   : > { %v4000_v26 = vmul.f32 %v3936_v36, %v8139_v19  ;;  %v4006_v28 = vmul.f32 %v3942_v59, %v8154_v33  ;;  %v3758_v38 = vmul.f32 0.7978846, %v3694_v10  ;;  %v4036_v0 = vpack.c.bf16 %v8265_v13, %v8225_v37 }
 0xb89   : > { %v6290_v60 = vpop.eup %6289  ;;  %v4002_v46 = vmul.f32 %v3938_v8, %v8141_v32  ;;  %4368 = vmatmul.mubr.bf16.gmra.mrb[112].mxu1 %v4031_v31  ;;  %4465 = vmatmul.mubr.bf16.gmra.mrb[112].mxu0 %v4033_v53  ;;  %v4038_v35 = vpack.c.bf16 %v8269_v9, %v8233_v50  ;;  %v4035_v44 = vpack.c.bf16 %v8256_v2, %v8217_v18  ;;  %v3879_v47 = vadd.f32 1.0, %v6288_v23 }
 0xb8a   : > { %6301 = vtanh.f32 %v3758_v38  ;;  %4375 = vmatprep.mubr.bf16.mxu1 %v4036_v0  ;;  %v4037_v19 = vpack.c.bf16 %v8262_v3, %v8220_v4  ;;  %v4040_v33 = vpack.c.bf16 %v4004_v49, %v4000_v26  ;;  %v4039_v32 = vpack.c.bf16 %v8302_v11, %v8296_v24 }
 0xb8b   : > { %v6292_v48 = vpop.eup %6291  ;;  %4472 = vmatprep.mubr.bf16.mxu0 %v4038_v35  ;;  %v4042_v25 = vpack.c.bf16 %v4006_v28, %v4002_v46  ;;  %v4041_v37 = vpack.c.bf16 %v4005_v39, %v8299_v42  ;;  %v3881_v13 = vadd.f32 1.0, %v6290_v60  ;;  %v3943_v2 = vmul.f32 0.5, %v3879_v47 }
 0xb8c   : > { %v3880_v62 = vadd.f32 1.0, %v6292_v48 }
 0xb8d   : > { %v6294_v50 = vpop.eup %6293  ;;  %v3945_v56 = vmul.f32 0.5, %v3881_v13  ;;  %v4007_v58 = vmul.f32 %v3943_v2, %v8162_v27 }
 0xb8e   : > { %v6296_v9 = vpop.eup %6295  ;;  %v3882_v3 = vadd.f32 1.0, %v6294_v50  ;;  %v3944_v17 = vmul.f32 0.5, %v3880_v62 }
 0xb8f   : > { %v6298_v18 = vpop.eup %6297  ;;  %v3883_v61 = vadd.f32 1.0, %v6296_v9  ;;  %v4009_v43 = vmul.f32 %v3945_v56, %v8164_v12 }
 0xb90   : > { %v3885_v14 = vadd.f32 1.0, %v6298_v18  ;;  %v3946_v55 = vmul.f32 0.5, %v3882_v3  ;;  %v4008_v22 = vmul.f32 %v3944_v17, %v8167_v40 }
 0xb91   : > { %v6300_v4 = vpop.eup %6299  ;;  %v3947_v21 = vmul.f32 0.5, %v3883_v61  ;;  %4376 = vmatmul.mubr.bf16.gmra.mrb[116].mxu1 %v4035_v44  ;;  %4473 = vmatmul.mubr.bf16.gmra.mrb[116].mxu0 %v4037_v19 }
 0xb92   : > { %v3949_v52 = vmul.f32 0.5, %v3885_v14  ;;  %v3884_v57 = vadd.f32 1.0, %v6300_v4  ;;  %4383 = vmatprep.mubr.bf16.mxu1 %v4040_v33  ;;  %4480 = vmatprep.mubr.bf16.mxu0 %v4042_v25  ;;  %v4010_v27 = vmul.f32 %v3946_v55, %v8169_v41 }
 0xb93   : > { %v4011_v16 = vmul.f32 %v3947_v21, %v8173_v30 }
 0xb94   : > { %v6302_v45 = vpop.eup %6301  ;;  %v4013_v24 = vmul.f32 %v3949_v52, %v8175_v20  ;;  %v3948_v15 = vmul.f32 0.5, %v3884_v57 }
 0xb95   : > { %v3886_v36 = vadd.f32 1.0, %v6302_v45  ;;  %v4043_v34 = vpack.c.bf16 %v4011_v16, %v4007_v58 }
 0xb96   : > { %v4012_v42 = vmul.f32 %v3948_v15, %v8177_v1  ;;  %v4045_v8 = vpack.c.bf16 %v4013_v24, %v4009_v43 }
 0xb97   : > { %v3950_v7 = vmul.f32 0.5, %v3886_v36 }
 0xb98   : > { %v4044_v23 = vpack.c.bf16 %v4012_v42, %v4008_v22 }
 0xb99   : > { %v4014_v30 = vmul.f32 %v3950_v7, %v8179_v51  ;;  %4384 = vmatmul.mubr.bf16.gmra.mrb[120].mxu1 %v4039_v32  ;;  %4481 = vmatmul.mubr.bf16.gmra.mrb[120].mxu0 %v4041_v37 }
 0xb9a   : > { %4391 = vmatprep.mubr.bf16.mxu1 %v4044_v23 }
 0xb9b   : > { %v4046_v12 = vpack.c.bf16 %v4014_v30, %v4010_v27  ;;  %v8733_v30 = vld [vmem:[#allocation7_spill] sm:$0xff] }
 0xb9d   : > { %4488 = vmatprep.mubr.bf16.mxu0 %v4046_v12 }
 0xba1   : > { %4392 = vmatmul.mubr.bf16.gmra.mrb[124].mxu1 %v4043_v34  ;;  %4489 = vmatmul.mubr.bf16.gmra.mrb[124].mxu0 %v4045_v8 }
 0xbb2   : > { %v5491_v49 = vpop.f32.mrb[96].mxu0 }
 0xbb3   : > { %v5427_v20 = vpop.f32.mrb[96].mxu1  ;;  %v5492_v1 = vpop.f32.mrb[97].mxu0 }
 0xbb4   : > { %v5428_v11 = vpop.f32.mrb[97].mxu1  ;;  %v5493_v39 = vadd.f32 %v5492_v1, %v5491_v49  ;;  %v5494_v31 = vpop.f32.mrb[98].mxu0 }
 0xbb5   : > { %v5429_v40 = vadd.f32 %v5428_v11, %v5427_v20  ;;  %v5430_v59 = vpop.f32.mrb[98].mxu1  ;;  %v5495_v41 = vpop.f32.mrb[99].mxu0  ;;  %v8734_v11 = vld [vmem:[#allocation6_spill] sm:$0xff] }
 0xbb6   : > { %v5431_v10 = vpop.f32.mrb[99].mxu1  ;;  %v5496_v51 = vadd.f32 %v5495_v41, %v5494_v31 }
 0xbb7   : > { %v5432_v53 = vadd.f32 %v5431_v10, %v5430_v59  ;;  %v4435_v26 = vadd.f32 %v5493_v39, %v5429_v40 }
 0xbb9   : > { %v8334_v28 = vadd.f32 %v4435_v26, %v7519_v29  ;;  %v4438_v38 = vadd.f32 %v5496_v51, %v5432_v53 }
 0xbbb   : > { %v5433_v0 = vpop.f32.mrb[100].mxu1  ;;  %4513 = vst [vmem:[#allocation2] sm:$0xff] %v8334_v28  ;;  %v8338_v60 = vadd.f32 %v4438_v38, %v7521_v54  ;;  %v5497_v46 = vpop.f32.mrb[100].mxu0  ;;  %4534 = vadd.xlane.f32.xlu0 (!%p5290_p6), %v8334_v28 }
 0xbbc   : > { %v5434_v35 = vpop.f32.mrb[101].mxu1  ;;  %v5498_v19 = vpop.f32.mrb[101].mxu0 }
 0xbbd   : > { %v5435_v44 = vadd.f32 %v5434_v35, %v5433_v0  ;;  %v5436_v33 = vpop.f32.mrb[102].mxu1  ;;  %4514 = vst [vmem:[#allocation2 + $0x8] sm:$0xff] %v8338_v60  ;;  %v5499_v48 = vadd.f32 %v5498_v19, %v5497_v46  ;;  %v5500_v47 = vpop.f32.mrb[102].mxu0  ;;  %v8735_v35 = vld [vmem:[#allocation8_spill] sm:$0xff] }
 0xbbe   : > { %v5437_v25 = vpop.f32.mrb[103].mxu1  ;;  %v5501_v29 = vpop.f32.mrb[103].mxu0 }
 0xbbf   : > { %v5438_v32 = vadd.f32 %v5437_v25, %v5436_v33  ;;  %v4443_v37 = vadd.f32 %v5499_v48, %v5435_v44  ;;  %v5502_v13 = vadd.f32 %v5501_v29, %v5500_v47  ;;  %v8736_v33 = vld [vmem:[#allocation9_spill] sm:$0xff]  ;;  %4536 = vadd.xlane.f32.xlu0 (!%p5290_p6), %v8338_v60 }
 0xbc1   : > { %v8342_v50 = vadd.f32 %v4443_v37, %v7534_v5  ;;  %v4446_v9 = vadd.f32 %v5502_v13, %v5438_v32 }
 0xbc3   : > { %v5439_v54 = vpop.f32.mrb[104].mxu1  ;;  %4515 = vst [vmem:[#allocation2 + $0x10] sm:$0xff] %v8342_v50  ;;  %v8346_v62 = vadd.f32 %v4446_v9, %v7527_v6  ;;  %v5503_v18 = vpop.f32.mrb[104].mxu0  ;;  %v8732_v6 = vld [vmem:[#allocation5_spill] sm:$0xff] }
 0xbc4   : > { %v5440_v2 = vpop.f32.mrb[105].mxu1  ;;  %v5504_v56 = vpop.f32.mrb[105].mxu0 }
 0xbc5   : > { %v5441_v61 = vadd.f32 %v5440_v2, %v5439_v54  ;;  %v5442_v14 = vpop.f32.mrb[106].mxu1  ;;  %4516 = vst [vmem:[#allocation2 + $0x18] sm:$0xff] %v8346_v62  ;;  %v5505_v4 = vadd.f32 %v5504_v56, %v5503_v18  ;;  %v5506_v3 = vpop.f32.mrb[106].mxu0 }
 0xbc6   : > { %v5443_v21 = vpop.f32.mrb[107].mxu1  ;;  %v5507_v5 = vpop.f32.mrb[107].mxu0 }
 0xbc7   : > { %v5444_v17 = vadd.f32 %v5443_v21, %v5442_v14  ;;  %v4451_v52 = vadd.f32 %v5505_v4, %v5441_v61  ;;  %v5508_v57 = vadd.f32 %v5507_v5, %v5506_v3  ;;  %v8737_v4 = vld [vmem:[#allocation10_spill] sm:$0xff] }
 0xbc9   : > { %v8350_v58 = vadd.f32 %v4451_v52, %v7548_v63  ;;  %v4454_v16 = vadd.f32 %v5508_v57, %v5444_v17  ;;  %v8738_v17 = vld [vmem:[#allocation11_spill] sm:$0xff] }
 0xbcb   : > { %4517 = vst [vmem:[#allocation2 + $0x20] sm:$0xff] %v8350_v58  ;;  %v8354_v45 = vadd.f32 %v4454_v16, %v8732_v6  ;;  %v5445_v43 = vpop.f32.mrb[108].mxu1 }
 0xbcc   : > { %v5446_v24 = vpop.f32.mrb[109].mxu1 }
 0xbcd   : > { %4518 = vst [vmem:[#allocation2 + $0x28] sm:$0xff] %v8354_v45  ;;  %v5447_v15 = vadd.f32 %v5446_v24, %v5445_v43  ;;  %v5448_v55 = vpop.f32.mrb[110].mxu1 }
 0xbce   : > { %v5449_v36 = vpop.f32.mrb[111].mxu1 }
 0xbcf   : > { %v5450_v34 = vadd.f32 %v5449_v36, %v5448_v55  ;;  %v5509_v22 = vpop.f32.mrb[108].mxu0 }
 0xbd0   : > { %v5510_v42 = vpop.f32.mrb[109].mxu0 }
 0xbd1   : > { %v5511_v8 = vadd.f32 %v5510_v42, %v5509_v22  ;;  %v5512_v7 = vpop.f32.mrb[110].mxu0 }
 0xbd2   : > { %v5513_v63 = vpop.f32.mrb[111].mxu0 }
 0xbd3   : > { %v4459_v23 = vadd.f32 %v5511_v8, %v5447_v15  ;;  %v5514_v27 = vadd.f32 %v5513_v63, %v5512_v7  ;;  %v8739_v7 = vld [vmem:[#allocation12_spill] sm:$0xff] }
 0xbd5   : > { %v8358_v12 = vadd.f32 %v4459_v23, %v8733_v30  ;;  %v4462_v20 = vadd.f32 %v5514_v27, %v5450_v34  ;;  %v8740_v27 = vld [vmem:[#allocation13_spill] sm:$0xff] }
 0xbd7   : > { %4519 = vst [vmem:[#allocation2 + $0x30] sm:$0xff] %v8358_v12  ;;  %v8362_v49 = vadd.f32 %v4462_v20, %v8734_v11 }
 0xbd9   : > { %4520 = vst [vmem:[#allocation2 + $0x38] sm:$0xff] %v8362_v49 }
 0xc5c   : > { %v5451_v40 = vpop.f32.mrb[112].mxu1  ;;  %v5515_v59 = vpop.f32.mrb[112].mxu0 }
 0xc5d   : > { %v5452_v1 = vpop.f32.mrb[113].mxu1  ;;  %v5516_v10 = vpop.f32.mrb[113].mxu0 }
 0xc5e   : > { %v5453_v39 = vadd.f32 %v5452_v1, %v5451_v40  ;;  %v5517_v31 = vadd.f32 %v5516_v10, %v5515_v59  ;;  %v5454_v53 = vpop.f32.mrb[114].mxu1  ;;  %v5518_v41 = vpop.f32.mrb[114].mxu0 }
 0xc5f   : > { %v5455_v26 = vpop.f32.mrb[115].mxu1  ;;  %v5519_v51 = vpop.f32.mrb[115].mxu0 }
 0xc60   : > { %v4467_v38 = vadd.f32 %v5517_v31, %v5453_v39  ;;  %v5456_v0 = vadd.f32 %v5455_v26, %v5454_v53  ;;  %v5520_v46 = vadd.f32 %v5519_v51, %v5518_v41 }
 0xc62   : > { %v8366_v44 = vadd.f32 %v4467_v38, %v8735_v35  ;;  %v4470_v19 = vadd.f32 %v5520_v46, %v5456_v0  ;;  %v8741_v0 = vld [vmem:[#allocation14_spill] sm:$0xff] }
 0xc64   : > { %4521 = vst [vmem:[#allocation2 + $0x40] sm:$0xff] %v8366_v44  ;;  %v8370_v48 = vadd.f32 %v4470_v19, %v8736_v33  ;;  %v5457_v47 = vpop.f32.mrb[116].mxu1  ;;  %v5521_v25 = vpop.f32.mrb[116].mxu0  ;;  %v8742_v19 = vld [vmem:[#allocation15_spill] sm:$0xff]  ;;  %4550 = vadd.xlane.f32.xlu1 (!%p5290_p6), %v8366_v44 }
 0xc65   : > { %v5458_v32 = vpop.f32.mrb[117].mxu1  ;;  %v5522_v29 = vpop.f32.mrb[117].mxu0 }
 0xc66   : > { %4522 = vst [vmem:[#allocation2 + $0x48] sm:$0xff] %v8370_v48  ;;  %v5459_v37 = vadd.f32 %v5458_v32, %v5457_v47  ;;  %v5523_v13 = vadd.f32 %v5522_v29, %v5521_v25  ;;  %v5460_v9 = vpop.f32.mrb[118].mxu1  ;;  %v5524_v54 = vpop.f32.mrb[118].mxu0  ;;  %v4583_v47 = vmul.f32 (!%p5290_p6), %v8338_v60, %v8338_v60  ;;  %v4582_v25 = vmul.f32 (!%p5290_p6), %v8334_v28, %v8334_v28 }
 0xc67   : > { %v5461_v18 = vpop.f32.mrb[119].mxu1  ;;  %v5525_v2 = vpop.f32.mrb[119].mxu0  ;;  %v4591_v32 = vmul.f32 (!%p5290_p6), %v8370_v48, %v8370_v48  ;;  %v4590_v29 = vmul.f32 (!%p5290_p6), %v8366_v44, %v8366_v44 }
 0xc68   : > { %v4475_v61 = vadd.f32 %v5523_v13, %v5459_v37  ;;  %v5462_v56 = vadd.f32 %v5461_v18, %v5460_v9  ;;  %v5526_v14 = vadd.f32 %v5525_v2, %v5524_v54  ;;  %4552 = vadd.xlane.f32.xlu1 (!%p5290_p6), %v8370_v48  ;;  %4598 = vadd.xlane.f32.xlu0 (!%p5290_p6), %v4582_v25  ;;  %v6319_v37 = vld [vmem:[%s8703_s9 + $0x4] ss:$8 sps:$4 sm:$0xff] (!%p5290_p6)   ;;  %v6321_v13 = vld [vmem:[%s8703_s9] ss:$8 sps:$4 sm:$0xff] (!%p5290_p6)   ;;  %v6322_v9 = vld [vmem:[%s8703_s9 + $0x14] ss:$8 sps:$4 sm:$0xff] (!%p5290_p6)  }
 0xc69   : > { %4868 = vmatprep.subr.bf16.mxu0 (!%p5290_p6), %v6319_v37  ;;  %5731 = vmatprep.subr.bf16.mxu1 (!%p5290_p6), %v6319_v37  ;;  %v6324_v54 = vld [vmem:[%s8703_s9 + $0x10] ss:$8 sps:$4 sm:$0xff] (!%p5290_p6)   ;;  %v6325_v18 = vld [vmem:[%s8703_s9 + $0x24] ss:$8 sps:$4 sm:$0xff] (!%p5290_p6)   ;;  %v4585_v2 = vmul.f32 (!%p5290_p6), %v8346_v62, %v8346_v62 }
 0xc6a   : > { %v8374_v3 = vadd.f32 %v4475_v61, %v8737_v4  ;;  %v4478_v21 = vadd.f32 %v5526_v14, %v5462_v56  ;;  %4869 = vmatpush1.bf16.msra.mxu0 (!%p5290_p6), %v6321_v13  ;;  %5739 = vmatpush1.bf16.msra.mxu1 (!%p5290_p6), %v6321_v13  ;;  %v4584_v61 = vmul.f32 (!%p5290_p6), %v8342_v50, %v8342_v50  ;;  %v6327_v56 = vld [vmem:[%s8703_s9 + $0x20] ss:$8 sps:$4 sm:$0xff] (!%p5290_p6)  }
 0xc6b   : > { %4870 = vmatprep.subr.bf16.mxu0 (!%p5290_p6), %v6322_v9  ;;  %5732 = vmatprep.subr.bf16.mxu1 (!%p5290_p6), %v6322_v9 }
 0xc6c   : > { %4523 = vst [vmem:[#allocation2 + $0x50] sm:$0xff] %v8374_v3  ;;  %v8378_v5 = vadd.f32 %v4478_v21, %v8738_v17  ;;  %v5463_v52 = vpop.f32.mrb[120].mxu1  ;;  %v5527_v57 = vpop.f32.mrb[120].mxu0  ;;  %4600 = vadd.xlane.f32.xlu1 (!%p5290_p6), %v4583_v47  ;;  %4614 = vadd.xlane.f32.xlu0 (!%p5290_p6), %v4590_v29  ;;  %v4592_v4 = vmul.f32 (!%p5290_p6), %v8374_v3, %v8374_v3  ;;  %v6328_v21 = vld [vmem:[%s8703_s9 + $0x34] ss:$8 sps:$4 sm:$0xff] (!%p5290_p6)  }
 0xc6d   : > { %v5464_v16 = vpop.f32.mrb[121].mxu1  ;;  %v5528_v6 = vpop.f32.mrb[121].mxu0  ;;  %v6330_v17 = vld [vmem:[%s8703_s9 + $0x30] ss:$8 sps:$4 sm:$0xff] (!%p5290_p6)  }
 0xc6e   : > { %4524 = vst [vmem:[#allocation2 + $0x58] sm:$0xff] %v8378_v5  ;;  %v5465_v43 = vadd.f32 %v5464_v16, %v5463_v52  ;;  %v5529_v24 = vadd.f32 %v5528_v6, %v5527_v57  ;;  %v5466_v15 = vpop.f32.mrb[122].mxu1  ;;  %v5530_v55 = vpop.f32.mrb[122].mxu0  ;;  %4871 = vmatpush1.bf16.msra.mxu0 (!%p5290_p6), %v6324_v54  ;;  %5740 = vmatpush1.bf16.msra.mxu1 (!%p5290_p6), %v6324_v54  ;;  %v6331_v52 = vld [vmem:[%s8703_s9 + $0x44] ss:$8 sps:$4 sm:$0xff] (!%p5290_p6)  }
 0xc6f   : > { %v5467_v36 = vpop.f32.mrb[123].mxu1  ;;  %v5531_v34 = vpop.f32.mrb[123].mxu0  ;;  %4872 = vmatprep.subr.bf16.mxu0 (!%p5290_p6), %v6325_v18  ;;  %5733 = vmatprep.subr.bf16.mxu1 (!%p5290_p6), %v6325_v18  ;;  %v4593_v14 = vmul.f32 (!%p5290_p6), %v8378_v5, %v8378_v5  ;;  %v6333_v57 = vld [vmem:[%s8703_s9 + $0x40] ss:$8 sps:$4 sm:$0xff] (!%p5290_p6)   ;;  %v6334_v16 = vld [vmem:[%s8703_s9 + $0x54] ss:$8 sps:$4 sm:$0xff] (!%p5290_p6)  }
 0xc70   : > { %v4483_v22 = vadd.f32 %v5529_v24, %v5465_v43  ;;  %v5468_v42 = vadd.f32 %v5467_v36, %v5466_v15  ;;  %v5532_v8 = vadd.f32 %v5531_v34, %v5530_v55  ;;  %4616 = vadd.xlane.f32.xlu1 (!%p5290_p6), %v4591_v32  ;;  %4538 = vadd.xlane.f32.xlu0 (!%p5290_p6), %v8342_v50  ;;  %v6336_v6 = vld [vmem:[%s8703_s9 + $0x50] ss:$8 sps:$4 sm:$0xff] (!%p5290_p6)   ;;  %v6337_v15 = vld [vmem:[%s8703_s9 + $0x64] ss:$8 sps:$4 sm:$0xff] (!%p5290_p6)   ;;  %v6339_v55 = vld [vmem:[%s8703_s9 + $0x60] ss:$8 sps:$4 sm:$0xff] (!%p5290_p6)  }
 0xc71   : > { %v4587_v43 = vmul.f32 (!%p5290_p6), %v8354_v45, %v8354_v45  ;;  %v4586_v24 = vmul.f32 (!%p5290_p6), %v8350_v58, %v8350_v58 }
 0xc72   : > { %v8382_v63 = vadd.f32 %v4483_v22, %v8739_v7  ;;  %v4486_v23 = vadd.f32 %v5532_v8, %v5468_v42  ;;  %4873 = vmatpush1.bf16.msra.mxu0 (!%p5290_p6), %v6327_v56  ;;  %5741 = vmatpush1.bf16.msra.mxu1 (!%p5290_p6), %v6327_v56  ;;  %v6340_v22 = vld [vmem:[%s8703_s9 + $0x74] ss:$8 sps:$4 sm:$0xff] (!%p5290_p6)   ;;  %v6342_v42 = vld [vmem:[%s8703_s9 + $0x70] ss:$8 sps:$4 sm:$0xff] (!%p5290_p6)   ;;  %v6401_v8 = vmov (!%p5290_p6), 0   ;;  %v4589_v7 = vmul.f32 (!%p5290_p6), %v8362_v49, %v8362_v49 }
 0xc73   : > { %4874 = vmatprep.subr.bf16.mxu0 (!%p5290_p6), %v6328_v21  ;;  %5734 = vmatprep.subr.bf16.mxu1 (!%p5290_p6), %v6328_v21 }
 0xc74   : > { %4525 = vst [vmem:[#allocation2 + $0x60] sm:$0xff] %v8382_v63  ;;  %v8386_v30 = vadd.f32 %v4486_v23, %v8740_v27  ;;  %v5469_v20 = vpop.f32.mrb[124].mxu1  ;;  %v5533_v11 = vpop.f32.mrb[124].mxu0  ;;  %4540 = vadd.xlane.f32.xlu1 (!%p5290_p6), %v8346_v62  ;;  %4554 = vadd.xlane.f32.xlu0 (!%p5290_p6), %v8374_v3  ;;  %v4594_v34 = vmul.f32 (!%p5290_p6), %v8382_v63, %v8382_v63 }
 0xc75   : > { %v5470_v40 = vpop.f32.mrb[125].mxu1  ;;  %v5534_v59 = vpop.f32.mrb[125].mxu0  ;;  %4900 = vmatprep.mubr.bf16.mxu0 (!%p5290_p6), %v6401_v8  ;;  %4940 = vmatprep.mubr.bf16.mxu1 (!%p5290_p6), %v6401_v8  ;;  %v4588_v23 = vmul.f32 (!%p5290_p6), %v8358_v12, %v8358_v12 }
 0xc76   : > { %4526 = vst [vmem:[#allocation2 + $0x68] sm:$0xff] %v8386_v30  ;;  %v5471_v1 = vadd.f32 %v5470_v40, %v5469_v20  ;;  %v5535_v10 = vadd.f32 %v5534_v59, %v5533_v11  ;;  %v5472_v39 = vpop.f32.mrb[126].mxu1  ;;  %v5536_v31 = vpop.f32.mrb[126].mxu0  ;;  %4875 = vmatpush1.bf16.msra.mxu0 (!%p5290_p6), %v6330_v17  ;;  %5742 = vmatpush1.bf16.msra.mxu1 (!%p5290_p6), %v6330_v17 }
 0xc77   : > { %v5473_v53 = vpop.f32.mrb[127].mxu1  ;;  %v5537_v41 = vpop.f32.mrb[127].mxu0  ;;  %4876 = vmatprep.subr.bf16.mxu0 (!%p5290_p6), %v6331_v52  ;;  %5735 = vmatprep.subr.bf16.mxu1 (!%p5290_p6), %v6331_v52  ;;  %v4595_v36 = vmul.f32 (!%p5290_p6), %v8386_v30, %v8386_v30 }
 0xc78   : > { %v4491_v26 = vadd.f32 %v5535_v10, %v5471_v1  ;;  %v5474_v51 = vadd.f32 %v5473_v53, %v5472_v39  ;;  %v5538_v38 = vadd.f32 %v5537_v41, %v5536_v31  ;;  %4532 = sbr.rel (%p5290_p6) target bundleno = 3614 (0xe1e), region = 68  ;;  %4556 = vadd.xlane.f32.xlu1 (!%p5290_p6), %v8378_v5  ;;  %4602 = vadd.xlane.f32.xlu0 (!%p5290_p6), %v4584_v61  ;;  %v4535_v40 = vpop.xlane.xlu0 (!%p5290_p6), %4534 }
 0xc79   : > { %v4566_v10 = vmul.f32 (!%p5290_p6), 0.0078125, %v4535_v40 }
 0xc7a   : > { %v8390_v46 = vadd.f32 %v4491_v26, %v8741_v0  ;;  %v4494_v35 = vadd.f32 %v5538_v38, %v5474_v51  ;;  %4877 = vmatpush1.bf16.msra.mxu0 (!%p5290_p6), %v6333_v57  ;;  %5743 = vmatpush1.bf16.msra.mxu1 (!%p5290_p6), %v6333_v57 }
 0xc7b   : > { %4878 = vmatprep.subr.bf16.mxu0 (!%p5290_p6), %v6334_v16  ;;  %5736 = vmatprep.subr.bf16.mxu1 (!%p5290_p6), %v6334_v16  ;;  %v4646_v51 = vmul.f32 (!%p5290_p6), %v4566_v10, %v4566_v10 }
 0xc7c   : > { %4527 = vst [vmem:[#allocation2 + $0x70] sm:$0xff] %v8390_v46  ;;  %v8394_v33 = vadd.f32 %v4494_v35, %v8742_v19  ;;  %4604 = vadd.xlane.f32.xlu1 (!%p5290_p6), %v4585_v2  ;;  %4618 = vadd.xlane.f32.xlu0 (!%p5290_p6), %v4592_v4  ;;  %v4596_v20 = vmul.f32 (!%p5290_p6), %v8390_v46, %v8390_v46  ;;  %v4537_v1 = vpop.xlane.xlu0 (!%p5290_p6), %4536 }
 0xc7d   : > { %v4567_v39 = vmul.f32 (!%p5290_p6), 0.0078125, %v4537_v1 }
 0xc7e   : > { %4528 = vst [vmem:[#allocation2 + $0x78] sm:$0xff] %v8394_v33  ;;  %4879 = vmatpush1.bf16.msra.mxu0 (!%p5290_p6), %v6336_v6  ;;  %5744 = vmatpush1.bf16.msra.mxu1 (!%p5290_p6), %v6336_v6  ;;  %v4597_v27 = vmul.f32 (!%p5290_p6), %v8394_v33, %v8394_v33  ;;  %v4678_v6 = vsub.f32 (!%p5290_p6), %v8334_v28, %v4566_v10  ;;  %v8521_v28 = vld [vmem:[%s8702_s8] ss:$0 sm:$0xff] (!%p5290_p6) }
 0xc7f   : > { %4880 = vmatprep.subr.bf16.mxu0 %v6337_v15  ;;  %5737 = vmatprep.subr.bf16.mxu1 %v6337_v15  ;;  %v4647_v38 = vmul.f32 %v4567_v39, %v4567_v39 }
 0xc80   : > { %4620 = vadd.xlane.f32.xlu1 %v4593_v14  ;;  %4542 = vadd.xlane.f32.xlu0 %v8350_v58 }
 0xc82   : > { %4881 = vmatpush1.bf16.msra.mxu0 %v6339_v55  ;;  %5745 = vmatpush1.bf16.msra.mxu1 %v6339_v55 }
 0xc83   : > { %4882 = vmatprep.subr.bf16.mxu0 %v6340_v22  ;;  %5738 = vmatprep.subr.bf16.mxu1 %v6340_v22 }
 0xc84   : > { %4544 = vadd.xlane.f32.xlu1 %v8354_v45  ;;  %4558 = vadd.xlane.f32.xlu0 %v8382_v63 }
 0xc86   : > { %4883 = vmatpush1.bf16.msra.mxu0 %v6342_v42  ;;  %5746 = vmatpush1.bf16.msra.mxu1 %v6342_v42 }
 0xc88   : > { %4560 = vadd.xlane.f32.xlu1 %v8386_v30  ;;  %4606 = vadd.xlane.f32.xlu0 %v4586_v24 }
 0xc8c   : > { %4608 = vadd.xlane.f32.xlu1 %v4587_v43  ;;  %4622 = vadd.xlane.f32.xlu0 %v4594_v34  ;;  %v4679_v43 = vsub.f32 %v8338_v60, %v4567_v39 }
 0xc90   : > { %4624 = vadd.xlane.f32.xlu1 %v4595_v36  ;;  %4546 = vadd.xlane.f32.xlu0 %v8358_v12 }
 0xc94   : > { %4548 = vadd.xlane.f32.xlu1 %v8362_v49  ;;  %4562 = vadd.xlane.f32.xlu0 %v8390_v46 }
 0xc98   : > { %4564 = vadd.xlane.f32.xlu1 %v8394_v33  ;;  %4610 = vadd.xlane.f32.xlu0 %v4588_v23 }
 0xc9c   : > { %4612 = vadd.xlane.f32.xlu1 %v4589_v7  ;;  %4626 = vadd.xlane.f32.xlu0 %v4596_v20 }
 0xca0   : > { %4628 = vadd.xlane.f32.xlu1 %v4597_v27 }
 0xcf1   : > { %v4551_v11 = vpop.xlane.xlu1 %4550 }
 0xcf2   : > { %v8496_v31 = vmul.f32 0.0078125, %v4551_v11 }
 0xcf4   : > { %v4654_v25 = vmul.f32 %v8496_v31, %v8496_v31  ;;  %v4686_v20 = vsub.f32 %v8366_v44, %v8496_v31 }
 0xcf5   : > { %v4553_v59 = vpop.xlane.xlu1 %4552  ;;  %v4599_v26 = vpop.xlane.xlu0 %4598 }
 0xcf6   : > { %v8498_v53 = vmul.f32 0.0078125, %v4553_v59  ;;  %v4630_v35 = vmul.f32 0.0078125, %v4599_v26 }
 0xcf8   : > { %v4662_v47 = vsub.f32 %v4630_v35, %v4646_v51  ;;  %v4655_v32 = vmul.f32 %v8498_v53, %v8498_v53  ;;  %v4687_v1 = vsub.f32 %v8370_v48, %v8498_v53 }
 0xcf9   : > { %v4601_v41 = vpop.xlane.xlu1 %4600  ;;  %v4615_v37 = vpop.xlane.xlu0 %4614 }
 0xcfa   : > { %v4631_v0 = vmul.f32 0.0078125, %v4601_v41  ;;  %v4694_v9 = vadd.f32 1e-05, %v4662_v47  ;;  %v4638_v18 = vmul.f32 0.0078125, %v4615_v37 }
 0xcfc   : > { %v4663_v19 = vsub.f32 %v4631_v0, %v4647_v38  ;;  %v4670_v61 = vsub.f32 %v4638_v18, %v4654_v25 }
 0xcfd   : > { %v4617_v29 = vpop.xlane.xlu1 %4616  ;;  %v4539_v14 = vpop.xlane.xlu0 %4538 }
 0xcfe   : > { %v4695_v13 = vadd.f32 1e-05, %v4663_v19  ;;  %v4639_v54 = vmul.f32 0.0078125, %v4617_v29  ;;  %v4702_v21 = vadd.f32 1e-05, %v4670_v61  ;;  %v8506_v16 = vmul.f32 0.0078125, %v4539_v14 }
 0xd00   : > { %6343 = vrsqrt.f32 %v4695_v13  ;;  %v4671_v2 = vsub.f32 %v4639_v54, %v4655_v32  ;;  %v4648_v42 = vmul.f32 %v8506_v16, %v8506_v16 }
 0xd01   : > { %6345 = vrsqrt.f32 %v4694_v9  ;;  %v4541_v56 = vpop.xlane.xlu1 %4540  ;;  %v4555_v52 = vpop.xlane.xlu0 %4554 }
 0xd02   : > { %v4703_v4 = vadd.f32 1e-05, %v4671_v2  ;;  %v8504_v57 = vmul.f32 0.0078125, %v4541_v56  ;;  %v8512_v15 = vmul.f32 0.0078125, %v4555_v52  ;;  %v4680_v52 = vsub.f32 %v8342_v50, %v8506_v16 }
 0xd04   : > { %6347 = vrsqrt.f32 %v4703_v4  ;;  %v4649_v22 = vmul.f32 %v8504_v57, %v8504_v57  ;;  %v4656_v39 = vmul.f32 %v8512_v15, %v8512_v15 }
 0xd05   : > { %6349 = vrsqrt.f32 %v4702_v21  ;;  %v4557_v17 = vpop.xlane.xlu1 %4556  ;;  %v4603_v36 = vpop.xlane.xlu0 %4602 }
 0xd06   : > { %v8510_v24 = vmul.f32 0.0078125, %v4557_v17  ;;  %v4632_v23 = vmul.f32 0.0078125, %v4603_v36  ;;  %v4681_v17 = vsub.f32 %v8346_v62, %v8504_v57 }
 0xd08   : > { %v4664_v40 = vsub.f32 %v4632_v23, %v4648_v42  ;;  %v4657_v10 = vmul.f32 %v8510_v24, %v8510_v24  ;;  %v4689_v50 = vsub.f32 %v8378_v5, %v8510_v24 }
 0xd09   : > { %v4605_v55 = vpop.xlane.xlu1 %4604  ;;  %v4619_v26 = vpop.xlane.xlu0 %4618 }
 0xd0a   : > { %v6344_v34 = vpop.eup %6343  ;;  %v4633_v7 = vmul.f32 0.0078125, %v4605_v55  ;;  %v4696_v35 = vadd.f32 1e-05, %v4664_v40  ;;  %v4640_v31 = vmul.f32 0.0078125, %v4619_v26 }
 0xd0b   : > { %v6346_v60 = vpop.eup %6345  ;;  %v4727_v27 = vmul.f32 %v6344_v34, %v4679_v43 }
 0xd0c   : > { %v4665_v11 = vsub.f32 %v4633_v7, %v4649_v22  ;;  %v4726_v59 = vmul.f32 %v6346_v60, %v4678_v6  ;;  %v4672_v53 = vsub.f32 %v4640_v31, %v4656_v39 }
 0xd0d   : > { %v4621_v41 = vpop.xlane.xlu1 %4620  ;;  %v4749_v51 = vmul.f32 %v8521_v28, %v4727_v27  ;;  %v4543_v37 = vpop.xlane.xlu0 %4542 }
 0xd0e   : > { %v6348_v38 = vpop.eup %6347  ;;  %v4697_v0 = vadd.f32 1e-05, %v4665_v11  ;;  %v4641_v44 = vmul.f32 0.0078125, %v4621_v41  ;;  %v4748_v47 = vmul.f32 %v8521_v28, %v4726_v59  ;;  %v4704_v18 = vadd.f32 1e-05, %v4672_v53 }
 0xd0f   : > { %v6350_v19 = vpop.eup %6349  ;;  %v4735_v25 = vmul.f32 %v6348_v38, %v4687_v1  ;;  %v8538_v21 = vmul.f32 0.0078125, %v4543_v37 }
 0xd10   : > { %6351 = vrsqrt.f32 %v4697_v0  ;;  %v4673_v48 = vsub.f32 %v4641_v44, %v4657_v10  ;;  %v4734_v32 = vmul.f32 %v6350_v19, %v4686_v20  ;;  %v4764_v13 = vpack.c.bf16 %v4749_v51, %v4748_v47 }
 0xd11   : > { %6353 = vrsqrt.f32 %v4696_v35  ;;  %v4545_v29 = vpop.xlane.xlu1 %4544  ;;  %v4757_v9 = vmul.f32 %v8521_v28, %v4735_v25  ;;  %v4559_v56 = vpop.xlane.xlu0 %4558  ;;  %v4650_v42 = vmul.f32 %v8538_v21, %v8538_v21  ;;  %v4688_v20 = vsub.f32 %v8374_v3, %v8512_v15 }
 0xd12   : > { %v4705_v54 = vadd.f32 1e-05, %v4673_v48  ;;  %4901 = vmatmul.mubr.bf16.vlgmr.msra.gmra.mrb[0].mxu0 %v4764_v13  ;;  %v4756_v2 = vmul.f32 %v8521_v28, %v4734_v32  ;;  %v8536_v4 = vmul.f32 0.0078125, %v4545_v29  ;;  %v8547_v43 = vmul.f32 0.0078125, %v4559_v56 }
 0xd13   : > { %4910 = vmatprep.mubr.bf16.mxu0 %v6401_v8 }
 0xd14   : > { %6355 = vrsqrt.f32 %v4705_v54  ;;  %v4768_v14 = vpack.c.bf16 %v4757_v9, %v4756_v2  ;;  %v4651_v22 = vmul.f32 %v8536_v4, %v8536_v4  ;;  %v4658_v40 = vmul.f32 %v8547_v43, %v8547_v43 }
 0xd15   : > { %6357 = vrsqrt.f32 %v4704_v18  ;;  %v4561_v61 = vpop.xlane.xlu1 %4560  ;;  %v4607_v36 = vpop.xlane.xlu0 %4606  ;;  %v4683_v54 = vsub.f32 %v8354_v45, %v8536_v4  ;;  %v4682_v18 = vsub.f32 %v8350_v58, %v8538_v21  ;;  %v4690_v58 = vsub.f32 %v8382_v63, %v8547_v43 }
 0xd16   : > { %4941 = vmatmul.mubr.bf16.vlgmr.msra.gmra.mrb[0].mxu1 %v4768_v14  ;;  %v8545_v6 = vmul.f32 0.0078125, %v4561_v61  ;;  %v4634_v23 = vmul.f32 0.0078125, %v4607_v36 }
 0xd17   : > { %4950 = vmatprep.mubr.bf16.mxu1 %v6401_v8 }
 0xd18   : > { %v4666_v16 = vsub.f32 %v4634_v23, %v4650_v42  ;;  %v4659_v11 = vmul.f32 %v8545_v6, %v8545_v6 }
 0xd19   : > { %v4609_v55 = vpop.xlane.xlu1 %4608  ;;  %v4623_v1 = vpop.xlane.xlu0 %4622 }
 0xd1a   : > { %v6352_v34 = vpop.eup %6351  ;;  %v4635_v7 = vmul.f32 0.0078125, %v4609_v55  ;;  %v4698_v26 = vadd.f32 1e-05, %v4666_v16  ;;  %v4642_v24 = vmul.f32 0.0078125, %v4623_v1 }
 0xd1b   : > { %v6354_v60 = vpop.eup %6353  ;;  %v4729_v62 = vmul.f32 %v6352_v34, %v4681_v17 }
 0xd1c   : > { %v4667_v57 = vsub.f32 %v4635_v7, %v4651_v22  ;;  %v4728_v27 = vmul.f32 %v6354_v60, %v4680_v52  ;;  %v4674_v15 = vsub.f32 %v4642_v24, %v4658_v40  ;;  %v4691_v7 = vsub.f32 %v8386_v30, %v8545_v6 }
 0xd1d   : > { %v4625_v59 = vpop.xlane.xlu1 %4624  ;;  %v4751_v10 = vmul.f32 %v8521_v28, %v4729_v62  ;;  %v4547_v31 = vpop.xlane.xlu0 %4546 }
 0xd1e   : > { %v6356_v39 = vpop.eup %6355  ;;  %v4699_v41 = vadd.f32 1e-05, %v4667_v57  ;;  %v4643_v5 = vmul.f32 0.0078125, %v4625_v59  ;;  %v4750_v38 = vmul.f32 %v8521_v28, %v4728_v27  ;;  %v4706_v48 = vadd.f32 1e-05, %v4674_v15 }
 0xd1f   : > { %v6358_v51 = vpop.eup %6357  ;;  %v4737_v0 = vmul.f32 %v6356_v39, %v4689_v50  ;;  %v4572_v9 = vmul.f32 0.0078125, %v4547_v31 }
 0xd20   : > { %6359 = vrsqrt.f32 %v4699_v41  ;;  %v4675_v3 = vsub.f32 %v4643_v5, %v4659_v11  ;;  %v4736_v35 = vmul.f32 %v6358_v51, %v4688_v20  ;;  %v4765_v19 = vpack.c.bf16 %v4751_v10, %v4750_v38 }
 0xd21   : > { %6361 = vrsqrt.f32 %v4698_v26  ;;  %v4549_v44 = vpop.xlane.xlu1 %4548  ;;  %v4759_v47 = vmul.f32 %v8521_v28, %v4737_v0  ;;  %v4563_v29 = vpop.xlane.xlu0 %4562  ;;  %v4652_v55 = vmul.f32 %v4572_v9, %v4572_v9  ;;  %v4684_v0 = vsub.f32 %v8358_v12, %v4572_v9 }
 0xd22   : > { %v4707_v25 = vadd.f32 1e-05, %v4675_v3  ;;  %4911 = vmatmul.mubr.bf16.gmra.mrb[4].mxu0 %v4765_v19  ;;  %v4758_v53 = vmul.f32 %v8521_v28, %v4736_v35  ;;  %v4573_v13 = vmul.f32 0.0078125, %v4549_v44  ;;  %v4580_v61 = vmul.f32 0.0078125, %v4563_v29 }
 0xd23   : > { %4920 = vmatprep.mubr.bf16.mxu0 %v6401_v8 }
 0xd24   : > { %6363 = vrsqrt.f32 %v4707_v25  ;;  %v4769_v37 = vpack.c.bf16 %v4759_v47, %v4758_v53  ;;  %v4653_v52 = vmul.f32 %v4573_v13, %v4573_v13  ;;  %v4660_v21 = vmul.f32 %v4580_v61, %v4580_v61 }
 0xd25   : > { %6365 = vrsqrt.f32 %v4706_v48  ;;  %v4565_v32 = vpop.xlane.xlu1 %4564  ;;  %v4611_v14 = vpop.xlane.xlu0 %4610  ;;  %v4685_v51 = vsub.f32 %v8362_v49, %v4573_v13  ;;  %v4692_v47 = vsub.f32 %v8390_v46, %v4580_v61 }
 0xd26   : > { %4951 = vmatmul.mubr.bf16.gmra.mrb[4].mxu1 %v4769_v37  ;;  %v4581_v2 = vmul.f32 0.0078125, %v4565_v32  ;;  %v4636_v34 = vmul.f32 0.0078125, %v4611_v14 }
 0xd27   : > { %4960 = vmatprep.mubr.bf16.mxu1 %v6401_v8 }
 0xd28   : > { %v4668_v60 = vsub.f32 %v4636_v34, %v4652_v55  ;;  %v4661_v4 = vmul.f32 %v4581_v2, %v4581_v2  ;;  %v4693_v44 = vsub.f32 %v8394_v33, %v4581_v2 }
 0xd29   : > { %v4613_v56 = vpop.xlane.xlu1 %4612  ;;  %v4627_v50 = vpop.xlane.xlu0 %4626 }
 0xd2a   : > { %v6360_v17 = vpop.eup %6359  ;;  %v4637_v36 = vmul.f32 0.0078125, %v4613_v56  ;;  %v4700_v20 = vadd.f32 1e-05, %v4668_v60  ;;  %v4644_v40 = vmul.f32 0.0078125, %v4627_v50 }
 0xd2b   : > { %v6362_v22 = vpop.eup %6361  ;;  %v4731_v42 = vmul.f32 %v6360_v17, %v4683_v54 }
 0xd2c   : > { %v4669_v23 = vsub.f32 %v4637_v36, %v4653_v52  ;;  %v4730_v45 = vmul.f32 %v6362_v22, %v4682_v18  ;;  %v4676_v10 = vsub.f32 %v4644_v40, %v4660_v21 }
 0xd2d   : > { %v4629_v62 = vpop.xlane.xlu1 %4628  ;;  %v4753_v57 = vmul.f32 %v8521_v28, %v4731_v42 }
 0xd2e   : > { %v6364_v16 = vpop.eup %6363  ;;  %v4701_v27 = vadd.f32 1e-05, %v4669_v23  ;;  %v4645_v11 = vmul.f32 0.0078125, %v4629_v62  ;;  %v4752_v30 = vmul.f32 %v8521_v28, %v4730_v45  ;;  %v4708_v26 = vadd.f32 1e-05, %v4676_v10 }
 0xd2f   : > { %v6366_v59 = vpop.eup %6365  ;;  %v4739_v6 = vmul.f32 %v6364_v16, %v4691_v7 }
 0xd30   : > { %6367 = vrsqrt.f32 %v4701_v27  ;;  %v4677_v1 = vsub.f32 %v4645_v11, %v4661_v4  ;;  %v4738_v39 = vmul.f32 %v6366_v59, %v4690_v58  ;;  %v4766_v63 = vpack.c.bf16 %v4753_v57, %v4752_v30 }
 0xd31   : > { %6369 = vrsqrt.f32 %v4700_v20  ;;  %v4761_v43 = vmul.f32 %v8521_v28, %v4739_v6 }
 0xd32   : > { %v4709_v41 = vadd.f32 1e-05, %v4677_v1  ;;  %v4760_v5 = vmul.f32 %v8521_v28, %v4738_v39  ;;  %4921 = vmatmul.mubr.bf16.gmra.mrb[8].mxu0 %v4766_v63 }
 0xd33   : > { %4930 = vmatprep.mubr.bf16.mxu0 %v6401_v8 }
 0xd34   : > { %6371 = vrsqrt.f32 %v4709_v41  ;;  %v4770_v24 = vpack.c.bf16 %v4761_v43, %v4760_v5 }
 0xd35   : > { %6373 = vrsqrt.f32 %v4708_v26 }
 0xd36   : > { %4961 = vmatmul.mubr.bf16.gmra.mrb[8].mxu1 %v4770_v24 }
 0xd37   : > { %4970 = vmatprep.mubr.bf16.mxu1 %v6401_v8 }
 0xd3a   : > { %v6368_v38 = vpop.eup %6367 }
 0xd3b   : > { %v6370_v3 = vpop.eup %6369  ;;  %v4733_v15 = vmul.f32 %v6368_v38, %v4685_v51 }
 0xd3c   : > { %v4732_v35 = vmul.f32 %v6370_v3, %v4684_v0 }
 0xd3d   : > { %v4755_v31 = vmul.f32 %v8521_v28, %v4733_v15 }
 0xd3e   : > { %v6372_v19 = vpop.eup %6371  ;;  %v4754_v25 = vmul.f32 %v8521_v28, %v4732_v35 }
 0xd3f   : > { %v6374_v48 = vpop.eup %6373  ;;  %v4741_v53 = vmul.f32 %v6372_v19, %v4693_v44 }
 0xd40   : > { %v4767_v8 = vpack.c.bf16 %v4755_v31, %v4754_v25  ;;  %v4740_v32 = vmul.f32 %v6374_v48, %v4692_v47 }
 0xd41   : > { %v4763_v49 = vmul.f32 %v8521_v28, %v4741_v53 }
 0xd42   : > { %4931 = vmatmul.mubr.bf16.gmra.mrb[12].mxu0 %v4767_v8  ;;  %v4762_v12 = vmul.f32 %v8521_v28, %v4740_v32 }
 0xd44   : > { %v4771_v29 = vpack.c.bf16 %v4763_v49, %v4762_v12 }
 0xd46   : > { %4971 = vmatmul.mubr.bf16.gmra.mrb[12].mxu1 %v4771_v29 }
 0xde5   : > { %v4902_v37 = vpop.f32.mrb[0].mxu0 }
 0xde6   : > { %4981 = vst [vmem:[%s8704_s10] sm:$0xff] %v4902_v37  ;;  %v4904_v33 = vpop.f32.mrb[1].mxu0 }
 0xde7   : > { %4982 = vst [vmem:[%s8704_s10 + $0x8] sm:$0xff] %v4904_v33  ;;  %v4906_v46 = vpop.f32.mrb[2].mxu0 }
 0xde8   : > { %4983 = vst [vmem:[%s8704_s10 + $0x10] sm:$0xff] %v4906_v46  ;;  %v4908_v13 = vpop.f32.mrb[3].mxu0 }
 0xde9   : > { %4984 = vst [vmem:[%s8704_s10 + $0x18] sm:$0xff] %v4908_v13  ;;  %v4942_v28 = vpop.f32.mrb[0].mxu1 }
 0xdea   : > { %4997 = vst [vmem:[%s8704_s10 + $0x80] sm:$0xff] %v4942_v28  ;;  %v4944_v9 = vpop.f32.mrb[1].mxu1 }
 0xdeb   : > { %4998 = vst [vmem:[%s8704_s10 + $0x88] sm:$0xff] %v4944_v9  ;;  %v4946_v54 = vpop.f32.mrb[2].mxu1 }
 0xdec   : > { %4999 = vst [vmem:[%s8704_s10 + $0x90] sm:$0xff] %v4946_v54  ;;  %v4948_v18 = vpop.f32.mrb[3].mxu1 }
 0xded   : > { %5000 = vst [vmem:[%s8704_s10 + $0x98] sm:$0xff] %v4948_v18 }
 0xdf5   : > { %v4912_v2 = vpop.f32.mrb[4].mxu0 }
 0xdf6   : > { %4985 = vst [vmem:[%s8704_s10 + $0x20] sm:$0xff] %v4912_v2  ;;  %v4914_v61 = vpop.f32.mrb[5].mxu0 }
 0xdf7   : > { %4986 = vst [vmem:[%s8704_s10 + $0x28] sm:$0xff] %v4914_v61  ;;  %v4916_v56 = vpop.f32.mrb[6].mxu0 }
 0xdf8   : > { %4987 = vst [vmem:[%s8704_s10 + $0x30] sm:$0xff] %v4916_v56  ;;  %v4918_v14 = vpop.f32.mrb[7].mxu0 }
 0xdf9   : > { %4988 = vst [vmem:[%s8704_s10 + $0x38] sm:$0xff] %v4918_v14  ;;  %v4952_v17 = vpop.f32.mrb[4].mxu1 }
 0xdfa   : > { %5001 = vst [vmem:[%s8704_s10 + $0xa0] sm:$0xff] %v4952_v17  ;;  %v4954_v52 = vpop.f32.mrb[5].mxu1 }
 0xdfb   : > { %5002 = vst [vmem:[%s8704_s10 + $0xa8] sm:$0xff] %v4954_v52  ;;  %v4956_v55 = vpop.f32.mrb[6].mxu1 }
 0xdfc   : > { %5003 = vst [vmem:[%s8704_s10 + $0xb0] sm:$0xff] %v4956_v55  ;;  %v4958_v36 = vpop.f32.mrb[7].mxu1 }
 0xdfd   : > { %5004 = vst [vmem:[%s8704_s10 + $0xb8] sm:$0xff] %v4958_v36 }
 0xe05   : > { %v4922_v34 = vpop.f32.mrb[8].mxu0 }
 0xe06   : > { %4989 = vst [vmem:[%s8704_s10 + $0x40] sm:$0xff] %v4922_v34  ;;  %v4924_v22 = vpop.f32.mrb[9].mxu0 }
 0xe07   : > { %4990 = vst [vmem:[%s8704_s10 + $0x48] sm:$0xff] %v4924_v22  ;;  %v4926_v42 = vpop.f32.mrb[10].mxu0 }
 0xe08   : > { %4991 = vst [vmem:[%s8704_s10 + $0x50] sm:$0xff] %v4926_v42  ;;  %v4928_v7 = vpop.f32.mrb[11].mxu0 }
 0xe09   : > { %v4962_v23 = vpop.f32.mrb[8].mxu1  ;;  %4992 = vst [vmem:[%s8704_s10 + $0x58] sm:$0xff] %v4928_v7 }
 0xe0a   : > { %5005 = vst [vmem:[%s8704_s10 + $0xc0] sm:$0xff] %v4962_v23  ;;  %v4964_v60 = vpop.f32.mrb[9].mxu1 }
 0xe0b   : > { %5006 = vst [vmem:[%s8704_s10 + $0xc8] sm:$0xff] %v4964_v60  ;;  %v4966_v45 = vpop.f32.mrb[10].mxu1 }
 0xe0c   : > { %5007 = vst [vmem:[%s8704_s10 + $0xd0] sm:$0xff] %v4966_v45  ;;  %v4968_v58 = vpop.f32.mrb[11].mxu1 }
 0xe0d   : > { %5008 = vst [vmem:[%s8704_s10 + $0xd8] sm:$0xff] %v4968_v58 }
 0xe15   : > { %v4932_v4 = vpop.f32.mrb[12].mxu0 }
 0xe16   : > { %4993 = vst [vmem:[%s8704_s10 + $0x60] sm:$0xff] %v4932_v4  ;;  %v4934_v21 = vpop.f32.mrb[13].mxu0 }
 0xe17   : > { %4994 = vst [vmem:[%s8704_s10 + $0x68] sm:$0xff] %v4934_v21  ;;  %v4936_v62 = vpop.f32.mrb[14].mxu0 }
 0xe18   : > { %4995 = vst [vmem:[%s8704_s10 + $0x70] sm:$0xff] %v4936_v62  ;;  %v4938_v50 = vpop.f32.mrb[15].mxu0 }
 0xe19   : > { %4996 = vst [vmem:[%s8704_s10 + $0x78] sm:$0xff] %v4938_v50  ;;  %v4972_v57 = vpop.f32.mrb[12].mxu1 }
 0xe1a   : > { %5009 = vst [vmem:[%s8704_s10 + $0xe0] sm:$0xff] %v4972_v57  ;;  %v4974_v16 = vpop.f32.mrb[13].mxu1 }
 0xe1b   : > { %5010 = vst [vmem:[%s8704_s10 + $0xe8] sm:$0xff] %v4974_v16  ;;  %v4976_v27 = vpop.f32.mrb[14].mxu1 }
 0xe1c   : > { %5011 = vst [vmem:[%s8704_s10 + $0xf0] sm:$0xff] %v4976_v27  ;;  %v4978_v20 = vpop.f32.mrb[15].mxu1 }
 0xe1d   : > { %5012 = vst [vmem:[%s8704_s10 + $0xf8] sm:$0xff] %v4978_v20 }
 0xe1e PF: > { %s20_s15 = sadd.s32 1, %s6397_s15   ;;  %s8743_s13 = sld [smem:[#allocation3_spill]] }
 0xe1f   : > { %p17_p7 = scmp.ge.s32.totalorder %s20_s15, 4   ;;  %s8744_s14 = sld [smem:[#allocation4_spill]] }
 0xe21   :  { %19 = sbr.rel (!%p17_p7) target bundleno = 2 (0x2), region = 116 }

</bundles_post_ra>
